<compile_context>
chip_gen: v5e
topology: v5e:2x2
jax: 0.10.0
libtpu: 0.0.40
codegen_flags: <defaults>
</compile_context>

<pallas_src>
import functools
import math

import jax
import jax.numpy as jnp
from jax.experimental import pallas as pl
from jax.experimental.pallas import tpu as pltpu


# ----------------------------------------------------------------------------
# Fused kernel: embedding -> encoder GRU -> decoder GRU -> l2norm/fc/PReLU head
# ----------------------------------------------------------------------------
def fused_net_kernel(tok_ref, emb_ref,
                     e_wih_ref, e_whh_ref, e_bih_ref, e_bhh_ref,
                     d_wih_ref, d_whh_ref, d_bih_ref, d_bhh_ref,
                     fcw_ref, fcb_ref, a_ref,
                     o_ref, *, B, S):
    V, E = emb_ref.shape
    H = e_whh_ref.shape[0]
    SB = S * B

    # --- frozen embedding lookup, fused as a one-hot matmul on the MXU -------
    tok = tok_ref[...]                                             # (SB, 1) int32, time-major
    vocab_ids = jax.lax.broadcasted_iota(jnp.int32, (SB, V), 1)    # lane-dim iota
    one_hot = (vocab_ids == tok).astype(jnp.float32)               # (SB, V)
    x_all = jnp.dot(one_hot, emb_ref[...],
                    preferred_element_type=jnp.float32)            # (SB, E), row t*B+b

    def run_gru(wih, whh, bih, bhh, h0):
        # Hoisted input projection for ALL time steps at once (one MXU push).
        gx = jnp.dot(x_all, wih, preferred_element_type=jnp.float32)        # (SB, 3H)
        # Gate slicing + bias pre-combination done ONCE, off the serial
        # critical path.  PyTorch gate order [r, z, n]; b_hn must stay inside
        # the r * (...) term for the n gate.
        gx_r = gx[:, 0 * H:1 * H] + (bih[:, 0 * H:1 * H] + bhh[:, 0 * H:1 * H])
        gx_z = gx[:, 1 * H:2 * H] + (bih[:, 1 * H:2 * H] + bhh[:, 1 * H:2 * H])
        gx_n = gx[:, 2 * H:3 * H] + bih[:, 2 * H:3 * H]
        w_hr = whh[:, 0 * H:1 * H]
        w_hz = whh[:, 1 * H:2 * H]
        w_hn = whh[:, 2 * H:3 * H]
        b_hn = bhh[:, 2 * H:3 * H]

        h = h0
        # Fully unrolled recurrence (S is small & static); per-gate dots keep
        # every per-step (B, H) result lane-aligned -- no cross-lane slicing
        # inside the serial chain.
        for t in range(S):
            xr = gx_r[t * B:(t + 1) * B, :]
            xz = gx_z[t * B:(t + 1) * B, :]
            xn = gx_n[t * B:(t + 1) * B, :]
            r = jax.nn.sigmoid(xr + jnp.dot(h, w_hr, preferred_element_type=jnp.float32))
            z = jax.nn.sigmoid(xz + jnp.dot(h, w_hz, preferred_element_type=jnp.float32))
            n = jnp.tanh(xn + r * (jnp.dot(h, w_hn, preferred_element_type=jnp.float32) + b_hn))
            h = (1.0 - z) * n + z * h
        return h

    h0 = jnp.zeros((B, H), jnp.float32)
    h_enc = run_gru(e_wih_ref[...], e_whh_ref[...], e_bih_ref[...], e_bhh_ref[...], h0)
    h_dec = run_gru(d_wih_ref[...], d_whh_ref[...], d_bih_ref[...], d_bhh_ref[...], h_enc)
    # Reference also computes out = l2norm(out_dec), but with
    # self_attention=False `out` is immediately overwritten by h -> dead code.

    # --- head: l2norm(h[-1]) -> dropout (eval: identity) -> fc -> PReLU ------
    ss = jnp.sum(h_dec * h_dec, axis=-1, keepdims=True)            # (B, 1)
    inv_norm = jax.lax.rsqrt(ss + 1e-24)                           # eps guards all-zero rows (torch would NaN)
    hn = h_dec * inv_norm
    # TODO(synk): dropout is identity in eval mode; training-mode RNG mask not implemented.
    y = jnp.dot(hn, fcw_ref[...], preferred_element_type=jnp.float32) + fcb_ref[...]
    a = a_ref[...]                                                 # (1, 1) PReLU slope
    o_ref[...] = jnp.where(y >= 0.0, y, a * y)


# ----------------------------------------------------------------------------
# Full forward (single fused pallas_call)
# ----------------------------------------------------------------------------
@jax.jit
def net_forward(tokens, emb_table, enc_params, dec_params, fc_w, fc_b, prelu_a):
    B, S = tokens.shape
    O = fc_w.shape[-1]
    # Time-major flattened token ids: row t*B + b == tokens[b, t].
    tok_tm = jnp.transpose(tokens, (1, 0)).reshape(S * B, 1).astype(jnp.int32)

    kernel = functools.partial(fused_net_kernel, B=B, S=S)
    n_inputs = 13
    return pl.pallas_call(
        kernel,
        out_shape=jax.ShapeDtypeStruct((B, O), jnp.float32),
        in_specs=[pl.BlockSpec(memory_space=pltpu.MemorySpace.VMEM)
                  for _ in range(n_inputs)],
        out_specs=pl.BlockSpec(memory_space=pltpu.MemorySpace.VMEM),
    )(tok_tm, emb_table, *enc_params, *dec_params, fc_w, fc_b, prelu_a)


if __name__ == "__main__":
    V, E, H, O = 50, 32, 32, 4     # vocab, input_size, hidden_size, output_size
    B, S = 8, 8                    # batch, fix_length

    key = jax.random.PRNGKey(0)
    keys = jax.random.split(key, 12)

    def uinit(k, shape, bound):
        return jax.random.uniform(k, shape, jnp.float32, -bound, bound)

    word_embeddings = jax.random.normal(keys[0], (V, E), jnp.float32)

    kscale = 1.0 / math.sqrt(H)    # PyTorch nn.GRU default uniform init
    enc_params = (uinit(keys[1], (E, 3 * H), kscale),   # W_ih^T  (gate order r,z,n)
                  uinit(keys[2], (H, 3 * H), kscale),   # W_hh^T
                  uinit(keys[3], (1, 3 * H), kscale),   # b_ih
                  uinit(keys[4], (1, 3 * H), kscale))   # b_hh
    dec_params = (uinit(keys[5], (E, 3 * H), kscale),
                  uinit(keys[6], (H, 3 * H), kscale),
                  uinit(keys[7], (1, 3 * H), kscale),
                  uinit(keys[8], (1, 3 * H), kscale))

    xavier_bound = math.sqrt(6.0 / (H + O))             # init.xavier_uniform_(fc.weight)
    fc_w = uinit(keys[9], (H, O), xavier_bound)
    fc_b = uinit(keys[10], (1, O), 1.0 / math.sqrt(H))
    prelu_a = jnp.full((1, 1), 0.25, jnp.float32)       # PReLU default init

    tokens = jax.random.randint(keys[11], (B, S), 0, V)

    out = net_forward(tokens, word_embeddings, enc_params, dec_params,
                      fc_w, fc_b, prelu_a)
    out = jax.block_until_ready(out)
    assert out.shape == (B, O) and out.dtype == jnp.float32
    assert bool(jnp.all(jnp.isfinite(out)))
    print("KERNEL_OK")
</pallas_src>

<mosaic_0001>
module attributes {stable_mosaic.version = 11 : i64} {
  func.func @fused_net_kernel(%arg0: memref<64x1xi32, #tpu.memory_space<vmem>>, %arg1: memref<50x32xf32, #tpu.memory_space<vmem>>, %arg2: memref<32x96xf32, #tpu.memory_space<vmem>>, %arg3: memref<32x96xf32, #tpu.memory_space<vmem>>, %arg4: memref<1x96xf32, #tpu.memory_space<vmem>>, %arg5: memref<1x96xf32, #tpu.memory_space<vmem>>, %arg6: memref<32x96xf32, #tpu.memory_space<vmem>>, %arg7: memref<32x96xf32, #tpu.memory_space<vmem>>, %arg8: memref<1x96xf32, #tpu.memory_space<vmem>>, %arg9: memref<1x96xf32, #tpu.memory_space<vmem>>, %arg10: memref<32x4xf32, #tpu.memory_space<vmem>>, %arg11: memref<1x4xf32, #tpu.memory_space<vmem>>, %arg12: memref<1x1xf32, #tpu.memory_space<vmem>>, %arg13: memref<8x4xf32, #tpu.memory_space<vmem>>) attributes {dimension_semantics = [], scalar_prefetch = 0 : i64, scratch_operands = 0 : i64, tpu.core_type = #tpu.core_type<tc>} {
    %c0 = arith.constant 0 : index
    %c0_0 = arith.constant 0 : index
    %0 = vector.load %arg0[%c0, %c0_0] : memref<64x1xi32, #tpu.memory_space<vmem>>, vector<64x1xi32>
    %1 = tpu.iota {dimensions = array<i32: 1>} : vector<64x50xi32>
    %2 = vector.broadcast %0 : vector<64x1xi32> to vector<64x50xi32>
    %3 = arith.cmpi eq, %1, %2 : vector<64x50xi32>
    %4 = arith.extui %3 : vector<64x50xi1> to vector<64x50xi32>
    %5 = arith.sitofp %4 : vector<64x50xi32> to vector<64x50xf32>
    %c0_1 = arith.constant 0 : index
    %c0_2 = arith.constant 0 : index
    %6 = vector.load %arg1[%c0_1, %c0_2] : memref<50x32xf32, #tpu.memory_space<vmem>>, vector<50x32xf32>
    %cst = arith.constant dense<0.000000e+00> : vector<64x32xf32>
    %7 = tpu.matmul %5, %6, %cst {dimension_numbers = #tpu.dot_dimension_numbers<[1], [0], [0], [1], [0, 0, 1, 1], [], []>} : vector<64x50xf32>, vector<50x32xf32>, vector<64x32xf32> -> vector<64x32xf32>
    %cst_3 = arith.constant 0.000000e+00 : f32
    %8 = vector.broadcast %cst_3 : f32 to vector<8x32xf32>
    %c0_4 = arith.constant 0 : index
    %c0_5 = arith.constant 0 : index
    %9 = vector.load %arg2[%c0_4, %c0_5] : memref<32x96xf32, #tpu.memory_space<vmem>>, vector<32x96xf32>
    %c0_6 = arith.constant 0 : index
    %c0_7 = arith.constant 0 : index
    %10 = vector.load %arg3[%c0_6, %c0_7] : memref<32x96xf32, #tpu.memory_space<vmem>>, vector<32x96xf32>
    %c0_8 = arith.constant 0 : index
    %c0_9 = arith.constant 0 : index
    %11 = vector.load %arg4[%c0_8, %c0_9] : memref<1x96xf32, #tpu.memory_space<vmem>>, vector<1x96xf32>
    %c0_10 = arith.constant 0 : index
    %c0_11 = arith.constant 0 : index
    %12 = vector.load %arg5[%c0_10, %c0_11] : memref<1x96xf32, #tpu.memory_space<vmem>>, vector<1x96xf32>
    %cst_12 = arith.constant dense<0.000000e+00> : vector<64x96xf32>
    %13 = tpu.matmul %7, %9, %cst_12 {dimension_numbers = #tpu.dot_dimension_numbers<[1], [0], [0], [1], [0, 0, 1, 1], [], []>} : vector<64x32xf32>, vector<32x96xf32>, vector<64x96xf32> -> vector<64x96xf32>
    %14 = vector.extract_strided_slice %13 {offsets = [0, 0], sizes = [64, 32], strides = [1, 1]} : vector<64x96xf32> to vector<64x32xf32>
    %15 = vector.extract_strided_slice %11 {offsets = [0, 0], sizes = [1, 32], strides = [1, 1]} : vector<1x96xf32> to vector<1x32xf32>
    %16 = vector.extract_strided_slice %12 {offsets = [0, 0], sizes = [1, 32], strides = [1, 1]} : vector<1x96xf32> to vector<1x32xf32>
    %17 = arith.addf %15, %16 : vector<1x32xf32>
    %18 = vector.broadcast %17 : vector<1x32xf32> to vector<64x32xf32>
    %19 = arith.addf %14, %18 : vector<64x32xf32>
    %20 = vector.extract_strided_slice %13 {offsets = [0, 32], sizes = [64, 32], strides = [1, 1]} : vector<64x96xf32> to vector<64x32xf32>
    %21 = vector.extract_strided_slice %11 {offsets = [0, 32], sizes = [1, 32], strides = [1, 1]} : vector<1x96xf32> to vector<1x32xf32>
    %22 = vector.extract_strided_slice %12 {offsets = [0, 32], sizes = [1, 32], strides = [1, 1]} : vector<1x96xf32> to vector<1x32xf32>
    %23 = arith.addf %21, %22 : vector<1x32xf32>
    %24 = vector.broadcast %23 : vector<1x32xf32> to vector<64x32xf32>
    %25 = arith.addf %20, %24 : vector<64x32xf32>
    %26 = vector.extract_strided_slice %13 {offsets = [0, 64], sizes = [64, 32], strides = [1, 1]} : vector<64x96xf32> to vector<64x32xf32>
    %27 = vector.extract_strided_slice %11 {offsets = [0, 64], sizes = [1, 32], strides = [1, 1]} : vector<1x96xf32> to vector<1x32xf32>
    %28 = vector.broadcast %27 : vector<1x32xf32> to vector<64x32xf32>
    %29 = arith.addf %26, %28 : vector<64x32xf32>
    %30 = vector.extract_strided_slice %10 {offsets = [0, 0], sizes = [32, 32], strides = [1, 1]} : vector<32x96xf32> to vector<32x32xf32>
    %31 = vector.extract_strided_slice %10 {offsets = [0, 32], sizes = [32, 32], strides = [1, 1]} : vector<32x96xf32> to vector<32x32xf32>
    %32 = vector.extract_strided_slice %10 {offsets = [0, 64], sizes = [32, 32], strides = [1, 1]} : vector<32x96xf32> to vector<32x32xf32>
    %33 = vector.extract_strided_slice %12 {offsets = [0, 64], sizes = [1, 32], strides = [1, 1]} : vector<1x96xf32> to vector<1x32xf32>
    %34 = vector.extract_strided_slice %19 {offsets = [0, 0], sizes = [8, 32], strides = [1, 1]} : vector<64x32xf32> to vector<8x32xf32>
    %35 = vector.extract_strided_slice %25 {offsets = [0, 0], sizes = [8, 32], strides = [1, 1]} : vector<64x32xf32> to vector<8x32xf32>
    %36 = vector.extract_strided_slice %29 {offsets = [0, 0], sizes = [8, 32], strides = [1, 1]} : vector<64x32xf32> to vector<8x32xf32>
    %cst_13 = arith.constant dense<0.000000e+00> : vector<8x32xf32>
    %37 = tpu.matmul %8, %30, %cst_13 {dimension_numbers = #tpu.dot_dimension_numbers<[1], [0], [0], [1], [0, 0, 1, 1], [], []>} : vector<8x32xf32>, vector<32x32xf32>, vector<8x32xf32> -> vector<8x32xf32>
    %38 = arith.addf %34, %37 : vector<8x32xf32>
    %39 = arith.negf %38 : vector<8x32xf32>
    %40 = math.exp %39 : vector<8x32xf32>
    %cst_14 = arith.constant 1.000000e+00 : f32
    %41 = vector.broadcast %cst_14 : f32 to vector<8x32xf32>
    %42 = arith.addf %41, %40 : vector<8x32xf32>
    %43 = arith.divf %41, %42 : vector<8x32xf32>
    %cst_15 = arith.constant dense<0.000000e+00> : vector<8x32xf32>
    %44 = tpu.matmul %8, %31, %cst_15 {dimension_numbers = #tpu.dot_dimension_numbers<[1], [0], [0], [1], [0, 0, 1, 1], [], []>} : vector<8x32xf32>, vector<32x32xf32>, vector<8x32xf32> -> vector<8x32xf32>
    %45 = arith.addf %35, %44 : vector<8x32xf32>
    %46 = arith.negf %45 : vector<8x32xf32>
    %47 = math.exp %46 : vector<8x32xf32>
    %cst_16 = arith.constant 1.000000e+00 : f32
    %48 = vector.broadcast %cst_16 : f32 to vector<8x32xf32>
    %49 = arith.addf %48, %47 : vector<8x32xf32>
    %50 = arith.divf %48, %49 : vector<8x32xf32>
    %cst_17 = arith.constant dense<0.000000e+00> : vector<8x32xf32>
    %51 = tpu.matmul %8, %32, %cst_17 {dimension_numbers = #tpu.dot_dimension_numbers<[1], [0], [0], [1], [0, 0, 1, 1], [], []>} : vector<8x32xf32>, vector<32x32xf32>, vector<8x32xf32> -> vector<8x32xf32>
    %52 = vector.broadcast %33 : vector<1x32xf32> to vector<8x32xf32>
    %53 = arith.addf %51, %52 : vector<8x32xf32>
    %54 = arith.mulf %43, %53 : vector<8x32xf32>
    %55 = arith.addf %36, %54 : vector<8x32xf32>
    %56 = math.tanh %55 : vector<8x32xf32>
    %cst_18 = arith.constant 1.000000e+00 : f32
    %57 = vector.broadcast %cst_18 : f32 to vector<8x32xf32>
    %58 = arith.subf %57, %50 : vector<8x32xf32>
    %59 = arith.mulf %58, %56 : vector<8x32xf32>
    %60 = arith.mulf %50, %8 : vector<8x32xf32>
    %61 = arith.addf %59, %60 : vector<8x32xf32>
    %62 = vector.extract_strided_slice %19 {offsets = [8, 0], sizes = [8, 32], strides = [1, 1]} : vector<64x32xf32> to vector<8x32xf32>
    %63 = vector.extract_strided_slice %25 {offsets = [8, 0], sizes = [8, 32], strides = [1, 1]} : vector<64x32xf32> to vector<8x32xf32>
    %64 = vector.extract_strided_slice %29 {offsets = [8, 0], sizes = [8, 32], strides = [1, 1]} : vector<64x32xf32> to vector<8x32xf32>
    %cst_19 = arith.constant dense<0.000000e+00> : vector<8x32xf32>
    %65 = tpu.matmul %61, %30, %cst_19 {dimension_numbers = #tpu.dot_dimension_numbers<[1], [0], [0], [1], [0, 0, 1, 1], [], []>} : vector<8x32xf32>, vector<32x32xf32>, vector<8x32xf32> -> vector<8x32xf32>
    %66 = arith.addf %62, %65 : vector<8x32xf32>
    %67 = arith.negf %66 : vector<8x32xf32>
    %68 = math.exp %67 : vector<8x32xf32>
    %cst_20 = arith.constant 1.000000e+00 : f32
    %69 = vector.broadcast %cst_20 : f32 to vector<8x32xf32>
    %70 = arith.addf %69, %68 : vector<8x32xf32>
    %71 = arith.divf %69, %70 : vector<8x32xf32>
    %cst_21 = arith.constant dense<0.000000e+00> : vector<8x32xf32>
    %72 = tpu.matmul %61, %31, %cst_21 {dimension_numbers = #tpu.dot_dimension_numbers<[1], [0], [0], [1], [0, 0, 1, 1], [], []>} : vector<8x32xf32>, vector<32x32xf32>, vector<8x32xf32> -> vector<8x32xf32>
    %73 = arith.addf %63, %72 : vector<8x32xf32>
    %74 = arith.negf %73 : vector<8x32xf32>
    %75 = math.exp %74 : vector<8x32xf32>
    %cst_22 = arith.constant 1.000000e+00 : f32
    %76 = vector.broadcast %cst_22 : f32 to vector<8x32xf32>
    %77 = arith.addf %76, %75 : vector<8x32xf32>
    %78 = arith.divf %76, %77 : vector<8x32xf32>
    %cst_23 = arith.constant dense<0.000000e+00> : vector<8x32xf32>
    %79 = tpu.matmul %61, %32, %cst_23 {dimension_numbers = #tpu.dot_dimension_numbers<[1], [0], [0], [1], [0, 0, 1, 1], [], []>} : vector<8x32xf32>, vector<32x32xf32>, vector<8x32xf32> -> vector<8x32xf32>
    %80 = vector.broadcast %33 : vector<1x32xf32> to vector<8x32xf32>
    %81 = arith.addf %79, %80 : vector<8x32xf32>
    %82 = arith.mulf %71, %81 : vector<8x32xf32>
    %83 = arith.addf %64, %82 : vector<8x32xf32>
    %84 = math.tanh %83 : vector<8x32xf32>
    %cst_24 = arith.constant 1.000000e+00 : f32
    %85 = vector.broadcast %cst_24 : f32 to vector<8x32xf32>
    %86 = arith.subf %85, %78 : vector<8x32xf32>
    %87 = arith.mulf %86, %84 : vector<8x32xf32>
    %88 = arith.mulf %78, %61 : vector<8x32xf32>
    %89 = arith.addf %87, %88 : vector<8x32xf32>
    %90 = vector.extract_strided_slice %19 {offsets = [16, 0], sizes = [8, 32], strides = [1, 1]} : vector<64x32xf32> to vector<8x32xf32>
    %91 = vector.extract_strided_slice %25 {offsets = [16, 0], sizes = [8, 32], strides = [1, 1]} : vector<64x32xf32> to vector<8x32xf32>
    %92 = vector.extract_strided_slice %29 {offsets = [16, 0], sizes = [8, 32], strides = [1, 1]} : vector<64x32xf32> to vector<8x32xf32>
    %cst_25 = arith.constant dense<0.000000e+00> : vector<8x32xf32>
    %93 = tpu.matmul %89, %30, %cst_25 {dimension_numbers = #tpu.dot_dimension_numbers<[1], [0], [0], [1], [0, 0, 1, 1], [], []>} : vector<8x32xf32>, vector<32x32xf32>, vector<8x32xf32> -> vector<8x32xf32>
    %94 = arith.addf %90, %93 : vector<8x32xf32>
    %95 = arith.negf %94 : vector<8x32xf32>
    %96 = math.exp %95 : vector<8x32xf32>
    %cst_26 = arith.constant 1.000000e+00 : f32
    %97 = vector.broadcast %cst_26 : f32 to vector<8x32xf32>
    %98 = arith.addf %97, %96 : vector<8x32xf32>
    %99 = arith.divf %97, %98 : vector<8x32xf32>
    %cst_27 = arith.constant dense<0.000000e+00> : vector<8x32xf32>
    %100 = tpu.matmul %89, %31, %cst_27 {dimension_numbers = #tpu.dot_dimension_numbers<[1], [0], [0], [1], [0, 0, 1, 1], [], []>} : vector<8x32xf32>, vector<32x32xf32>, vector<8x32xf32> -> vector<8x32xf32>
    %101 = arith.addf %91, %100 : vector<8x32xf32>
    %102 = arith.negf %101 : vector<8x32xf32>
    %103 = math.exp %102 : vector<8x32xf32>
    %cst_28 = arith.constant 1.000000e+00 : f32
    %104 = vector.broadcast %cst_28 : f32 to vector<8x32xf32>
    %105 = arith.addf %104, %103 : vector<8x32xf32>
    %106 = arith.divf %104, %105 : vector<8x32xf32>
    %cst_29 = arith.constant dense<0.000000e+00> : vector<8x32xf32>
    %107 = tpu.matmul %89, %32, %cst_29 {dimension_numbers = #tpu.dot_dimension_numbers<[1], [0], [0], [1], [0, 0, 1, 1], [], []>} : vector<8x32xf32>, vector<32x32xf32>, vector<8x32xf32> -> vector<8x32xf32>
    %108 = vector.broadcast %33 : vector<1x32xf32> to vector<8x32xf32>
    %109 = arith.addf %107, %108 : vector<8x32xf32>
    %110 = arith.mulf %99, %109 : vector<8x32xf32>
    %111 = arith.addf %92, %110 : vector<8x32xf32>
    %112 = math.tanh %111 : vector<8x32xf32>
    %cst_30 = arith.constant 1.000000e+00 : f32
    %113 = vector.broadcast %cst_30 : f32 to vector<8x32xf32>
    %114 = arith.subf %113, %106 : vector<8x32xf32>
    %115 = arith.mulf %114, %112 : vector<8x32xf32>
    %116 = arith.mulf %106, %89 : vector<8x32xf32>
    %117 = arith.addf %115, %116 : vector<8x32xf32>
    %118 = vector.extract_strided_slice %19 {offsets = [24, 0], sizes = [8, 32], strides = [1, 1]} : vector<64x32xf32> to vector<8x32xf32>
    %119 = vector.extract_strided_slice %25 {offsets = [24, 0], sizes = [8, 32], strides = [1, 1]} : vector<64x32xf32> to vector<8x32xf32>
    %120 = vector.extract_strided_slice %29 {offsets = [24, 0], sizes = [8, 32], strides = [1, 1]} : vector<64x32xf32> to vector<8x32xf32>
    %cst_31 = arith.constant dense<0.000000e+00> : vector<8x32xf32>
    %121 = tpu.matmul %117, %30, %cst_31 {dimension_numbers = #tpu.dot_dimension_numbers<[1], [0], [0], [1], [0, 0, 1, 1], [], []>} : vector<8x32xf32>, vector<32x32xf32>, vector<8x32xf32> -> vector<8x32xf32>
    %122 = arith.addf %118, %121 : vector<8x32xf32>
    %123 = arith.negf %122 : vector<8x32xf32>
    %124 = math.exp %123 : vector<8x32xf32>
    %cst_32 = arith.constant 1.000000e+00 : f32
    %125 = vector.broadcast %cst_32 : f32 to vector<8x32xf32>
    %126 = arith.addf %125, %124 : vector<8x32xf32>
    %127 = arith.divf %125, %126 : vector<8x32xf32>
    %cst_33 = arith.constant dense<0.000000e+00> : vector<8x32xf32>
    %128 = tpu.matmul %117, %31, %cst_33 {dimension_numbers = #tpu.dot_dimension_numbers<[1], [0], [0], [1], [0, 0, 1, 1], [], []>} : vector<8x32xf32>, vector<32x32xf32>, vector<8x32xf32> -> vector<8x32xf32>
    %129 = arith.addf %119, %128 : vector<8x32xf32>
    %130 = arith.negf %129 : vector<8x32xf32>
    %131 = math.exp %130 : vector<8x32xf32>
    %cst_34 = arith.constant 1.000000e+00 : f32
    %132 = vector.broadcast %cst_34 : f32 to vector<8x32xf32>
    %133 = arith.addf %132, %131 : vector<8x32xf32>
    %134 = arith.divf %132, %133 : vector<8x32xf32>
    %cst_35 = arith.constant dense<0.000000e+00> : vector<8x32xf32>
    %135 = tpu.matmul %117, %32, %cst_35 {dimension_numbers = #tpu.dot_dimension_numbers<[1], [0], [0], [1], [0, 0, 1, 1], [], []>} : vector<8x32xf32>, vector<32x32xf32>, vector<8x32xf32> -> vector<8x32xf32>
    %136 = vector.broadcast %33 : vector<1x32xf32> to vector<8x32xf32>
    %137 = arith.addf %135, %136 : vector<8x32xf32>
    %138 = arith.mulf %127, %137 : vector<8x32xf32>
    %139 = arith.addf %120, %138 : vector<8x32xf32>
    %140 = math.tanh %139 : vector<8x32xf32>
    %cst_36 = arith.constant 1.000000e+00 : f32
    %141 = vector.broadcast %cst_36 : f32 to vector<8x32xf32>
    %142 = arith.subf %141, %134 : vector<8x32xf32>
    %143 = arith.mulf %142, %140 : vector<8x32xf32>
    %144 = arith.mulf %134, %117 : vector<8x32xf32>
    %145 = arith.addf %143, %144 : vector<8x32xf32>
    %146 = vector.extract_strided_slice %19 {offsets = [32, 0], sizes = [8, 32], strides = [1, 1]} : vector<64x32xf32> to vector<8x32xf32>
    %147 = vector.extract_strided_slice %25 {offsets = [32, 0], sizes = [8, 32], strides = [1, 1]} : vector<64x32xf32> to vector<8x32xf32>
    %148 = vector.extract_strided_slice %29 {offsets = [32, 0], sizes = [8, 32], strides = [1, 1]} : vector<64x32xf32> to vector<8x32xf32>
    %cst_37 = arith.constant dense<0.000000e+00> : vector<8x32xf32>
    %149 = tpu.matmul %145, %30, %cst_37 {dimension_numbers = #tpu.dot_dimension_numbers<[1], [0], [0], [1], [0, 0, 1, 1], [], []>} : vector<8x32xf32>, vector<32x32xf32>, vector<8x32xf32> -> vector<8x32xf32>
    %150 = arith.addf %146, %149 : vector<8x32xf32>
    %151 = arith.negf %150 : vector<8x32xf32>
    %152 = math.exp %151 : vector<8x32xf32>
    %cst_38 = arith.constant 1.000000e+00 : f32
    %153 = vector.broadcast %cst_38 : f32 to vector<8x32xf32>
    %154 = arith.addf %153, %152 : vector<8x32xf32>
    %155 = arith.divf %153, %154 : vector<8x32xf32>
    %cst_39 = arith.constant dense<0.000000e+00> : vector<8x32xf32>
    %156 = tpu.matmul %145, %31, %cst_39 {dimension_numbers = #tpu.dot_dimension_numbers<[1], [0], [0], [1], [0, 0, 1, 1], [], []>} : vector<8x32xf32>, vector<32x32xf32>, vector<8x32xf32> -> vector<8x32xf32>
    %157 = arith.addf %147, %156 : vector<8x32xf32>
    %158 = arith.negf %157 : vector<8x32xf32>
    %159 = math.exp %158 : vector<8x32xf32>
    %cst_40 = arith.constant 1.000000e+00 : f32
    %160 = vector.broadcast %cst_40 : f32 to vector<8x32xf32>
    %161 = arith.addf %160, %159 : vector<8x32xf32>
    %162 = arith.divf %160, %161 : vector<8x32xf32>
    %cst_41 = arith.constant dense<0.000000e+00> : vector<8x32xf32>
    %163 = tpu.matmul %145, %32, %cst_41 {dimension_numbers = #tpu.dot_dimension_numbers<[1], [0], [0], [1], [0, 0, 1, 1], [], []>} : vector<8x32xf32>, vector<32x32xf32>, vector<8x32xf32> -> vector<8x32xf32>
    %164 = vector.broadcast %33 : vector<1x32xf32> to vector<8x32xf32>
    %165 = arith.addf %163, %164 : vector<8x32xf32>
    %166 = arith.mulf %155, %165 : vector<8x32xf32>
    %167 = arith.addf %148, %166 : vector<8x32xf32>
    %168 = math.tanh %167 : vector<8x32xf32>
    %cst_42 = arith.constant 1.000000e+00 : f32
    %169 = vector.broadcast %cst_42 : f32 to vector<8x32xf32>
    %170 = arith.subf %169, %162 : vector<8x32xf32>
    %171 = arith.mulf %170, %168 : vector<8x32xf32>
    %172 = arith.mulf %162, %145 : vector<8x32xf32>
    %173 = arith.addf %171, %172 : vector<8x32xf32>
    %174 = vector.extract_strided_slice %19 {offsets = [40, 0], sizes = [8, 32], strides = [1, 1]} : vector<64x32xf32> to vector<8x32xf32>
    %175 = vector.extract_strided_slice %25 {offsets = [40, 0], sizes = [8, 32], strides = [1, 1]} : vector<64x32xf32> to vector<8x32xf32>
    %176 = vector.extract_strided_slice %29 {offsets = [40, 0], sizes = [8, 32], strides = [1, 1]} : vector<64x32xf32> to vector<8x32xf32>
    %cst_43 = arith.constant dense<0.000000e+00> : vector<8x32xf32>
    %177 = tpu.matmul %173, %30, %cst_43 {dimension_numbers = #tpu.dot_dimension_numbers<[1], [0], [0], [1], [0, 0, 1, 1], [], []>} : vector<8x32xf32>, vector<32x32xf32>, vector<8x32xf32> -> vector<8x32xf32>
    %178 = arith.addf %174, %177 : vector<8x32xf32>
    %179 = arith.negf %178 : vector<8x32xf32>
    %180 = math.exp %179 : vector<8x32xf32>
    %cst_44 = arith.constant 1.000000e+00 : f32
    %181 = vector.broadcast %cst_44 : f32 to vector<8x32xf32>
    %182 = arith.addf %181, %180 : vector<8x32xf32>
    %183 = arith.divf %181, %182 : vector<8x32xf32>
    %cst_45 = arith.constant dense<0.000000e+00> : vector<8x32xf32>
    %184 = tpu.matmul %173, %31, %cst_45 {dimension_numbers = #tpu.dot_dimension_numbers<[1], [0], [0], [1], [0, 0, 1, 1], [], []>} : vector<8x32xf32>, vector<32x32xf32>, vector<8x32xf32> -> vector<8x32xf32>
    %185 = arith.addf %175, %184 : vector<8x32xf32>
    %186 = arith.negf %185 : vector<8x32xf32>
    %187 = math.exp %186 : vector<8x32xf32>
    %cst_46 = arith.constant 1.000000e+00 : f32
    %188 = vector.broadcast %cst_46 : f32 to vector<8x32xf32>
    %189 = arith.addf %188, %187 : vector<8x32xf32>
    %190 = arith.divf %188, %189 : vector<8x32xf32>
    %cst_47 = arith.constant dense<0.000000e+00> : vector<8x32xf32>
    %191 = tpu.matmul %173, %32, %cst_47 {dimension_numbers = #tpu.dot_dimension_numbers<[1], [0], [0], [1], [0, 0, 1, 1], [], []>} : vector<8x32xf32>, vector<32x32xf32>, vector<8x32xf32> -> vector<8x32xf32>
    %192 = vector.broadcast %33 : vector<1x32xf32> to vector<8x32xf32>
    %193 = arith.addf %191, %192 : vector<8x32xf32>
    %194 = arith.mulf %183, %193 : vector<8x32xf32>
    %195 = arith.addf %176, %194 : vector<8x32xf32>
    %196 = math.tanh %195 : vector<8x32xf32>
    %cst_48 = arith.constant 1.000000e+00 : f32
    %197 = vector.broadcast %cst_48 : f32 to vector<8x32xf32>
    %198 = arith.subf %197, %190 : vector<8x32xf32>
    %199 = arith.mulf %198, %196 : vector<8x32xf32>
    %200 = arith.mulf %190, %173 : vector<8x32xf32>
    %201 = arith.addf %199, %200 : vector<8x32xf32>
    %202 = vector.extract_strided_slice %19 {offsets = [48, 0], sizes = [8, 32], strides = [1, 1]} : vector<64x32xf32> to vector<8x32xf32>
    %203 = vector.extract_strided_slice %25 {offsets = [48, 0], sizes = [8, 32], strides = [1, 1]} : vector<64x32xf32> to vector<8x32xf32>
    %204 = vector.extract_strided_slice %29 {offsets = [48, 0], sizes = [8, 32], strides = [1, 1]} : vector<64x32xf32> to vector<8x32xf32>
    %cst_49 = arith.constant dense<0.000000e+00> : vector<8x32xf32>
    %205 = tpu.matmul %201, %30, %cst_49 {dimension_numbers = #tpu.dot_dimension_numbers<[1], [0], [0], [1], [0, 0, 1, 1], [], []>} : vector<8x32xf32>, vector<32x32xf32>, vector<8x32xf32> -> vector<8x32xf32>
    %206 = arith.addf %202, %205 : vector<8x32xf32>
    %207 = arith.negf %206 : vector<8x32xf32>
    %208 = math.exp %207 : vector<8x32xf32>
    %cst_50 = arith.constant 1.000000e+00 : f32
    %209 = vector.broadcast %cst_50 : f32 to vector<8x32xf32>
    %210 = arith.addf %209, %208 : vector<8x32xf32>
    %211 = arith.divf %209, %210 : vector<8x32xf32>
    %cst_51 = arith.constant dense<0.000000e+00> : vector<8x32xf32>
    %212 = tpu.matmul %201, %31, %cst_51 {dimension_numbers = #tpu.dot_dimension_numbers<[1], [0], [0], [1], [0, 0, 1, 1], [], []>} : vector<8x32xf32>, vector<32x32xf32>, vector<8x32xf32> -> vector<8x32xf32>
    %213 = arith.addf %203, %212 : vector<8x32xf32>
    %214 = arith.negf %213 : vector<8x32xf32>
    %215 = math.exp %214 : vector<8x32xf32>
    %cst_52 = arith.constant 1.000000e+00 : f32
    %216 = vector.broadcast %cst_52 : f32 to vector<8x32xf32>
    %217 = arith.addf %216, %215 : vector<8x32xf32>
    %218 = arith.divf %216, %217 : vector<8x32xf32>
    %cst_53 = arith.constant dense<0.000000e+00> : vector<8x32xf32>
    %219 = tpu.matmul %201, %32, %cst_53 {dimension_numbers = #tpu.dot_dimension_numbers<[1], [0], [0], [1], [0, 0, 1, 1], [], []>} : vector<8x32xf32>, vector<32x32xf32>, vector<8x32xf32> -> vector<8x32xf32>
    %220 = vector.broadcast %33 : vector<1x32xf32> to vector<8x32xf32>
    %221 = arith.addf %219, %220 : vector<8x32xf32>
    %222 = arith.mulf %211, %221 : vector<8x32xf32>
    %223 = arith.addf %204, %222 : vector<8x32xf32>
    %224 = math.tanh %223 : vector<8x32xf32>
    %cst_54 = arith.constant 1.000000e+00 : f32
    %225 = vector.broadcast %cst_54 : f32 to vector<8x32xf32>
    %226 = arith.subf %225, %218 : vector<8x32xf32>
    %227 = arith.mulf %226, %224 : vector<8x32xf32>
    %228 = arith.mulf %218, %201 : vector<8x32xf32>
    %229 = arith.addf %227, %228 : vector<8x32xf32>
    %230 = vector.extract_strided_slice %19 {offsets = [56, 0], sizes = [8, 32], strides = [1, 1]} : vector<64x32xf32> to vector<8x32xf32>
    %231 = vector.extract_strided_slice %25 {offsets = [56, 0], sizes = [8, 32], strides = [1, 1]} : vector<64x32xf32> to vector<8x32xf32>
    %232 = vector.extract_strided_slice %29 {offsets = [56, 0], sizes = [8, 32], strides = [1, 1]} : vector<64x32xf32> to vector<8x32xf32>
    %cst_55 = arith.constant dense<0.000000e+00> : vector<8x32xf32>
    %233 = tpu.matmul %229, %30, %cst_55 {dimension_numbers = #tpu.dot_dimension_numbers<[1], [0], [0], [1], [0, 0, 1, 1], [], []>} : vector<8x32xf32>, vector<32x32xf32>, vector<8x32xf32> -> vector<8x32xf32>
    %234 = arith.addf %230, %233 : vector<8x32xf32>
    %235 = arith.negf %234 : vector<8x32xf32>
    %236 = math.exp %235 : vector<8x32xf32>
    %cst_56 = arith.constant 1.000000e+00 : f32
    %237 = vector.broadcast %cst_56 : f32 to vector<8x32xf32>
    %238 = arith.addf %237, %236 : vector<8x32xf32>
    %239 = arith.divf %237, %238 : vector<8x32xf32>
    %cst_57 = arith.constant dense<0.000000e+00> : vector<8x32xf32>
    %240 = tpu.matmul %229, %31, %cst_57 {dimension_numbers = #tpu.dot_dimension_numbers<[1], [0], [0], [1], [0, 0, 1, 1], [], []>} : vector<8x32xf32>, vector<32x32xf32>, vector<8x32xf32> -> vector<8x32xf32>
    %241 = arith.addf %231, %240 : vector<8x32xf32>
    %242 = arith.negf %241 : vector<8x32xf32>
    %243 = math.exp %242 : vector<8x32xf32>
    %cst_58 = arith.constant 1.000000e+00 : f32
    %244 = vector.broadcast %cst_58 : f32 to vector<8x32xf32>
    %245 = arith.addf %244, %243 : vector<8x32xf32>
    %246 = arith.divf %244, %245 : vector<8x32xf32>
    %cst_59 = arith.constant dense<0.000000e+00> : vector<8x32xf32>
    %247 = tpu.matmul %229, %32, %cst_59 {dimension_numbers = #tpu.dot_dimension_numbers<[1], [0], [0], [1], [0, 0, 1, 1], [], []>} : vector<8x32xf32>, vector<32x32xf32>, vector<8x32xf32> -> vector<8x32xf32>
    %248 = vector.broadcast %33 : vector<1x32xf32> to vector<8x32xf32>
    %249 = arith.addf %247, %248 : vector<8x32xf32>
    %250 = arith.mulf %239, %249 : vector<8x32xf32>
    %251 = arith.addf %232, %250 : vector<8x32xf32>
    %252 = math.tanh %251 : vector<8x32xf32>
    %cst_60 = arith.constant 1.000000e+00 : f32
    %253 = vector.broadcast %cst_60 : f32 to vector<8x32xf32>
    %254 = arith.subf %253, %246 : vector<8x32xf32>
    %255 = arith.mulf %254, %252 : vector<8x32xf32>
    %256 = arith.mulf %246, %229 : vector<8x32xf32>
    %257 = arith.addf %255, %256 : vector<8x32xf32>
    %c0_61 = arith.constant 0 : index
    %c0_62 = arith.constant 0 : index
    %258 = vector.load %arg6[%c0_61, %c0_62] : memref<32x96xf32, #tpu.memory_space<vmem>>, vector<32x96xf32>
    %c0_63 = arith.constant 0 : index
    %c0_64 = arith.constant 0 : index
    %259 = vector.load %arg7[%c0_63, %c0_64] : memref<32x96xf32, #tpu.memory_space<vmem>>, vector<32x96xf32>
    %c0_65 = arith.constant 0 : index
    %c0_66 = arith.constant 0 : index
    %260 = vector.load %arg8[%c0_65, %c0_66] : memref<1x96xf32, #tpu.memory_space<vmem>>, vector<1x96xf32>
    %c0_67 = arith.constant 0 : index
    %c0_68 = arith.constant 0 : index
    %261 = vector.load %arg9[%c0_67, %c0_68] : memref<1x96xf32, #tpu.memory_space<vmem>>, vector<1x96xf32>
    %cst_69 = arith.constant dense<0.000000e+00> : vector<64x96xf32>
    %262 = tpu.matmul %7, %258, %cst_69 {dimension_numbers = #tpu.dot_dimension_numbers<[1], [0], [0], [1], [0, 0, 1, 1], [], []>} : vector<64x32xf32>, vector<32x96xf32>, vector<64x96xf32> -> vector<64x96xf32>
    %263 = vector.extract_strided_slice %262 {offsets = [0, 0], sizes = [64, 32], strides = [1, 1]} : vector<64x96xf32> to vector<64x32xf32>
    %264 = vector.extract_strided_slice %260 {offsets = [0, 0], sizes = [1, 32], strides = [1, 1]} : vector<1x96xf32> to vector<1x32xf32>
    %265 = vector.extract_strided_slice %261 {offsets = [0, 0], sizes = [1, 32], strides = [1, 1]} : vector<1x96xf32> to vector<1x32xf32>
    %266 = arith.addf %264, %265 : vector<1x32xf32>
    %267 = vector.broadcast %266 : vector<1x32xf32> to vector<64x32xf32>
    %268 = arith.addf %263, %267 : vector<64x32xf32>
    %269 = vector.extract_strided_slice %262 {offsets = [0, 32], sizes = [64, 32], strides = [1, 1]} : vector<64x96xf32> to vector<64x32xf32>
    %270 = vector.extract_strided_slice %260 {offsets = [0, 32], sizes = [1, 32], strides = [1, 1]} : vector<1x96xf32> to vector<1x32xf32>
    %271 = vector.extract_strided_slice %261 {offsets = [0, 32], sizes = [1, 32], strides = [1, 1]} : vector<1x96xf32> to vector<1x32xf32>
    %272 = arith.addf %270, %271 : vector<1x32xf32>
    %273 = vector.broadcast %272 : vector<1x32xf32> to vector<64x32xf32>
    %274 = arith.addf %269, %273 : vector<64x32xf32>
    %275 = vector.extract_strided_slice %262 {offsets = [0, 64], sizes = [64, 32], strides = [1, 1]} : vector<64x96xf32> to vector<64x32xf32>
    %276 = vector.extract_strided_slice %260 {offsets = [0, 64], sizes = [1, 32], strides = [1, 1]} : vector<1x96xf32> to vector<1x32xf32>
    %277 = vector.broadcast %276 : vector<1x32xf32> to vector<64x32xf32>
    %278 = arith.addf %275, %277 : vector<64x32xf32>
    %279 = vector.extract_strided_slice %259 {offsets = [0, 0], sizes = [32, 32], strides = [1, 1]} : vector<32x96xf32> to vector<32x32xf32>
    %280 = vector.extract_strided_slice %259 {offsets = [0, 32], sizes = [32, 32], strides = [1, 1]} : vector<32x96xf32> to vector<32x32xf32>
    %281 = vector.extract_strided_slice %259 {offsets = [0, 64], sizes = [32, 32], strides = [1, 1]} : vector<32x96xf32> to vector<32x32xf32>
    %282 = vector.extract_strided_slice %261 {offsets = [0, 64], sizes = [1, 32], strides = [1, 1]} : vector<1x96xf32> to vector<1x32xf32>
    %283 = vector.extract_strided_slice %268 {offsets = [0, 0], sizes = [8, 32], strides = [1, 1]} : vector<64x32xf32> to vector<8x32xf32>
    %284 = vector.extract_strided_slice %274 {offsets = [0, 0], sizes = [8, 32], strides = [1, 1]} : vector<64x32xf32> to vector<8x32xf32>
    %285 = vector.extract_strided_slice %278 {offsets = [0, 0], sizes = [8, 32], strides = [1, 1]} : vector<64x32xf32> to vector<8x32xf32>
    %cst_70 = arith.constant dense<0.000000e+00> : vector<8x32xf32>
    %286 = tpu.matmul %257, %279, %cst_70 {dimension_numbers = #tpu.dot_dimension_numbers<[1], [0], [0], [1], [0, 0, 1, 1], [], []>} : vector<8x32xf32>, vector<32x32xf32>, vector<8x32xf32> -> vector<8x32xf32>
    %287 = arith.addf %283, %286 : vector<8x32xf32>
    %288 = arith.negf %287 : vector<8x32xf32>
    %289 = math.exp %288 : vector<8x32xf32>
    %cst_71 = arith.constant 1.000000e+00 : f32
    %290 = vector.broadcast %cst_71 : f32 to vector<8x32xf32>
    %291 = arith.addf %290, %289 : vector<8x32xf32>
    %292 = arith.divf %290, %291 : vector<8x32xf32>
    %cst_72 = arith.constant dense<0.000000e+00> : vector<8x32xf32>
    %293 = tpu.matmul %257, %280, %cst_72 {dimension_numbers = #tpu.dot_dimension_numbers<[1], [0], [0], [1], [0, 0, 1, 1], [], []>} : vector<8x32xf32>, vector<32x32xf32>, vector<8x32xf32> -> vector<8x32xf32>
    %294 = arith.addf %284, %293 : vector<8x32xf32>
    %295 = arith.negf %294 : vector<8x32xf32>
    %296 = math.exp %295 : vector<8x32xf32>
    %cst_73 = arith.constant 1.000000e+00 : f32
    %297 = vector.broadcast %cst_73 : f32 to vector<8x32xf32>
    %298 = arith.addf %297, %296 : vector<8x32xf32>
    %299 = arith.divf %297, %298 : vector<8x32xf32>
    %cst_74 = arith.constant dense<0.000000e+00> : vector<8x32xf32>
    %300 = tpu.matmul %257, %281, %cst_74 {dimension_numbers = #tpu.dot_dimension_numbers<[1], [0], [0], [1], [0, 0, 1, 1], [], []>} : vector<8x32xf32>, vector<32x32xf32>, vector<8x32xf32> -> vector<8x32xf32>
    %301 = vector.broadcast %282 : vector<1x32xf32> to vector<8x32xf32>
    %302 = arith.addf %300, %301 : vector<8x32xf32>
    %303 = arith.mulf %292, %302 : vector<8x32xf32>
    %304 = arith.addf %285, %303 : vector<8x32xf32>
    %305 = math.tanh %304 : vector<8x32xf32>
    %cst_75 = arith.constant 1.000000e+00 : f32
    %306 = vector.broadcast %cst_75 : f32 to vector<8x32xf32>
    %307 = arith.subf %306, %299 : vector<8x32xf32>
    %308 = arith.mulf %307, %305 : vector<8x32xf32>
    %309 = arith.mulf %299, %257 : vector<8x32xf32>
    %310 = arith.addf %308, %309 : vector<8x32xf32>
    %311 = vector.extract_strided_slice %268 {offsets = [8, 0], sizes = [8, 32], strides = [1, 1]} : vector<64x32xf32> to vector<8x32xf32>
    %312 = vector.extract_strided_slice %274 {offsets = [8, 0], sizes = [8, 32], strides = [1, 1]} : vector<64x32xf32> to vector<8x32xf32>
    %313 = vector.extract_strided_slice %278 {offsets = [8, 0], sizes = [8, 32], strides = [1, 1]} : vector<64x32xf32> to vector<8x32xf32>
    %cst_76 = arith.constant dense<0.000000e+00> : vector<8x32xf32>
    %314 = tpu.matmul %310, %279, %cst_76 {dimension_numbers = #tpu.dot_dimension_numbers<[1], [0], [0], [1], [0, 0, 1, 1], [], []>} : vector<8x32xf32>, vector<32x32xf32>, vector<8x32xf32> -> vector<8x32xf32>
    %315 = arith.addf %311, %314 : vector<8x32xf32>
    %316 = arith.negf %315 : vector<8x32xf32>
    %317 = math.exp %316 : vector<8x32xf32>
    %cst_77 = arith.constant 1.000000e+00 : f32
    %318 = vector.broadcast %cst_77 : f32 to vector<8x32xf32>
    %319 = arith.addf %318, %317 : vector<8x32xf32>
    %320 = arith.divf %318, %319 : vector<8x32xf32>
    %cst_78 = arith.constant dense<0.000000e+00> : vector<8x32xf32>
    %321 = tpu.matmul %310, %280, %cst_78 {dimension_numbers = #tpu.dot_dimension_numbers<[1], [0], [0], [1], [0, 0, 1, 1], [], []>} : vector<8x32xf32>, vector<32x32xf32>, vector<8x32xf32> -> vector<8x32xf32>
    %322 = arith.addf %312, %321 : vector<8x32xf32>
    %323 = arith.negf %322 : vector<8x32xf32>
    %324 = math.exp %323 : vector<8x32xf32>
    %cst_79 = arith.constant 1.000000e+00 : f32
    %325 = vector.broadcast %cst_79 : f32 to vector<8x32xf32>
    %326 = arith.addf %325, %324 : vector<8x32xf32>
    %327 = arith.divf %325, %326 : vector<8x32xf32>
    %cst_80 = arith.constant dense<0.000000e+00> : vector<8x32xf32>
    %328 = tpu.matmul %310, %281, %cst_80 {dimension_numbers = #tpu.dot_dimension_numbers<[1], [0], [0], [1], [0, 0, 1, 1], [], []>} : vector<8x32xf32>, vector<32x32xf32>, vector<8x32xf32> -> vector<8x32xf32>
    %329 = vector.broadcast %282 : vector<1x32xf32> to vector<8x32xf32>
    %330 = arith.addf %328, %329 : vector<8x32xf32>
    %331 = arith.mulf %320, %330 : vector<8x32xf32>
    %332 = arith.addf %313, %331 : vector<8x32xf32>
    %333 = math.tanh %332 : vector<8x32xf32>
    %cst_81 = arith.constant 1.000000e+00 : f32
    %334 = vector.broadcast %cst_81 : f32 to vector<8x32xf32>
    %335 = arith.subf %334, %327 : vector<8x32xf32>
    %336 = arith.mulf %335, %333 : vector<8x32xf32>
    %337 = arith.mulf %327, %310 : vector<8x32xf32>
    %338 = arith.addf %336, %337 : vector<8x32xf32>
    %339 = vector.extract_strided_slice %268 {offsets = [16, 0], sizes = [8, 32], strides = [1, 1]} : vector<64x32xf32> to vector<8x32xf32>
    %340 = vector.extract_strided_slice %274 {offsets = [16, 0], sizes = [8, 32], strides = [1, 1]} : vector<64x32xf32> to vector<8x32xf32>
    %341 = vector.extract_strided_slice %278 {offsets = [16, 0], sizes = [8, 32], strides = [1, 1]} : vector<64x32xf32> to vector<8x32xf32>
    %cst_82 = arith.constant dense<0.000000e+00> : vector<8x32xf32>
    %342 = tpu.matmul %338, %279, %cst_82 {dimension_numbers = #tpu.dot_dimension_numbers<[1], [0], [0], [1], [0, 0, 1, 1], [], []>} : vector<8x32xf32>, vector<32x32xf32>, vector<8x32xf32> -> vector<8x32xf32>
    %343 = arith.addf %339, %342 : vector<8x32xf32>
    %344 = arith.negf %343 : vector<8x32xf32>
    %345 = math.exp %344 : vector<8x32xf32>
    %cst_83 = arith.constant 1.000000e+00 : f32
    %346 = vector.broadcast %cst_83 : f32 to vector<8x32xf32>
    %347 = arith.addf %346, %345 : vector<8x32xf32>
    %348 = arith.divf %346, %347 : vector<8x32xf32>
    %cst_84 = arith.constant dense<0.000000e+00> : vector<8x32xf32>
    %349 = tpu.matmul %338, %280, %cst_84 {dimension_numbers = #tpu.dot_dimension_numbers<[1], [0], [0], [1], [0, 0, 1, 1], [], []>} : vector<8x32xf32>, vector<32x32xf32>, vector<8x32xf32> -> vector<8x32xf32>
    %350 = arith.addf %340, %349 : vector<8x32xf32>
    %351 = arith.negf %350 : vector<8x32xf32>
    %352 = math.exp %351 : vector<8x32xf32>
    %cst_85 = arith.constant 1.000000e+00 : f32
    %353 = vector.broadcast %cst_85 : f32 to vector<8x32xf32>
    %354 = arith.addf %353, %352 : vector<8x32xf32>
    %355 = arith.divf %353, %354 : vector<8x32xf32>
    %cst_86 = arith.constant dense<0.000000e+00> : vector<8x32xf32>
    %356 = tpu.matmul %338, %281, %cst_86 {dimension_numbers = #tpu.dot_dimension_numbers<[1], [0], [0], [1], [0, 0, 1, 1], [], []>} : vector<8x32xf32>, vector<32x32xf32>, vector<8x32xf32> -> vector<8x32xf32>
    %357 = vector.broadcast %282 : vector<1x32xf32> to vector<8x32xf32>
    %358 = arith.addf %356, %357 : vector<8x32xf32>
    %359 = arith.mulf %348, %358 : vector<8x32xf32>
    %360 = arith.addf %341, %359 : vector<8x32xf32>
    %361 = math.tanh %360 : vector<8x32xf32>
    %cst_87 = arith.constant 1.000000e+00 : f32
    %362 = vector.broadcast %cst_87 : f32 to vector<8x32xf32>
    %363 = arith.subf %362, %355 : vector<8x32xf32>
    %364 = arith.mulf %363, %361 : vector<8x32xf32>
    %365 = arith.mulf %355, %338 : vector<8x32xf32>
    %366 = arith.addf %364, %365 : vector<8x32xf32>
    %367 = vector.extract_strided_slice %268 {offsets = [24, 0], sizes = [8, 32], strides = [1, 1]} : vector<64x32xf32> to vector<8x32xf32>
    %368 = vector.extract_strided_slice %274 {offsets = [24, 0], sizes = [8, 32], strides = [1, 1]} : vector<64x32xf32> to vector<8x32xf32>
    %369 = vector.extract_strided_slice %278 {offsets = [24, 0], sizes = [8, 32], strides = [1, 1]} : vector<64x32xf32> to vector<8x32xf32>
    %cst_88 = arith.constant dense<0.000000e+00> : vector<8x32xf32>
    %370 = tpu.matmul %366, %279, %cst_88 {dimension_numbers = #tpu.dot_dimension_numbers<[1], [0], [0], [1], [0, 0, 1, 1], [], []>} : vector<8x32xf32>, vector<32x32xf32>, vector<8x32xf32> -> vector<8x32xf32>
    %371 = arith.addf %367, %370 : vector<8x32xf32>
    %372 = arith.negf %371 : vector<8x32xf32>
    %373 = math.exp %372 : vector<8x32xf32>
    %cst_89 = arith.constant 1.000000e+00 : f32
    %374 = vector.broadcast %cst_89 : f32 to vector<8x32xf32>
    %375 = arith.addf %374, %373 : vector<8x32xf32>
    %376 = arith.divf %374, %375 : vector<8x32xf32>
    %cst_90 = arith.constant dense<0.000000e+00> : vector<8x32xf32>
    %377 = tpu.matmul %366, %280, %cst_90 {dimension_numbers = #tpu.dot_dimension_numbers<[1], [0], [0], [1], [0, 0, 1, 1], [], []>} : vector<8x32xf32>, vector<32x32xf32>, vector<8x32xf32> -> vector<8x32xf32>
    %378 = arith.addf %368, %377 : vector<8x32xf32>
    %379 = arith.negf %378 : vector<8x32xf32>
    %380 = math.exp %379 : vector<8x32xf32>
    %cst_91 = arith.constant 1.000000e+00 : f32
    %381 = vector.broadcast %cst_91 : f32 to vector<8x32xf32>
    %382 = arith.addf %381, %380 : vector<8x32xf32>
    %383 = arith.divf %381, %382 : vector<8x32xf32>
    %cst_92 = arith.constant dense<0.000000e+00> : vector<8x32xf32>
    %384 = tpu.matmul %366, %281, %cst_92 {dimension_numbers = #tpu.dot_dimension_numbers<[1], [0], [0], [1], [0, 0, 1, 1], [], []>} : vector<8x32xf32>, vector<32x32xf32>, vector<8x32xf32> -> vector<8x32xf32>
    %385 = vector.broadcast %282 : vector<1x32xf32> to vector<8x32xf32>
    %386 = arith.addf %384, %385 : vector<8x32xf32>
    %387 = arith.mulf %376, %386 : vector<8x32xf32>
    %388 = arith.addf %369, %387 : vector<8x32xf32>
    %389 = math.tanh %388 : vector<8x32xf32>
    %cst_93 = arith.constant 1.000000e+00 : f32
    %390 = vector.broadcast %cst_93 : f32 to vector<8x32xf32>
    %391 = arith.subf %390, %383 : vector<8x32xf32>
    %392 = arith.mulf %391, %389 : vector<8x32xf32>
    %393 = arith.mulf %383, %366 : vector<8x32xf32>
    %394 = arith.addf %392, %393 : vector<8x32xf32>
    %395 = vector.extract_strided_slice %268 {offsets = [32, 0], sizes = [8, 32], strides = [1, 1]} : vector<64x32xf32> to vector<8x32xf32>
    %396 = vector.extract_strided_slice %274 {offsets = [32, 0], sizes = [8, 32], strides = [1, 1]} : vector<64x32xf32> to vector<8x32xf32>
    %397 = vector.extract_strided_slice %278 {offsets = [32, 0], sizes = [8, 32], strides = [1, 1]} : vector<64x32xf32> to vector<8x32xf32>
    %cst_94 = arith.constant dense<0.000000e+00> : vector<8x32xf32>
    %398 = tpu.matmul %394, %279, %cst_94 {dimension_numbers = #tpu.dot_dimension_numbers<[1], [0], [0], [1], [0, 0, 1, 1], [], []>} : vector<8x32xf32>, vector<32x32xf32>, vector<8x32xf32> -> vector<8x32xf32>
    %399 = arith.addf %395, %398 : vector<8x32xf32>
    %400 = arith.negf %399 : vector<8x32xf32>
    %401 = math.exp %400 : vector<8x32xf32>
    %cst_95 = arith.constant 1.000000e+00 : f32
    %402 = vector.broadcast %cst_95 : f32 to vector<8x32xf32>
    %403 = arith.addf %402, %401 : vector<8x32xf32>
    %404 = arith.divf %402, %403 : vector<8x32xf32>
    %cst_96 = arith.constant dense<0.000000e+00> : vector<8x32xf32>
    %405 = tpu.matmul %394, %280, %cst_96 {dimension_numbers = #tpu.dot_dimension_numbers<[1], [0], [0], [1], [0, 0, 1, 1], [], []>} : vector<8x32xf32>, vector<32x32xf32>, vector<8x32xf32> -> vector<8x32xf32>
    %406 = arith.addf %396, %405 : vector<8x32xf32>
    %407 = arith.negf %406 : vector<8x32xf32>
    %408 = math.exp %407 : vector<8x32xf32>
    %cst_97 = arith.constant 1.000000e+00 : f32
    %409 = vector.broadcast %cst_97 : f32 to vector<8x32xf32>
    %410 = arith.addf %409, %408 : vector<8x32xf32>
    %411 = arith.divf %409, %410 : vector<8x32xf32>
    %cst_98 = arith.constant dense<0.000000e+00> : vector<8x32xf32>
    %412 = tpu.matmul %394, %281, %cst_98 {dimension_numbers = #tpu.dot_dimension_numbers<[1], [0], [0], [1], [0, 0, 1, 1], [], []>} : vector<8x32xf32>, vector<32x32xf32>, vector<8x32xf32> -> vector<8x32xf32>
    %413 = vector.broadcast %282 : vector<1x32xf32> to vector<8x32xf32>
    %414 = arith.addf %412, %413 : vector<8x32xf32>
    %415 = arith.mulf %404, %414 : vector<8x32xf32>
    %416 = arith.addf %397, %415 : vector<8x32xf32>
    %417 = math.tanh %416 : vector<8x32xf32>
    %cst_99 = arith.constant 1.000000e+00 : f32
    %418 = vector.broadcast %cst_99 : f32 to vector<8x32xf32>
    %419 = arith.subf %418, %411 : vector<8x32xf32>
    %420 = arith.mulf %419, %417 : vector<8x32xf32>
    %421 = arith.mulf %411, %394 : vector<8x32xf32>
    %422 = arith.addf %420, %421 : vector<8x32xf32>
    %423 = vector.extract_strided_slice %268 {offsets = [40, 0], sizes = [8, 32], strides = [1, 1]} : vector<64x32xf32> to vector<8x32xf32>
    %424 = vector.extract_strided_slice %274 {offsets = [40, 0], sizes = [8, 32], strides = [1, 1]} : vector<64x32xf32> to vector<8x32xf32>
    %425 = vector.extract_strided_slice %278 {offsets = [40, 0], sizes = [8, 32], strides = [1, 1]} : vector<64x32xf32> to vector<8x32xf32>
    %cst_100 = arith.constant dense<0.000000e+00> : vector<8x32xf32>
    %426 = tpu.matmul %422, %279, %cst_100 {dimension_numbers = #tpu.dot_dimension_numbers<[1], [0], [0], [1], [0, 0, 1, 1], [], []>} : vector<8x32xf32>, vector<32x32xf32>, vector<8x32xf32> -> vector<8x32xf32>
    %427 = arith.addf %423, %426 : vector<8x32xf32>
    %428 = arith.negf %427 : vector<8x32xf32>
    %429 = math.exp %428 : vector<8x32xf32>
    %cst_101 = arith.constant 1.000000e+00 : f32
    %430 = vector.broadcast %cst_101 : f32 to vector<8x32xf32>
    %431 = arith.addf %430, %429 : vector<8x32xf32>
    %432 = arith.divf %430, %431 : vector<8x32xf32>
    %cst_102 = arith.constant dense<0.000000e+00> : vector<8x32xf32>
    %433 = tpu.matmul %422, %280, %cst_102 {dimension_numbers = #tpu.dot_dimension_numbers<[1], [0], [0], [1], [0, 0, 1, 1], [], []>} : vector<8x32xf32>, vector<32x32xf32>, vector<8x32xf32> -> vector<8x32xf32>
    %434 = arith.addf %424, %433 : vector<8x32xf32>
    %435 = arith.negf %434 : vector<8x32xf32>
    %436 = math.exp %435 : vector<8x32xf32>
    %cst_103 = arith.constant 1.000000e+00 : f32
    %437 = vector.broadcast %cst_103 : f32 to vector<8x32xf32>
    %438 = arith.addf %437, %436 : vector<8x32xf32>
    %439 = arith.divf %437, %438 : vector<8x32xf32>
    %cst_104 = arith.constant dense<0.000000e+00> : vector<8x32xf32>
    %440 = tpu.matmul %422, %281, %cst_104 {dimension_numbers = #tpu.dot_dimension_numbers<[1], [0], [0], [1], [0, 0, 1, 1], [], []>} : vector<8x32xf32>, vector<32x32xf32>, vector<8x32xf32> -> vector<8x32xf32>
    %441 = vector.broadcast %282 : vector<1x32xf32> to vector<8x32xf32>
    %442 = arith.addf %440, %441 : vector<8x32xf32>
    %443 = arith.mulf %432, %442 : vector<8x32xf32>
    %444 = arith.addf %425, %443 : vector<8x32xf32>
    %445 = math.tanh %444 : vector<8x32xf32>
    %cst_105 = arith.constant 1.000000e+00 : f32
    %446 = vector.broadcast %cst_105 : f32 to vector<8x32xf32>
    %447 = arith.subf %446, %439 : vector<8x32xf32>
    %448 = arith.mulf %447, %445 : vector<8x32xf32>
    %449 = arith.mulf %439, %422 : vector<8x32xf32>
    %450 = arith.addf %448, %449 : vector<8x32xf32>
    %451 = vector.extract_strided_slice %268 {offsets = [48, 0], sizes = [8, 32], strides = [1, 1]} : vector<64x32xf32> to vector<8x32xf32>
    %452 = vector.extract_strided_slice %274 {offsets = [48, 0], sizes = [8, 32], strides = [1, 1]} : vector<64x32xf32> to vector<8x32xf32>
    %453 = vector.extract_strided_slice %278 {offsets = [48, 0], sizes = [8, 32], strides = [1, 1]} : vector<64x32xf32> to vector<8x32xf32>
    %cst_106 = arith.constant dense<0.000000e+00> : vector<8x32xf32>
    %454 = tpu.matmul %450, %279, %cst_106 {dimension_numbers = #tpu.dot_dimension_numbers<[1], [0], [0], [1], [0, 0, 1, 1], [], []>} : vector<8x32xf32>, vector<32x32xf32>, vector<8x32xf32> -> vector<8x32xf32>
    %455 = arith.addf %451, %454 : vector<8x32xf32>
    %456 = arith.negf %455 : vector<8x32xf32>
    %457 = math.exp %456 : vector<8x32xf32>
    %cst_107 = arith.constant 1.000000e+00 : f32
    %458 = vector.broadcast %cst_107 : f32 to vector<8x32xf32>
    %459 = arith.addf %458, %457 : vector<8x32xf32>
    %460 = arith.divf %458, %459 : vector<8x32xf32>
    %cst_108 = arith.constant dense<0.000000e+00> : vector<8x32xf32>
    %461 = tpu.matmul %450, %280, %cst_108 {dimension_numbers = #tpu.dot_dimension_numbers<[1], [0], [0], [1], [0, 0, 1, 1], [], []>} : vector<8x32xf32>, vector<32x32xf32>, vector<8x32xf32> -> vector<8x32xf32>
    %462 = arith.addf %452, %461 : vector<8x32xf32>
    %463 = arith.negf %462 : vector<8x32xf32>
    %464 = math.exp %463 : vector<8x32xf32>
    %cst_109 = arith.constant 1.000000e+00 : f32
    %465 = vector.broadcast %cst_109 : f32 to vector<8x32xf32>
    %466 = arith.addf %465, %464 : vector<8x32xf32>
    %467 = arith.divf %465, %466 : vector<8x32xf32>
    %cst_110 = arith.constant dense<0.000000e+00> : vector<8x32xf32>
    %468 = tpu.matmul %450, %281, %cst_110 {dimension_numbers = #tpu.dot_dimension_numbers<[1], [0], [0], [1], [0, 0, 1, 1], [], []>} : vector<8x32xf32>, vector<32x32xf32>, vector<8x32xf32> -> vector<8x32xf32>
    %469 = vector.broadcast %282 : vector<1x32xf32> to vector<8x32xf32>
    %470 = arith.addf %468, %469 : vector<8x32xf32>
    %471 = arith.mulf %460, %470 : vector<8x32xf32>
    %472 = arith.addf %453, %471 : vector<8x32xf32>
    %473 = math.tanh %472 : vector<8x32xf32>
    %cst_111 = arith.constant 1.000000e+00 : f32
    %474 = vector.broadcast %cst_111 : f32 to vector<8x32xf32>
    %475 = arith.subf %474, %467 : vector<8x32xf32>
    %476 = arith.mulf %475, %473 : vector<8x32xf32>
    %477 = arith.mulf %467, %450 : vector<8x32xf32>
    %478 = arith.addf %476, %477 : vector<8x32xf32>
    %479 = vector.extract_strided_slice %268 {offsets = [56, 0], sizes = [8, 32], strides = [1, 1]} : vector<64x32xf32> to vector<8x32xf32>
    %480 = vector.extract_strided_slice %274 {offsets = [56, 0], sizes = [8, 32], strides = [1, 1]} : vector<64x32xf32> to vector<8x32xf32>
    %481 = vector.extract_strided_slice %278 {offsets = [56, 0], sizes = [8, 32], strides = [1, 1]} : vector<64x32xf32> to vector<8x32xf32>
    %cst_112 = arith.constant dense<0.000000e+00> : vector<8x32xf32>
    %482 = tpu.matmul %478, %279, %cst_112 {dimension_numbers = #tpu.dot_dimension_numbers<[1], [0], [0], [1], [0, 0, 1, 1], [], []>} : vector<8x32xf32>, vector<32x32xf32>, vector<8x32xf32> -> vector<8x32xf32>
    %483 = arith.addf %479, %482 : vector<8x32xf32>
    %484 = arith.negf %483 : vector<8x32xf32>
    %485 = math.exp %484 : vector<8x32xf32>
    %cst_113 = arith.constant 1.000000e+00 : f32
    %486 = vector.broadcast %cst_113 : f32 to vector<8x32xf32>
    %487 = arith.addf %486, %485 : vector<8x32xf32>
    %488 = arith.divf %486, %487 : vector<8x32xf32>
    %cst_114 = arith.constant dense<0.000000e+00> : vector<8x32xf32>
    %489 = tpu.matmul %478, %280, %cst_114 {dimension_numbers = #tpu.dot_dimension_numbers<[1], [0], [0], [1], [0, 0, 1, 1], [], []>} : vector<8x32xf32>, vector<32x32xf32>, vector<8x32xf32> -> vector<8x32xf32>
    %490 = arith.addf %480, %489 : vector<8x32xf32>
    %491 = arith.negf %490 : vector<8x32xf32>
    %492 = math.exp %491 : vector<8x32xf32>
    %cst_115 = arith.constant 1.000000e+00 : f32
    %493 = vector.broadcast %cst_115 : f32 to vector<8x32xf32>
    %494 = arith.addf %493, %492 : vector<8x32xf32>
    %495 = arith.divf %493, %494 : vector<8x32xf32>
    %cst_116 = arith.constant dense<0.000000e+00> : vector<8x32xf32>
    %496 = tpu.matmul %478, %281, %cst_116 {dimension_numbers = #tpu.dot_dimension_numbers<[1], [0], [0], [1], [0, 0, 1, 1], [], []>} : vector<8x32xf32>, vector<32x32xf32>, vector<8x32xf32> -> vector<8x32xf32>
    %497 = vector.broadcast %282 : vector<1x32xf32> to vector<8x32xf32>
    %498 = arith.addf %496, %497 : vector<8x32xf32>
    %499 = arith.mulf %488, %498 : vector<8x32xf32>
    %500 = arith.addf %481, %499 : vector<8x32xf32>
    %501 = math.tanh %500 : vector<8x32xf32>
    %cst_117 = arith.constant 1.000000e+00 : f32
    %502 = vector.broadcast %cst_117 : f32 to vector<8x32xf32>
    %503 = arith.subf %502, %495 : vector<8x32xf32>
    %504 = arith.mulf %503, %501 : vector<8x32xf32>
    %505 = arith.mulf %495, %478 : vector<8x32xf32>
    %506 = arith.addf %504, %505 : vector<8x32xf32>
    %507 = arith.mulf %506, %506 : vector<8x32xf32>
    %cst_118 = arith.constant dense<0.000000e+00> : vector<8xf32>
    %508 = vector.multi_reduction <add>, %507, %cst_118 [1] : vector<8x32xf32> to vector<8xf32>
    %509 = vector.shape_cast %508 : vector<8xf32> to vector<8x1xf32>
    %cst_119 = arith.constant 1.000000e-24 : f32
    %510 = vector.broadcast %cst_119 : f32 to vector<8x1xf32>
    %511 = arith.addf %509, %510 : vector<8x1xf32>
    %512 = math.rsqrt %511 : vector<8x1xf32>
    %513 = vector.broadcast %512 : vector<8x1xf32> to vector<8x32xf32>
    %514 = arith.mulf %506, %513 : vector<8x32xf32>
    %c0_120 = arith.constant 0 : index
    %c0_121 = arith.constant 0 : index
    %515 = vector.load %arg10[%c0_120, %c0_121] : memref<32x4xf32, #tpu.memory_space<vmem>>, vector<32x4xf32>
    %cst_122 = arith.constant dense<0.000000e+00> : vector<8x4xf32>
    %516 = tpu.matmul %514, %515, %cst_122 {dimension_numbers = #tpu.dot_dimension_numbers<[1], [0], [0], [1], [0, 0, 1, 1], [], []>} : vector<8x32xf32>, vector<32x4xf32>, vector<8x4xf32> -> vector<8x4xf32>
    %c0_123 = arith.constant 0 : index
    %c0_124 = arith.constant 0 : index
    %517 = vector.load %arg11[%c0_123, %c0_124] : memref<1x4xf32, #tpu.memory_space<vmem>>, vector<1x4xf32>
    %518 = vector.broadcast %517 : vector<1x4xf32> to vector<8x4xf32>
    %519 = arith.addf %516, %518 : vector<8x4xf32>
    %c0_125 = arith.constant 0 : index
    %c0_126 = arith.constant 0 : index
    %520 = vector.load %arg12[%c0_125, %c0_126] : memref<1x1xf32, #tpu.memory_space<vmem>>, vector<1x1xf32>
    %cst_127 = arith.constant 0.000000e+00 : f32
    %521 = vector.broadcast %cst_127 : f32 to vector<8x4xf32>
    %522 = arith.cmpf oge, %519, %521 : vector<8x4xf32>
    %523 = vector.broadcast %520 : vector<1x1xf32> to vector<8x4xf32>
    %524 = arith.mulf %523, %519 : vector<8x4xf32>
    %525 = arith.select %522, %519, %524 : vector<8x4xi1>, vector<8x4xf32>
    %c0_128 = arith.constant 0 : index
    %c0_129 = arith.constant 0 : index
    %526 = vector.load %arg13[%c0_128, %c0_129] : memref<8x4xf32, #tpu.memory_space<vmem>>, vector<8x4xf32>
    tpu.vector_store %arg13[%c0_128, %c0_129], %525 {strides = array<i32>} : memref<8x4xf32, #tpu.memory_space<vmem>>, vector<8x4xf32>,
    return
  }
}

</mosaic_0001>

<bundles_post_ra>
// kernel: net_forward.1
= control target key start
LH: loop header
LB: loop body
LE: loop exit
PB: predicated region body
PF: predicated region fallthrough
CT: control target
= control target key end

     0   :  { %v2800_v0 = vmov 0   ;;  %vm136_vm0 = vcmask 1041408   ;;  %s2801_s22 = smov 64   ;;  %v2803_v13 = vmov 0.0   ;;  %v54_v20 = vlaneseq  ;;  %s3631_s0 = inlined_call_operand.vmem [shape: s32[64,1], index: 0, kind: input, shape index: {}]   ;;  %s3632_s3 = inlined_call_operand.vmem [shape: f32[32,96], index: 3, kind: input, shape index: {}]   ;;  %s3633_s1 = inlined_call_operand.vmem [shape: f32[50,32], index: 1, kind: input, shape index: {}]   ;;  %s3634_s2 = inlined_call_operand.vmem [shape: f32[32,96], index: 2, kind: input, shape index: {}]   ;;  %s3635_s5 = inlined_call_operand.vmem [shape: f32[1,96], index: 5, kind: input, shape index: {}]   ;;  %s3636_s4 = inlined_call_operand.vmem [shape: f32[1,96], index: 4, kind: input, shape index: {}]   ;;  %s3637_s6 = inlined_call_operand.vmem [shape: f32[32,96], index: 6, kind: input, shape index: {}]   ;;  %s3638_s8 = inlined_call_operand.vmem [shape: f32[1,96], index: 8, kind: input, shape index: {}]   ;;  %s3639_s7 = inlined_call_operand.vmem [shape: f32[32,96], index: 7, kind: input, shape index: {}]   ;;  %s3640_s9 = inlined_call_operand.vmem [shape: f32[1,96], index: 9, kind: input, shape index: {}]   ;;  %s3641_s12 = inlined_call_operand.<no memory space> [shape: f32[1,1], index: 12, kind: input, shape index: {}]   ;;  %s3642_s11 = inlined_call_operand.vmem [shape: f32[1,4], index: 11, kind: input, shape index: {}]   ;;  %s3643_s10 = inlined_call_operand.vmem [shape: f32[32,4], index: 10, kind: input, shape index: {}]   ;;  %s3644_s13 = inlined_call_operand.vmem [shape: f32[8,4], index: 13, kind: output, shape index: {}]  }
   0x1   :  { %2587 = vset.pattern.permute.xlu0 %v2800_v0  ;;  %v46_v1 = vld [vmem:[%s3631_s0] sm:$0xff]  ;;  %v2881_v2 = vld [vmem:[%s3632_s3 + $0x18] sm:$0xff]  ;;  %2608 = vset.pattern.permute.xlu2 %v2800_v0  ;;  %v2891_v4 = vld [vmem:[%s3632_s3 + $0x8] sm:$0xff]  ;;  %vm111_vm1 = vcmask 408576   ;;  %vm191_vm4 = vcmask 261120  }
   0x2   :  { %57 = vperm.xlu0 %2587, %v46_v1   ;;  %v2886_v3 = vld [vmem:[%s3632_s3] sm:$0xff]  ;;  %295 = vmatpush.msra.mxu2 %v2881_v2  ;;  %v2897_v5 = vld [vmem:[%s3632_s3 + $0x10] sm:$0xff]  ;;  %v109_v8 = vld [vmem:[%s3633_s1 + $0x28] sm:$0xff]  ;;  %s2802_s3 = smov 96   ;;  %v2944_v21 = vand.u32 127, %v54_v20 }
   0x3   :  { %v2593_v6 = vpack.i.bf16 %v2886_v3, %v2891_v4  ;;  %v110_v7 = vld [vmem:[%s3633_s1 + $0x30] sm:$0x3]  ;;  %2609 = vset.pattern.permute.xlu1 %v2800_v0  ;;  %v108_v9 = vld [vmem:[%s3633_s1 + $0x20] sm:$0xff]  ;;  %v2588_v10 = vpack.i.bf16 %v2897_v5, %v2881_v2  ;;  %v107_v11 = vld [vmem:[%s3633_s1 + $0x18] sm:$0xff] }
   0x4   :  { %2479 = vmatpush.msk.msra.mxu0 %vm136_vm0, %v110_v7  ;;  %296 = vmatpush.msra.mxu2 %v2897_v5  ;;  %v106_v12 = vld [vmem:[%s3633_s1 + $0x10] sm:$0xff]  ;;  %v105_v14 = vld [vmem:[%s3633_s1 + $0x8] sm:$0xff]  ;;  %v104_v16 = vld [vmem:[%s3633_s1] sm:$0xff] }
   0x5   :  { %2594 = vrot.lane.b32.xlu1 %v2593_v6, %s2801_s22  ;;  %2604 = vrot.lane.b32.xlu2 %v2593_v6, %s2802_s3  ;;  %v47_v15 = vld [vmem:[%s3631_s0 + $0x8] sm:$0xff]  ;;  %v184_v17 = vld [vmem:[%s3634_s2 + $0x18] sm:$0xff] }
   0x6   :  { %150 = vmatpush.msra.mxu0 %v109_v8  ;;  %297 = vmatpush.msra.mxu2 %v2891_v4  ;;  %v183_v18 = vld [vmem:[%s3634_s2 + $0x10] sm:$0xff]  ;;  %v182_v19 = vld [vmem:[%s3634_s2 + $0x8] sm:$0xff]  ;;  %v181_v38 = vld [vmem:[%s3634_s2] sm:$0xff]  ;;  %s2804_s2 = smov 32  }
   0x7   :  { %228 = vmatpush.msra.mxu1 %v184_v17  ;;  %v2631_v39 = vld [vmem:[%s3635_s5] ss:$0 sm:$0xff] }
   0x8   :  { %151 = vmatpush.msra.mxu0 %v108_v9  ;;  %298 = vmatpush.msra.mxu2 %v2886_v3  ;;  %v189_v43 = vld [vmem:[%s3636_s4] sm:$0x1] }
   0x9   :  { %299 = vmatmul.f32.vlgmr.msra.gmra.mxu2 %v2803_v13  ;;  %229 = vmatpush.msra.mxu1 %v183_v18  ;;  %v190_v44 = vld [vmem:[%s3635_s5] sm:$0x1] }
   0xa   :  { %2589 = vrot.lane.b32.xlu0 %v2588_v10, %s2801_s22  ;;  %152 = vmatpush.msra.mxu0 %v107_v11  ;;  %v257_v45 = vadd.f32 %v190_v44, %v189_v43  ;;  %v3042_v8 = vld [vmem:[%s3636_s4] ss:$0 sm:$0xff] }
   0xb   :  { %230 = vmatpush.msra.mxu1 %v182_v19 }
   0xc   :  { %153 = vmatpush.msra.mxu0 %v106_v12  ;;  %v3032_v46 = vperm.slane %v257_v45, 0 }
   0xd   :  { %2599 = vrot.lane.b32.xlu1 %v2588_v10, %s2802_s3  ;;  %231 = vmatpush.msra.mxu1 %v181_v38 }
   0xe   :  { %154 = vmatpush.msra.mxu0 %v105_v14  ;;  %397 = vrot.lane.b32.xlu2 %v2631_v39, %s2801_s22 }
  0x10   :  { %155 = vmatpush.msra.mxu0 %v104_v16 }
  0x12   :  { %60 = vperm.xlu0 %2587, %v47_v15  }
  0x5f   :  { %v2605_v30 = vpop.permute.xlu2 %2604 }
  0x60   :  { %v2964_v34 = vunpack.i.l.bf16 %v2605_v30  ;;  %v2968_v36 = vunpack.i.h.bf16 %v2605_v30 }
  0x68   :  { %v3035_v61 = vpop.permute.xlu2 %397 }
  0x74   :  { %v58_v22 = vpop.permute.xlu0 %57 }
  0x75   :  { %vm80_vm2 = vcmp.eq.s32.totalorder %v2944_v21, %v58_v22 }
  0x76   :  { %v2471_v23 = vsel %vm80_vm2, 1.0, %v2803_v13 }
  0x77   :  { %2480 = vmatmul.msk.f32.vlgmr.msra.gmra.mxu0 %vm111_vm1, %v2471_v23  ;;  %v2595_v24 = vpop.permute.xlu1 %2594 }
  0x78   :  { %v2953_v28 = vunpack.i.l.bf16 %v2595_v24  ;;  %v2960_v33 = vunpack.i.h.bf16 %v2595_v24 }
  0x7c   :  { %v2590_v25 = vpop.permute.xlu0 %2589 }
  0x7d   :  { %v2949_v26 = vunpack.i.h.bf16 %v2590_v25  ;;  %v2951_v27 = vunpack.i.l.bf16 %v2590_v25 }
  0x7f   :  { %v2600_v29 = vpop.permute.xlu1 %2599  ;;  %412 = vmatpush.msrb.mxu2 %v2951_v27 }
  0x80   :  { %v2956_v31 = vunpack.i.h.bf16 %v2600_v29  ;;  %v2958_v32 = vunpack.i.l.bf16 %v2600_v29 }
  0x81   :  { %413 = vmatpush.msrb.mxu2 %v2949_v26 }
  0x82   :  { %351 = vmatpush.msra.mxu3 %v2958_v32  ;;  %1112 = vmatpush.msrb.mxu0 %v2958_v32 }
  0x83   :  { %414 = vmatpush.msrb.mxu2 %v2953_v28  ;;  %988 = vmatpush.msrb.mxu1 %v2958_v32 }
  0x84   :  { %v61_v35 = vpop.permute.xlu0 %60  ;;  %352 = vmatpush.msra.mxu3 %v2956_v31  ;;  %1113 = vmatpush.msrb.mxu0 %v2956_v31 }
  0x85   :  { %vm81_vm3 = vcmp.eq.s32.totalorder %v2944_v21, %v61_v35  ;;  %415 = vmatpush.msrb.mxu2 %v2960_v33  ;;  %989 = vmatpush.msrb.mxu1 %v2956_v31 }
  0x86   :  { %v2472_v37 = vsel %vm81_vm3, 1.0, %v2803_v13  ;;  %353 = vmatpush.msra.mxu3 %v2964_v34  ;;  %1114 = vmatpush.msrb.mxu0 %v2964_v34 }
  0x87   :  { %2481 = vmatmul.msk.f32.gmra.mxu0 %vm111_vm1, %v2472_v37  ;;  %416 = vmatmul.f32.vlgmr.msrb.gmra.mxu2 %v2803_v13 }
  0x88   :  { %354 = vmatpush.msra.mxu3 %v2968_v36  ;;  %1115 = vmatpush.msrb.mxu0 %v2968_v36 }
  0x89   :  { %355 = vmatmul.f32.vlgmr.msra.gmra.mxu3 %v2803_v13  ;;  %492 = vmatpush.msra.mxu2 %v2958_v32 }
  0x8a   :  { %1280 = vmatpush.msra.mxu0 %v2951_v27  ;;  %452 = vmatpush.msrb.mxu3 %v2881_v2 }
  0x8b   :  { %493 = vmatpush.msra.mxu2 %v2956_v31  ;;  %990 = vmatpush.msrb.mxu1 %v2964_v34 }
  0x8c   :  { %1281 = vmatpush.msra.mxu0 %v2949_v26  ;;  %453 = vmatpush.msrb.mxu3 %v2897_v5  ;;  %v300_v48 = vpop.f32.mrf.mxu2 }
  0x8d   :  { %494 = vmatpush.msra.mxu2 %v2964_v34  ;;  %991 = vmatpush.msrb.mxu1 %v2968_v36 }
  0x8e   :  { %1282 = vmatpush.msra.mxu0 %v2953_v28  ;;  %454 = vmatpush.msrb.mxu3 %v2891_v4 }
  0x8f   :  { %495 = vmatpush.msra.mxu2 %v2968_v36 }
  0x90   :  { %1283 = vmatpush.msra.mxu0 %v2960_v33  ;;  %455 = vmatpush.msrb.mxu3 %v2886_v3 }
  0x91   :  { %576 = vmatpush.msrb.mxu2 %v2881_v2 }
  0x92   :  { %536 = vmatpush.msra.mxu3 %v2951_v27 }
  0x93   :  { %577 = vmatpush.msrb.mxu2 %v2897_v5 }
  0x94   :  { %537 = vmatpush.msra.mxu3 %v2949_v26 }
  0x95   :  { %578 = vmatpush.msrb.mxu2 %v2891_v4 }
  0x96   :  { %538 = vmatpush.msra.mxu3 %v2953_v28 }
  0x97   :  { %579 = vmatpush.msrb.mxu2 %v2886_v3 }
  0x98   :  { %539 = vmatpush.msra.mxu3 %v2960_v33 }
  0xf4   :  { %v3013_v40 = vpop.f32.mrf.mxu0 }
  0xf5   :  { %2488 = vmatmul.msk.f32.vlgmr.msra.gmra.mxu1 %vm191_vm4, %v3013_v40 }
  0xf6   :  { %1156 = vmatpush.msra.mxu1 %v2951_v27 }
  0xf8   :  { %1157 = vmatpush.msra.mxu1 %v2949_v26 }
  0xfa   :  { %1158 = vmatpush.msra.mxu1 %v2953_v28 }
  0xfc   :  { %1159 = vmatpush.msra.mxu1 %v2960_v33 }
 0x104   :  { %v3021_v41 = vpop.f32.mrf.mxu0 }
 0x105   :  { %2489 = vmatmul.msk.f32.gmra.mxu1 %vm191_vm4, %v3021_v41 }
 0x10a   :  { %v417_v58 = vpop.f32.mrf.mxu2 }
 0x10b   :  { %v418_v63 = vadd.f32 %v417_v58, %v3035_v61 }
 0x10c   :  { %v356_v42 = vpop.f32.mrf.mxu3 }
 0x10d   :  { %360 = vrot.lane.b32.xlu2 %v356_v42, %s2804_s2 }
 0x167   :  { %v361_v14 = vpop.permute.xlu2 %360 }
 0x172   :  { %v233_v47 = vpop.f32.mrf.mxu1 }
 0x173   :  { %v261_v49 = vadd.f32 %v3032_v46, %v233_v47  ;;  %v272_v9 = vadd.f32 %v3042_v8, %v233_v47 }
 0x175   :  { %v303_v50 = vadd.f32 %v300_v48, %v261_v49  ;;  %v363_v15 = vadd.f32 %v361_v14, %v261_v49 }
 0x177   :  { %v2496_v51 = vmul.f32 -1.442695, %v303_v50  ;;  %v2497_v16 = vmul.f32 -1.442695, %v363_v15 }
 0x179   :  { %2636 = vpow2.f32 %v2496_v51 }
 0x17f   :  { %v2637_v52 = vpop.eup %2636 }
 0x180   :  { %v307_v53 = vadd.f32 1.0, %v2637_v52 }
 0x182   :  { %2638 = vrcp.f32 %v307_v53  ;;  %v319_v57 = vand.u32 2147483648, %v307_v53  ;;  %v317_v60 = vand.u32 2147483647, %v307_v53  ;;  %vm313_vm6 = vweird.f32 %v307_v53  ;;  %v236_v47 = vpop.f32.mrf.mxu1 }
 0x183   :  { %v262_v48 = vadd.f32 %v3032_v46, %v236_v47 }
 0x184   :  { %v320_v0 = vor.u32 1.1754944e-38, %v319_v57  ;;  %vm318_vm8 = vcmp.eq.f32.partialorder %v317_v60, 8.507059e+37 }
 0x188   :  { %v2639_v54 = vpop.eup %2638 }
 0x189   :  { %v309_v55 = vmul.f32 %v2639_v54, %v307_v53  ;;  %vm314_vm5 = vweird.f32 %v2639_v54 }
 0x18a   :  { %vm315_vm7 = vmor %vm313_vm6, %vm314_vm5 }
 0x18b   :  { %v310_v56 = vsub.f32 1.0, %v309_v55 }
 0x18d   :  { %v311_v59 = vmul.f32 %v2639_v54, %v310_v56 }
 0x18f   :  { %v312_v62 = vadd.f32 %v2639_v54, %v311_v59 }
 0x191   :  { %v316_v1 = vsel %vm315_vm7, %v2639_v54, %v312_v62 }
 0x192   :  { %v321_v6 = vsel %vm318_vm8, %v320_v0, %v316_v1 }
 0x193   :  { %v420_v7 = vmul.f32 %v418_v63, %v321_v6 }
 0x195   :  { %422 = vrot.lane.b32.xlu1 %v420_v7, %s2801_s22 }
 0x207   :  { %v423_v10 = vpop.permute.xlu1 %422 }
 0x208   :  { %v425_v11 = vadd.f32 %v423_v10, %v272_v9  ;;  %v48_v10 = vld [vmem:[%s3631_s0 + $0x10] sm:$0xff] }
 0x209   :  { %63 = vperm.xlu2 %2608, %v48_v10  }
 0x20a   :  { %2640 = vtanh.f32 %v425_v11  ;;  %v273_v11 = vadd.f32 %v3042_v8, %v236_v47 }
 0x20b   :  { %2642 = vpow2.f32 %v2497_v16 }
 0x210   :  { %v2641_v12 = vpop.eup %2640 }
 0x211   :  { %429 = vrot.lane.b32.xlu0 %v2641_v12, %s2802_s3  ;;  %v2643_v17 = vpop.eup %2642 }
 0x212   :  { %v367_v18 = vadd.f32 1.0, %v2643_v17 }
 0x214   :  { %2644 = vrcp.f32 %v367_v18  ;;  %v379_v25 = vand.u32 2147483648, %v367_v18  ;;  %vm373_vm10 = vweird.f32 %v367_v18  ;;  %v377_v29 = vand.u32 2147483647, %v367_v18 }
 0x216   :  { %v380_v35 = vor.u32 1.1754944e-38, %v379_v25  ;;  %vm378_vm12 = vcmp.eq.f32.partialorder %v377_v29, 8.507059e+37 }
 0x21a   :  { %v2645_v19 = vpop.eup %2644 }
 0x21b   :  { %v369_v20 = vmul.f32 %v2645_v19, %v367_v18  ;;  %vm374_vm9 = vweird.f32 %v2645_v19 }
 0x21c   :  { %vm375_vm11 = vmor %vm373_vm10, %vm374_vm9 }
 0x21d   :  { %v370_v22 = vsub.f32 1.0, %v369_v20 }
 0x21f   :  { %v371_v23 = vmul.f32 %v2645_v19, %v370_v22 }
 0x221   :  { %v372_v24 = vadd.f32 %v2645_v19, %v371_v23 }
 0x223   :  { %v376_v30 = vsel %vm375_vm11, %v2645_v19, %v372_v24 }
 0x224   :  { %v381_v37 = vsel %vm378_vm12, %v380_v35, %v376_v30 }
 0x225   :  { %v427_v38 = vsub.f32 1.0, %v381_v37  ;;  %v433_v42 = vmul.f32 0.0, %v381_v37 }
 0x263   :  { %v64_v20 = vpop.permute.xlu2 %63 }
 0x264   :  { %vm82_vm2 = vcmp.eq.s32.totalorder %v2944_v21, %v64_v20 }
 0x265   :  { %v2473_v22 = vsel %vm82_vm2, 1.0, %v2803_v13 }
 0x266   :  { %2482 = vmatmul.msk.f32.gmra.mxu0 %vm111_vm1, %v2473_v22 }
 0x283   :  { %v430_v39 = vpop.permute.xlu0 %429 }
 0x284   :  { %v432_v43 = vmul.f32 %v430_v39, %v427_v38 }
 0x286   :  { %v3046_v44 = vadd.f32 %v433_v42, %v432_v43 }
 0x288   :  { %436 = vrot.lane.b32.xlu1 %v3046_v44, %s2802_s3 }
 0x2fa   :  { %v437_v45 = vpop.permute.xlu1 %436 }
 0x2fb   :  { %2498 = vmatmul.msk.f32.vlgmr.msrb.gmra.mxu3 %vm191_vm4, %v437_v45  ;;  %2500 = vmatmul.msk.f32.vlgmr.msra.gmra.mxu2 %vm191_vm4, %v437_v45 }
 0x2fc   :  { %616 = vmatpush.msrb.mxu3 %v2958_v32  ;;  %660 = vmatpush.msra.mxu2 %v2951_v27 }
 0x2fe   :  { %617 = vmatpush.msrb.mxu3 %v2956_v31  ;;  %661 = vmatpush.msra.mxu2 %v2949_v26 }
 0x300   :  { %618 = vmatpush.msrb.mxu3 %v2964_v34  ;;  %662 = vmatpush.msra.mxu2 %v2953_v28 }
 0x302   :  { %619 = vmatpush.msrb.mxu3 %v2968_v36  ;;  %663 = vmatpush.msra.mxu2 %v2960_v33 }
 0x303   :  { %2502 = vmatmul.msk.f32.vlgmr.msra.gmra.mxu3 %vm191_vm4, %v437_v45 }
 0x304   :  { %700 = vmatpush.msra.mxu3 %v2881_v2 }
 0x306   :  { %701 = vmatpush.msra.mxu3 %v2897_v5 }
 0x308   :  { %702 = vmatpush.msra.mxu3 %v2891_v4 }
 0x30a   :  { %703 = vmatpush.msra.mxu3 %v2886_v3 }
 0x37e   :  { %v457_v49 = vpop.f32.mrf.mxu3  ;;  %v497_v50 = vpop.f32.mrf.mxu2 }
 0x37f   :  { %v460_v51 = vadd.f32 %v457_v49, %v262_v48  ;;  %501 = vrot.lane.b32.xlu1 %v497_v50, %s2804_s2 }
 0x381   :  { %v2499_v52 = vmul.f32 -1.442695, %v460_v51  ;;  %v3082_v51 = vpop.f32.mrf.mxu0 }
 0x382   :  { %2490 = vmatmul.msk.f32.gmra.mxu1 %vm191_vm4, %v3082_v51 }
 0x383   :  { %2646 = vpow2.f32 %v2499_v52 }
 0x386   :  { %v541_v62 = vpop.f32.mrf.mxu3 }
 0x387   :  { %v542_v6 = vadd.f32 %v541_v62, %v3035_v61 }
 0x389   :  { %v2647_v53 = vpop.eup %2646 }
 0x38a   :  { %v464_v54 = vadd.f32 1.0, %v2647_v53 }
 0x38c   :  { %2648 = vrcp.f32 %v464_v54  ;;  %v476_v58 = vand.u32 2147483648, %v464_v54  ;;  %v474_v60 = vand.u32 2147483647, %v464_v54  ;;  %vm470_vm14 = vweird.f32 %v464_v54 }
 0x38e   :  { %v477_v0 = vor.u32 1.1754944e-38, %v476_v58  ;;  %vm475_vm0 = vcmp.eq.f32.partialorder %v474_v60, 8.507059e+37 }
 0x392   :  { %v2649_v55 = vpop.eup %2648 }
 0x393   :  { %v466_v56 = vmul.f32 %v2649_v55, %v464_v54  ;;  %vm471_vm13 = vweird.f32 %v2649_v55 }
 0x394   :  { %vm472_vm15 = vmor %vm470_vm14, %vm471_vm13 }
 0x395   :  { %v467_v57 = vsub.f32 1.0, %v466_v56 }
 0x397   :  { %v468_v59 = vmul.f32 %v2649_v55, %v467_v57 }
 0x399   :  { %v469_v63 = vadd.f32 %v2649_v55, %v468_v59  ;;  %v50_v59 = vld [vmem:[%s3631_s0 + $0x20] sm:$0xff] }
 0x39b   :  { %v473_v1 = vsel %vm472_vm15, %v2649_v55, %v469_v63 }
 0x39c   :  { %v478_v7 = vsel %vm475_vm0, %v477_v0, %v473_v1 }
 0x39d   :  { %v544_v9 = vmul.f32 %v542_v6, %v478_v7 }
 0x39f   :  { %546 = vrot.lane.b32.xlu0 %v544_v9, %s2801_s22 }
 0x3f1   :  { %v502_v16 = vpop.permute.xlu1 %501 }
 0x3f2   :  { %v504_v17 = vadd.f32 %v502_v16, %v262_v48 }
 0x3f4   :  { %v2501_v18 = vmul.f32 -1.442695, %v504_v17 }
 0x3ff   :  { %v239_v53 = vpop.f32.mrf.mxu1 }
 0x400   :  { %v263_v54 = vadd.f32 %v3032_v46, %v239_v53  ;;  %v274_v22 = vadd.f32 %v3042_v8, %v239_v53 }
 0x411   :  { %v547_v12 = vpop.permute.xlu0 %546 }
 0x412   :  { %v549_v14 = vadd.f32 %v547_v12, %v273_v11 }
 0x414   :  { %2650 = vtanh.f32 %v549_v14 }
 0x415   :  { %2652 = vpow2.f32 %v2501_v18 }
 0x41a   :  { %v2651_v15 = vpop.eup %2650 }
 0x41b   :  { %553 = vrot.lane.b32.xlu2 %v2651_v15, %s2802_s3  ;;  %v2653_v19 = vpop.eup %2652 }
 0x41c   :  { %v508_v23 = vadd.f32 1.0, %v2653_v19 }
 0x41e   :  { %2654 = vrcp.f32 %v508_v23  ;;  %v520_v37 = vand.u32 2147483648, %v508_v23  ;;  %vm514_vm5 = vweird.f32 %v508_v23  ;;  %v518_v38 = vand.u32 2147483647, %v508_v23 }
 0x420   :  { %v521_v42 = vor.u32 1.1754944e-38, %v520_v37  ;;  %vm519_vm7 = vcmp.eq.f32.partialorder %v518_v38, 8.507059e+37 }
 0x424   :  { %v2655_v24 = vpop.eup %2654 }
 0x425   :  { %v510_v25 = vmul.f32 %v2655_v24, %v508_v23  ;;  %vm515_vm3 = vweird.f32 %v2655_v24 }
 0x426   :  { %vm516_vm6 = vmor %vm514_vm5, %vm515_vm3 }
 0x427   :  { %v511_v29 = vsub.f32 1.0, %v510_v25 }
 0x429   :  { %v512_v30 = vmul.f32 %v2655_v24, %v511_v29 }
 0x42b   :  { %v513_v35 = vadd.f32 %v2655_v24, %v512_v30 }
 0x42d   :  { %v517_v39 = vsel %vm516_vm6, %v2655_v24, %v513_v35 }
 0x42e   :  { %v522_v43 = vsel %vm519_vm7, %v521_v42, %v517_v39 }
 0x42f   :  { %v551_v45 = vsub.f32 1.0, %v522_v43  ;;  %v557_v48 = vmul.f32 %v522_v43, %v3046_v44  ;;  %v49_v44 = vld [vmem:[%s3631_s0 + $0x18] sm:$0xff] }
 0x430   :  { %66 = vperm.xlu1 %2609, %v49_v44  }
 0x475   :  { %v554_v47 = vpop.permute.xlu2 %553 }
 0x476   :  { %v556_v49 = vmul.f32 %v554_v47, %v551_v45 }
 0x478   :  { %v3078_v50 = vadd.f32 %v557_v48, %v556_v49 }
 0x47a   :  { %560 = vrot.lane.b32.xlu0 %v3078_v50, %s2802_s3 }
 0x4a2   :  { %v67_v18 = vpop.permute.xlu1 %66 }
 0x4a3   :  { %vm83_vm12 = vcmp.eq.s32.totalorder %v2944_v21, %v67_v18 }
 0x4a4   :  { %v2474_v19 = vsel %vm83_vm12, 1.0, %v2803_v13 }
 0x4a5   :  { %2483 = vmatmul.msk.f32.gmra.mxu0 %vm111_vm1, %v2474_v19 }
 0x4ec   :  { %v561_v52 = vpop.permute.xlu0 %560 }
 0x4ed   :  { %2503 = vmatmul.msk.f32.vlgmr.msrb.gmra.mxu2 %vm191_vm4, %v561_v52  ;;  %2505 = vmatmul.msk.f32.vlgmr.msrb.gmra.mxu3 %vm191_vm4, %v561_v52 }
 0x4ee   :  { %740 = vmatpush.msrb.mxu2 %v2958_v32  ;;  %784 = vmatpush.msrb.mxu3 %v2951_v27 }
 0x4f0   :  { %741 = vmatpush.msrb.mxu2 %v2956_v31  ;;  %785 = vmatpush.msrb.mxu3 %v2949_v26 }
 0x4f2   :  { %742 = vmatpush.msrb.mxu2 %v2964_v34  ;;  %786 = vmatpush.msrb.mxu3 %v2953_v28 }
 0x4f4   :  { %743 = vmatpush.msrb.mxu2 %v2968_v36  ;;  %787 = vmatpush.msrb.mxu3 %v2960_v33 }
 0x4f5   :  { %2507 = vmatmul.msk.f32.vlgmr.msra.gmra.mxu2 %vm191_vm4, %v561_v52 }
 0x4f6   :  { %824 = vmatpush.msra.mxu2 %v2881_v2 }
 0x4f8   :  { %825 = vmatpush.msra.mxu2 %v2897_v5 }
 0x4fa   :  { %826 = vmatpush.msra.mxu2 %v2891_v4 }
 0x4fc   :  { %827 = vmatpush.msra.mxu2 %v2886_v3 }
 0x522   :  { %v3119_v42 = vpop.f32.mrf.mxu0 }
 0x523   :  { %2491 = vmatmul.msk.f32.gmra.mxu1 %vm191_vm4, %v3119_v42 }
 0x570   :  { %v581_v55 = vpop.f32.mrf.mxu2  ;;  %v621_v56 = vpop.f32.mrf.mxu3 }
 0x571   :  { %v584_v57 = vadd.f32 %v581_v55, %v263_v54  ;;  %625 = vrot.lane.b32.xlu0 %v621_v56, %s2804_s2 }
 0x573   :  { %v2504_v58 = vmul.f32 -1.442695, %v584_v57 }
 0x575   :  { %2656 = vpow2.f32 %v2504_v58 }
 0x578   :  { %v665_v10 = vpop.f32.mrf.mxu2 }
 0x579   :  { %69 = vperm.xlu0 %2587, %v50_v59   ;;  %v666_v15 = vadd.f32 %v665_v10, %v3035_v61  ;;  %v51_v10 = vld [vmem:[%s3631_s0 + $0x28] sm:$0xff] }
 0x57b   :  { %v2657_v60 = vpop.eup %2656 }
 0x57c   :  { %v588_v62 = vadd.f32 1.0, %v2657_v60 }
 0x57e   :  { %2658 = vrcp.f32 %v588_v62  ;;  %v600_v6 = vand.u32 2147483648, %v588_v62  ;;  %v598_v9 = vand.u32 2147483647, %v588_v62  ;;  %vm594_vm9 = vweird.f32 %v588_v62 }
 0x580   :  { %v601_v12 = vor.u32 1.1754944e-38, %v600_v6  ;;  %vm599_vm11 = vcmp.eq.f32.partialorder %v598_v9, 8.507059e+37 }
 0x584   :  { %v2659_v63 = vpop.eup %2658 }
 0x585   :  { %v590_v0 = vmul.f32 %v2659_v63, %v588_v62  ;;  %vm595_vm8 = vweird.f32 %v2659_v63 }
 0x586   :  { %vm596_vm10 = vmor %vm594_vm9, %vm595_vm8 }
 0x587   :  { %v591_v1 = vsub.f32 1.0, %v590_v0 }
 0x589   :  { %v592_v7 = vmul.f32 %v2659_v63, %v591_v1 }
 0x58b   :  { %v593_v11 = vadd.f32 %v2659_v63, %v592_v7 }
 0x58d   :  { %v597_v14 = vsel %vm596_vm10, %v2659_v63, %v593_v11 }
 0x58e   :  { %v602_v16 = vsel %vm599_vm11, %v601_v12, %v597_v14  ;;  %v53_v14 = vld [vmem:[%s3631_s0 + $0x38] sm:$0xff] }
 0x58f   :  { %v668_v17 = vmul.f32 %v666_v15, %v602_v16 }
 0x591   :  { %670 = vrot.lane.b32.xlu2 %v668_v17, %s2801_s22 }
 0x5e3   :  { %v626_v20 = vpop.permute.xlu0 %625 }
 0x5e4   :  { %v628_v35 = vadd.f32 %v626_v20, %v263_v54 }
 0x5e6   :  { %v2506_v37 = vmul.f32 -1.442695, %v628_v35 }
 0x5eb   :  { %v70_v23 = vpop.permute.xlu0 %69  ;;  %v671_v24 = vpop.permute.xlu2 %670 }
 0x5ec   :  { %vm84_vm13 = vcmp.eq.s32.totalorder %v2944_v21, %v70_v23  ;;  %v673_v25 = vadd.f32 %v671_v24, %v274_v22 }
 0x5ed   :  { %v2475_v29 = vsel %vm84_vm13, 1.0, %v2803_v13 }
 0x5ee   :  { %2660 = vtanh.f32 %v673_v25  ;;  %2484 = vmatmul.msk.f32.gmra.mxu0 %vm111_vm1, %v2475_v29 }
 0x5ef   :  { %2662 = vpow2.f32 %v2506_v37 }
 0x5f4   :  { %v2661_v30 = vpop.eup %2660 }
 0x5f5   :  { %677 = vrot.lane.b32.xlu1 %v2661_v30, %s2802_s3  ;;  %v2663_v38 = vpop.eup %2662 }
 0x5f6   :  { %v632_v39 = vadd.f32 1.0, %v2663_v38 }
 0x5f8   :  { %2664 = vrcp.f32 %v632_v39  ;;  %v644_v52 = vand.u32 2147483648, %v632_v39  ;;  %vm638_vm15 = vweird.f32 %v632_v39  ;;  %v642_v44 = vand.u32 2147483647, %v632_v39 }
 0x5fa   :  { %v645_v54 = vor.u32 1.1754944e-38, %v644_v52  ;;  %vm643_vm2 = vcmp.eq.f32.partialorder %v642_v44, 8.507059e+37 }
 0x5fe   :  { %v2665_v43 = vpop.eup %2664 }
 0x5ff   :  { %v634_v45 = vmul.f32 %v2665_v43, %v632_v39  ;;  %vm639_vm14 = vweird.f32 %v2665_v43 }
 0x600   :  { %vm640_vm0 = vmor %vm638_vm15, %vm639_vm14 }
 0x601   :  { %v635_v47 = vsub.f32 1.0, %v634_v45 }
 0x603   :  { %v636_v48 = vmul.f32 %v2665_v43, %v635_v47 }
 0x605   :  { %v637_v49 = vadd.f32 %v2665_v43, %v636_v48 }
 0x607   :  { %v641_v53 = vsel %vm640_vm0, %v2665_v43, %v637_v49 }
 0x608   :  { %v646_v55 = vsel %vm643_vm2, %v645_v54, %v641_v53 }
 0x609   :  { %v675_v56 = vsub.f32 1.0, %v646_v55  ;;  %v681_v58 = vmul.f32 %v646_v55, %v3078_v50  ;;  %v242_v50 = vpop.f32.mrf.mxu1 }
 0x60a   :  { %v264_v0 = vadd.f32 %v3032_v46, %v242_v50  ;;  %v275_v43 = vadd.f32 %v3042_v8, %v242_v50 }
 0x667   :  { %v678_v57 = vpop.permute.xlu1 %677 }
 0x668   :  { %v680_v59 = vmul.f32 %v678_v57, %v675_v56 }
 0x66a   :  { %v3124_v60 = vadd.f32 %v681_v58, %v680_v59 }
 0x66b   :  { %v3126_v62 = vpop.f32.mrf.mxu0 }
 0x66c   :  { %2492 = vmatmul.msk.f32.gmra.mxu1 %vm191_vm4, %v3126_v62  ;;  %684 = vrot.lane.b32.xlu2 %v3124_v60, %s2802_s3 }
 0x6c6   :  { %v685_v63 = vpop.permute.xlu2 %684 }
 0x6c7   :  { %2508 = vmatmul.msk.f32.vlgmr.msra.gmra.mxu3 %vm191_vm4, %v685_v63  ;;  %2510 = vmatmul.msk.f32.vlgmr.msrb.gmra.mxu2 %vm191_vm4, %v685_v63 }
 0x6c8   :  { %864 = vmatpush.msra.mxu3 %v2958_v32  ;;  %908 = vmatpush.msrb.mxu2 %v2951_v27 }
 0x6ca   :  { %865 = vmatpush.msra.mxu3 %v2956_v31  ;;  %909 = vmatpush.msrb.mxu2 %v2949_v26 }
 0x6cc   :  { %866 = vmatpush.msra.mxu3 %v2964_v34  ;;  %910 = vmatpush.msrb.mxu2 %v2953_v28 }
 0x6ce   :  { %867 = vmatpush.msra.mxu3 %v2968_v36  ;;  %911 = vmatpush.msrb.mxu2 %v2960_v33 }
 0x6cf   :  { %2512 = vmatmul.msk.f32.vlgmr.msrb.gmra.mxu3 %vm191_vm4, %v685_v63 }
 0x6d0   :  { %948 = vmatpush.msrb.mxu3 %v2881_v2 }
 0x6d2   :  { %949 = vmatpush.msrb.mxu3 %v2897_v5 }
 0x6d4   :  { %950 = vmatpush.msrb.mxu3 %v2891_v4 }
 0x6d6   :  { %951 = vmatpush.msrb.mxu3 %v2886_v3 }
 0x74a   :  { %v705_v1 = vpop.f32.mrf.mxu3  ;;  %v745_v6 = vpop.f32.mrf.mxu2 }
 0x74b   :  { %v708_v7 = vadd.f32 %v705_v1, %v264_v0  ;;  %749 = vrot.lane.b32.xlu2 %v745_v6, %s2804_s2 }
 0x74d   :  { %v2509_v9 = vmul.f32 -1.442695, %v708_v7 }
 0x74f   :  { %2666 = vpow2.f32 %v2509_v9 }
 0x752   :  { %v789_v22 = vpop.f32.mrf.mxu3 }
 0x753   :  { %72 = vperm.xlu2 %2608, %v51_v10   ;;  %v790_v29 = vadd.f32 %v789_v22, %v3035_v61 }
 0x755   :  { %v2667_v11 = vpop.eup %2666 }
 0x756   :  { %v712_v12 = vadd.f32 1.0, %v2667_v11 }
 0x758   :  { %2668 = vrcp.f32 %v712_v12  ;;  %v724_v18 = vand.u32 2147483648, %v712_v12  ;;  %v722_v20 = vand.u32 2147483647, %v712_v12  ;;  %vm718_vm5 = vweird.f32 %v712_v12 }
 0x75a   :  { %v725_v24 = vor.u32 1.1754944e-38, %v724_v18  ;;  %vm723_vm7 = vcmp.eq.f32.partialorder %v722_v20, 8.507059e+37 }
 0x75b   :  { %78 = vperm.xlu2 %2608, %v53_v14   ;;  %v52_v14 = vld [vmem:[%s3631_s0 + $0x30] sm:$0xff] }
 0x75e   :  { %v2669_v15 = vpop.eup %2668 }
 0x75f   :  { %v714_v16 = vmul.f32 %v2669_v15, %v712_v12  ;;  %vm719_vm3 = vweird.f32 %v2669_v15 }
 0x760   :  { %vm720_vm6 = vmor %vm718_vm5, %vm719_vm3 }
 0x761   :  { %v715_v17 = vsub.f32 1.0, %v714_v16 }
 0x763   :  { %v716_v19 = vmul.f32 %v2669_v15, %v715_v17 }
 0x765   :  { %v717_v23 = vadd.f32 %v2669_v15, %v716_v19 }
 0x767   :  { %v721_v25 = vsel %vm720_vm6, %v2669_v15, %v717_v23 }
 0x768   :  { %v726_v30 = vsel %vm723_vm7, %v725_v24, %v721_v25 }
 0x769   :  { %v792_v35 = vmul.f32 %v790_v29, %v726_v30 }
 0x76b   :  { %794 = vrot.lane.b32.xlu1 %v792_v35, %s2801_s22 }
 0x7a5   :  { %v750_v37 = vpop.permute.xlu2 %749 }
 0x7a6   :  { %v752_v49 = vadd.f32 %v750_v37, %v264_v0 }
 0x7a8   :  { %v2511_v52 = vmul.f32 -1.442695, %v752_v49 }
 0x7ad   :  { %v73_v38 = vpop.permute.xlu2 %72 }
 0x7ae   :  { %vm85_vm8 = vcmp.eq.s32.totalorder %v2944_v21, %v73_v38 }
 0x7af   :  { %v2476_v39 = vsel %vm85_vm8, 1.0, %v2803_v13 }
 0x7b0   :  { %2485 = vmatmul.msk.f32.gmra.mxu0 %vm111_vm1, %v2476_v39 }
 0x7dd   :  { %v795_v45 = vpop.permute.xlu1 %794 }
 0x7de   :  { %v797_v47 = vadd.f32 %v795_v45, %v275_v43 }
 0x7e0   :  { %2670 = vtanh.f32 %v797_v47 }
 0x7e1   :  { %2672 = vpow2.f32 %v2511_v52 }
 0x7e6   :  { %v2671_v48 = vpop.eup %2670 }
 0x7e7   :  { %801 = vrot.lane.b32.xlu0 %v2671_v48, %s2802_s3  ;;  %v2673_v53 = vpop.eup %2672 }
 0x7e8   :  { %v756_v54 = vadd.f32 1.0, %v2673_v53 }
 0x7ea   :  { %2674 = vrcp.f32 %v756_v54  ;;  %v768_v63 = vand.u32 2147483648, %v756_v54  ;;  %vm762_vm10 = vweird.f32 %v756_v54  ;;  %v766_v50 = vand.u32 2147483647, %v756_v54 }
 0x7ec   :  { %v769_v1 = vor.u32 1.1754944e-38, %v768_v63  ;;  %vm767_vm12 = vcmp.eq.f32.partialorder %v766_v50, 8.507059e+37 }
 0x7f0   :  { %v2675_v55 = vpop.eup %2674 }
 0x7f1   :  { %v758_v56 = vmul.f32 %v2675_v55, %v756_v54  ;;  %vm763_vm9 = vweird.f32 %v2675_v55 }
 0x7f2   :  { %vm764_vm11 = vmor %vm762_vm10, %vm763_vm9 }
 0x7f3   :  { %v759_v57 = vsub.f32 1.0, %v758_v56 }
 0x7f5   :  { %v760_v58 = vmul.f32 %v2675_v55, %v759_v57 }
 0x7f7   :  { %v761_v59 = vadd.f32 %v2675_v55, %v760_v58 }
 0x7f9   :  { %v765_v0 = vsel %vm764_vm11, %v2675_v55, %v761_v59 }
 0x7fa   :  { %v770_v6 = vsel %vm767_vm12, %v769_v1, %v765_v0 }
 0x7fb   :  { %v799_v7 = vsub.f32 1.0, %v770_v6  ;;  %v805_v10 = vmul.f32 %v770_v6, %v3124_v60 }
 0x82d   :  { %v3162_v44 = vpop.f32.mrf.mxu0 }
 0x82e   :  { %2493 = vmatmul.msk.f32.gmra.mxu1 %vm191_vm4, %v3162_v44 }
 0x859   :  { %v802_v9 = vpop.permute.xlu0 %801 }
 0x85a   :  { %v804_v11 = vmul.f32 %v802_v9, %v799_v7 }
 0x85c   :  { %v3167_v12 = vadd.f32 %v805_v10, %v804_v11 }
 0x85e   :  { %808 = vrot.lane.b32.xlu1 %v3167_v12, %s2802_s3 }
 0x866   :  { %75 = vperm.xlu1 %2609, %v52_v14  }
 0x8d0   :  { %v809_v15 = vpop.permute.xlu1 %808 }
 0x8d1   :  { %2513 = vmatmul.msk.f32.vlgmr.msra.gmra.mxu2 %vm191_vm4, %v809_v15  ;;  %2515 = vmatmul.msk.f32.vlgmr.msra.gmra.mxu3 %vm191_vm4, %v809_v15 }
 0x8d2   :  { %1032 = vmatpush.msra.mxu2 %v2951_v27  ;;  %1072 = vmatpush.msra.mxu3 %v2881_v2 }
 0x8d4   :  { %1033 = vmatpush.msra.mxu2 %v2949_v26  ;;  %1073 = vmatpush.msra.mxu3 %v2897_v5  ;;  %v79_v26 = vpop.permute.xlu2 %78 }
 0x8d5   :  { %vm87_vm14 = vcmp.eq.s32.totalorder %v2944_v21, %v79_v26 }
 0x8d6   :  { %1034 = vmatpush.msra.mxu2 %v2953_v28  ;;  %1074 = vmatpush.msra.mxu3 %v2891_v4  ;;  %v2478_v28 = vsel %vm87_vm14, 1.0, %v2803_v13 }
 0x8d8   :  { %1035 = vmatpush.msra.mxu2 %v2960_v33  ;;  %v76_v60 = vpop.permute.xlu1 %75  ;;  %1075 = vmatpush.msra.mxu3 %v2886_v3  ;;  %v245_v33 = vpop.f32.mrf.mxu1 }
 0x8d9   :  { %vm86_vm13 = vcmp.eq.s32.totalorder %v2944_v21, %v76_v60  ;;  %2517 = vmatmul.msk.f32.vlgmr.msrb.gmra.mxu2 %vm191_vm4, %v809_v15  ;;  %v265_v16 = vadd.f32 %v3032_v46, %v245_v33  ;;  %v276_v45 = vadd.f32 %v3042_v8, %v245_v33 }
 0x8da   :  { %v2477_v27 = vsel %vm86_vm13, 1.0, %v2803_v13  ;;  %1196 = vmatpush.msrb.mxu2 %v2881_v2 }
 0x8db   :  { %2486 = vmatmul.msk.f32.gmra.mxu0 %vm111_vm1, %v2477_v27 }
 0x8dc   :  { %1197 = vmatpush.msrb.mxu2 %v2897_v5 }
 0x8de   :  { %1198 = vmatpush.msrb.mxu2 %v2891_v4 }
 0x8e0   :  { %1199 = vmatpush.msrb.mxu2 %v2886_v3 }
 0x8e3   :  { %2487 = vmatmul.msk.f32.gmra.mxu0 %vm111_vm1, %v2478_v28 }
 0x954   :  { %v829_v17 = vpop.f32.mrf.mxu2  ;;  %v869_v43 = vpop.f32.mrf.mxu3 }
 0x955   :  { %v832_v2 = vadd.f32 %v829_v17, %v265_v16 }
 0x957   :  { %v2514_v18 = vmul.f32 -1.442695, %v832_v2 }
 0x958   :  { %v3196_v19 = vpop.f32.mrf.mxu0 }
 0x959   :  { %2676 = vpow2.f32 %v2514_v18  ;;  %2494 = vmatmul.msk.f32.gmra.mxu1 %vm191_vm4, %v3196_v19 }
 0x95c   :  { %v913_v25 = vpop.f32.mrf.mxu2 }
 0x95d   :  { %v914_v37 = vadd.f32 %v913_v25, %v3035_v61 }
 0x95f   :  { %v2677_v4 = vpop.eup %2676 }
 0x960   :  { %v836_v5 = vadd.f32 1.0, %v2677_v4  ;;  %v3200_v21 = vpop.f32.mrf.mxu0 }
 0x961   :  { %2495 = vmatmul.msk.f32.gmra.mxu1 %vm191_vm4, %v3200_v21 }
 0x962   :  { %2678 = vrcp.f32 %v836_v5  ;;  %v848_v22 = vand.u32 2147483648, %v836_v5  ;;  %v846_v24 = vand.u32 2147483647, %v836_v5  ;;  %vm842_vm15 = vweird.f32 %v836_v5 }
 0x964   :  { %v849_v30 = vor.u32 1.1754944e-38, %v848_v22  ;;  %vm847_vm2 = vcmp.eq.f32.partialorder %v846_v24, 8.507059e+37 }
 0x968   :  { %v2679_v3 = vpop.eup %2678 }
 0x969   :  { %v838_v13 = vmul.f32 %v2679_v3, %v836_v5  ;;  %vm843_vm1 = vweird.f32 %v2679_v3 }
 0x96a   :  { %vm844_vm0 = vmor %vm842_vm15, %vm843_vm1 }
 0x96b   :  { %v839_v20 = vsub.f32 1.0, %v838_v13 }
 0x96d   :  { %v840_v23 = vmul.f32 %v2679_v3, %v839_v20 }
 0x96f   :  { %v841_v29 = vadd.f32 %v2679_v3, %v840_v23 }
 0x971   :  { %v845_v35 = vsel %vm844_vm0, %v2679_v3, %v841_v29 }
 0x972   :  { %v850_v38 = vsel %vm847_vm2, %v849_v30, %v845_v35 }
 0x973   :  { %v916_v39 = vmul.f32 %v914_v37, %v850_v38 }
 0x975   :  { %918 = vrot.lane.b32.xlu0 %v916_v39, %s2801_s22 }
 0x97d   :  { %873 = vrot.lane.b32.xlu0 %v869_v43, %s2804_s2 }
 0x9e7   :  { %v919_v47 = vpop.permute.xlu0 %918 }
 0x9e8   :  { %v921_v48 = vadd.f32 %v919_v47, %v276_v45 }
 0x9ea   :  { %2680 = vtanh.f32 %v921_v48 }
 0x9ef   :  { %v874_v52 = vpop.permute.xlu0 %873 }
 0x9f0   :  { %v2681_v49 = vpop.eup %2680  ;;  %v876_v53 = vadd.f32 %v874_v52, %v265_v16 }
 0x9f1   :  { %925 = vrot.lane.b32.xlu1 %v2681_v49, %s2802_s3 }
 0x9f2   :  { %v2516_v54 = vmul.f32 -1.442695, %v876_v53 }
 0x9f4   :  { %2682 = vpow2.f32 %v2516_v54 }
 0x9fa   :  { %v2683_v55 = vpop.eup %2682 }
 0x9fb   :  { %v880_v56 = vadd.f32 1.0, %v2683_v55 }
 0x9fd   :  { %2684 = vrcp.f32 %v880_v56  ;;  %v892_v0 = vand.u32 2147483648, %v880_v56  ;;  %vm886_vm5 = vweird.f32 %v880_v56  ;;  %v890_v1 = vand.u32 2147483647, %v880_v56 }
 0x9ff   :  { %v893_v7 = vor.u32 1.1754944e-38, %v892_v0  ;;  %vm891_vm7 = vcmp.eq.f32.partialorder %v890_v1, 8.507059e+37 }
 0xa03   :  { %v2685_v57 = vpop.eup %2684 }
 0xa04   :  { %v882_v58 = vmul.f32 %v2685_v57, %v880_v56  ;;  %vm887_vm3 = vweird.f32 %v2685_v57 }
 0xa05   :  { %vm888_vm6 = vmor %vm886_vm5, %vm887_vm3 }
 0xa06   :  { %v883_v59 = vsub.f32 1.0, %v882_v58 }
 0xa08   :  { %v884_v63 = vmul.f32 %v2685_v57, %v883_v59 }
 0xa0a   :  { %v885_v50 = vadd.f32 %v2685_v57, %v884_v63 }
 0xa0c   :  { %v889_v6 = vsel %vm888_vm6, %v2685_v57, %v885_v50 }
 0xa0d   :  { %v894_v9 = vsel %vm891_vm7, %v893_v7, %v889_v6 }
 0xa0e   :  { %v923_v10 = vsub.f32 1.0, %v894_v9  ;;  %v929_v14 = vmul.f32 %v894_v9, %v3167_v12  ;;  %v248_v12 = vpop.f32.mrf.mxu1  ;;  %v1306_v9 = vld [vmem:[%s3637_s6 + $0x18] sm:$0xff] }
 0xa0f   :  { %v266_v16 = vadd.f32 %v3032_v46, %v248_v12  ;;  %v277_v35 = vadd.f32 %v3042_v8, %v248_v12 }
 0xa16   :  { %v3221_v26 = vpop.f32.mrf.mxu1 }
 0xa1e   :  { %v3223_v28 = vpop.f32.mrf.mxu1 }
 0xa63   :  { %v926_v11 = vpop.permute.xlu1 %925 }
 0xa64   :  { %v928_v15 = vmul.f32 %v926_v11, %v923_v10  ;;  %v1305_v10 = vld [vmem:[%s3637_s6 + $0x10] sm:$0xff]  ;;  %v1304_v11 = vld [vmem:[%s3637_s6 + $0x8] sm:$0xff] }
 0xa66   :  { %v3210_v60 = vadd.f32 %v929_v14, %v928_v15  ;;  %v1303_v14 = vld [vmem:[%s3637_s6] sm:$0xff] }
 0xa68   :  { %932 = vrot.lane.b32.xlu2 %v3210_v60, %s2802_s3 }
 0xac2   :  { %v933_v27 = vpop.permute.xlu2 %932 }
 0xac3   :  { %2518 = vmatmul.msk.f32.vlgmr.msrb.gmra.mxu3 %vm191_vm4, %v933_v27  ;;  %2520 = vmatmul.msk.f32.vlgmr.msrb.gmra.mxu1 %vm191_vm4, %v933_v27 }
 0xac4   :  { %2522 = vmatmul.msk.f32.vlgmr.msra.gmra.mxu2 %vm191_vm4, %v933_v27  ;;  %1236 = vmatpush.msrb.mxu3 %v2958_v32 }
 0xac5   :  { %1325 = vmatpush.msrb.mxu1 %v1306_v9 }
 0xac6   :  { %1237 = vmatpush.msrb.mxu3 %v2956_v31 }
 0xac7   :  { %1326 = vmatpush.msrb.mxu1 %v1305_v10 }
 0xac8   :  { %1238 = vmatpush.msrb.mxu3 %v2964_v34 }
 0xac9   :  { %1327 = vmatpush.msrb.mxu1 %v1304_v11 }
 0xaca   :  { %1239 = vmatpush.msrb.mxu3 %v2968_v36 }
 0xacb   :  { %1328 = vmatpush.msrb.mxu1 %v1303_v14 }
 0xb40   :  { %v993_v33 = vpop.f32.mrf.mxu1 }
 0xb41   :  { %997 = vrot.lane.b32.xlu1 %v993_v33, %s2804_s2 }
 0xb46   :  { %v953_v17 = vpop.f32.mrf.mxu3 }
 0xb47   :  { %v956_v2 = vadd.f32 %v953_v17, %v266_v16  ;;  %v1037_v20 = vpop.f32.mrf.mxu2 }
 0xb48   :  { %v1038_v25 = vadd.f32 %v1037_v20, %v3035_v61 }
 0xb49   :  { %v2519_v18 = vmul.f32 -1.442695, %v956_v2 }
 0xb4b   :  { %2686 = vpow2.f32 %v2519_v18 }
 0xb51   :  { %v2687_v32 = vpop.eup %2686 }
 0xb52   :  { %v960_v31 = vadd.f32 1.0, %v2687_v32 }
 0xb54   :  { %2688 = vrcp.f32 %v960_v31  ;;  %v972_v5 = vand.u32 2147483648, %v960_v31  ;;  %v970_v13 = vand.u32 2147483647, %v960_v31  ;;  %vm966_vm9 = vweird.f32 %v960_v31 }
 0xb56   :  { %v973_v23 = vor.u32 1.1754944e-38, %v972_v5  ;;  %vm971_vm11 = vcmp.eq.f32.partialorder %v970_v13, 8.507059e+37 }
 0xb5a   :  { %v2689_v34 = vpop.eup %2688 }
 0xb5b   :  { %v962_v4 = vmul.f32 %v2689_v34, %v960_v31  ;;  %vm967_vm8 = vweird.f32 %v2689_v34 }
 0xb5c   :  { %vm968_vm10 = vmor %vm966_vm9, %vm967_vm8 }
 0xb5d   :  { %v963_v36 = vsub.f32 1.0, %v962_v4 }
 0xb5f   :  { %v964_v3 = vmul.f32 %v2689_v34, %v963_v36 }
 0xb61   :  { %v965_v22 = vadd.f32 %v2689_v34, %v964_v3 }
 0xb63   :  { %v969_v24 = vsel %vm968_vm10, %v2689_v34, %v965_v22 }
 0xb64   :  { %v974_v29 = vsel %vm971_vm11, %v973_v23, %v969_v24 }
 0xb65   :  { %v1040_v30 = vmul.f32 %v1038_v25, %v974_v29 }
 0xb67   :  { %1042 = vrot.lane.b32.xlu0 %v1040_v30, %s2801_s22 }
 0xbb3   :  { %v998_v43 = vpop.permute.xlu1 %997 }
 0xbb4   :  { %v1000_v45 = vadd.f32 %v998_v43, %v266_v16  ;;  %v3313_v43 = vld [vmem:[%s3636_s4] ss:$0 sm:$0xff] }
 0xbb6   :  { %v2521_v47 = vmul.f32 -1.442695, %v1000_v45  ;;  %v278_v45 = vadd.f32 %v3313_v43, %v3221_v26 }
 0xbd9   :  { %v1043_v37 = vpop.permute.xlu0 %1042 }
 0xbda   :  { %v1045_v38 = vadd.f32 %v1043_v37, %v277_v35 }
 0xbdc   :  { %2690 = vtanh.f32 %v1045_v38 }
 0xbdd   :  { %2692 = vpow2.f32 %v2521_v47 }
 0xbe2   :  { %v2691_v39 = vpop.eup %2690 }
 0xbe3   :  { %1049 = vrot.lane.b32.xlu2 %v2691_v39, %s2802_s3  ;;  %v2693_v48 = vpop.eup %2692 }
 0xbe4   :  { %v1004_v49 = vadd.f32 1.0, %v2693_v48 }
 0xbe6   :  { %2694 = vrcp.f32 %v1004_v49  ;;  %v1016_v8 = vand.u32 2147483648, %v1004_v49  ;;  %vm1010_vm13 = vweird.f32 %v1004_v49  ;;  %v1014_v57 = vand.u32 2147483647, %v1004_v49 }
 0xbe8   :  { %v1017_v59 = vor.u32 1.1754944e-38, %v1016_v8  ;;  %vm1015_vm1 = vcmp.eq.f32.partialorder %v1014_v57, 8.507059e+37 }
 0xbec   :  { %v2695_v52 = vpop.eup %2694 }
 0xbed   :  { %v1006_v53 = vmul.f32 %v2695_v52, %v1004_v49  ;;  %vm1011_vm12 = vweird.f32 %v2695_v52 }
 0xbee   :  { %vm1012_vm14 = vmor %vm1010_vm13, %vm1011_vm12 }
 0xbef   :  { %v1007_v54 = vsub.f32 1.0, %v1006_v53 }
 0xbf1   :  { %v1008_v55 = vmul.f32 %v2695_v52, %v1007_v54 }
 0xbf3   :  { %v1009_v56 = vadd.f32 %v2695_v52, %v1008_v55 }
 0xbf5   :  { %v1013_v58 = vsel %vm1012_vm14, %v2695_v52, %v1009_v56 }
 0xbf6   :  { %v1018_v63 = vsel %vm1015_vm1, %v1017_v59, %v1013_v58 }
 0xbf7   :  { %v1047_v50 = vsub.f32 1.0, %v1018_v63  ;;  %v1053_v1 = vmul.f32 %v1018_v63, %v3210_v60 }
 0xc3d   :  { %v1050_v0 = vpop.permute.xlu2 %1049 }
 0xc3e   :  { %v1052_v6 = vmul.f32 %v1050_v0, %v1047_v50 }
 0xc40   :  { %v3232_v7 = vadd.f32 %v1053_v1, %v1052_v6 }
 0xc42   :  { %1056 = vrot.lane.b32.xlu0 %v3232_v7, %s2802_s3 }
 0xcb4   :  { %v1057_v15 = vpop.permute.xlu0 %1056 }
 0xcb5   :  { %2523 = vmatmul.msk.f32.vlgmr.msra.gmra.mxu3 %vm191_vm4, %v1057_v15  ;;  %2525 = vmatmul.msk.f32.vlgmr.msrb.gmra.mxu0 %vm191_vm4, %v1057_v15 }
 0xcb6   :  { %2527 = vmatmul.msk.f32.vlgmr.msra.gmra.mxu1 %vm191_vm4, %v1057_v15 }
 0xcbe   :  { %2533 = vmatmul.msk.f32.vlgmr.msrb.gmra.mxu1 %vm191_vm4, %v3013_v40 }
 0xcc6   :  { %2534 = vmatmul.msk.f32.gmra.mxu1 %vm191_vm4, %v3021_v41 }
 0xcce   :  { %2535 = vmatmul.msk.f32.gmra.mxu1 %vm191_vm4, %v3082_v51  ;;  %v267_v51 = vadd.f32 %v3032_v46, %v3221_v26 }
 0xcd6   :  { %2536 = vmatmul.msk.f32.gmra.mxu1 %vm191_vm4, %v3119_v42 }
 0xcde   :  { %2537 = vmatmul.msk.f32.gmra.mxu1 %vm191_vm4, %v3126_v62  ;;  %v2632_v62 = vld [vmem:[%s3638_s8] ss:$0 sm:$0xff] }
 0xce6   :  { %2538 = vmatmul.msk.f32.gmra.mxu1 %vm191_vm4, %v3162_v44 }
 0xcee   :  { %2539 = vmatmul.msk.f32.gmra.mxu1 %vm191_vm4, %v3196_v19 }
 0xcf6   :  { %2540 = vmatmul.msk.f32.gmra.mxu1 %vm191_vm4, %v3200_v21 }
 0xd32   :  { %v1117_v40 = vpop.f32.mrf.mxu0 }
 0xd33   :  { %v1161_v41 = vpop.f32.mrf.mxu1  ;;  %1121 = vrot.lane.b32.xlu2 %v1117_v40, %s2804_s2 }
 0xd34   :  { %v1162_v22 = vadd.f32 %v1161_v41, %v3035_v61  ;;  %v268_v41 = vadd.f32 %v3032_v46, %v3223_v28 }
 0xd38   :  { %v1077_v42 = vpop.f32.mrf.mxu3 }
 0xd39   :  { %v1080_v60 = vadd.f32 %v1077_v42, %v267_v51 }
 0xd3b   :  { %v2524_v44 = vmul.f32 -1.442695, %v1080_v60  ;;  %v3273_v27 = vpop.f32.mrf.mxu1 }
 0xd3c   :  { %v3276_v19 = vadd.f32 %v2632_v62, %v3273_v27 }
 0xd3d   :  { %2696 = vpow2.f32 %v2524_v44 }
 0xd43   :  { %v2697_v21 = vpop.eup %2696  ;;  %v3278_v12 = vpop.f32.mrf.mxu1 }
 0xd44   :  { %v1084_v33 = vadd.f32 1.0, %v2697_v21  ;;  %v3281_v16 = vadd.f32 %v2632_v62, %v3278_v12 }
 0xd46   :  { %2698 = vrcp.f32 %v1084_v33  ;;  %v1096_v34 = vand.u32 2147483648, %v1084_v33  ;;  %v1094_v36 = vand.u32 2147483647, %v1084_v33  ;;  %vm1090_vm0 = vweird.f32 %v1084_v33 }
 0xd48   :  { %v1097_v20 = vor.u32 1.1754944e-38, %v1096_v34  ;;  %vm1095_vm3 = vcmp.eq.f32.partialorder %v1094_v36, 8.507059e+37 }
 0xd4b   :  { %v3283_v17 = vpop.f32.mrf.mxu1 }
 0xd4c   :  { %v2699_v2 = vpop.eup %2698  ;;  %v3286_v18 = vadd.f32 %v2632_v62, %v3283_v17 }
 0xd4d   :  { %v1086_v32 = vmul.f32 %v2699_v2, %v1084_v33  ;;  %vm1091_vm15 = vweird.f32 %v2699_v2 }
 0xd4e   :  { %vm1092_vm2 = vmor %vm1090_vm0, %vm1091_vm15 }
 0xd4f   :  { %v1087_v31 = vsub.f32 1.0, %v1086_v32 }
 0xd51   :  { %v1088_v4 = vmul.f32 %v2699_v2, %v1087_v31 }
 0xd53   :  { %v3288_v5 = vpop.f32.mrf.mxu1  ;;  %v1089_v3 = vadd.f32 %v2699_v2, %v1088_v4 }
 0xd54   :  { %v3291_v13 = vadd.f32 %v2632_v62, %v3288_v5 }
 0xd55   :  { %v1093_v23 = vsel %vm1092_vm2, %v2699_v2, %v1089_v3 }
 0xd56   :  { %v1098_v24 = vsel %vm1095_vm3, %v1097_v20, %v1093_v23 }
 0xd57   :  { %v1164_v25 = vmul.f32 %v1162_v22, %v1098_v24  ;;  %v3334_v24 = vld [vmem:[%s3639_s7 + $0x10] sm:$0xff] }
 0xd59   :  { %1166 = vrot.lane.b32.xlu1 %v1164_v25, %s2801_s22  ;;  %v3339_v25 = vld [vmem:[%s3639_s7 + $0x18] sm:$0xff] }
 0xd5a   :  { %1394 = vmatpush.msra.mxu2 %v3339_v25 }
 0xd5b   :  { %v3295_v29 = vpop.f32.mrf.mxu1 }
 0xd5c   :  { %v3298_v30 = vadd.f32 %v2632_v62, %v3295_v29  ;;  %1395 = vmatpush.msra.mxu2 %v3334_v24 }
 0xd63   :  { %v3300_v35 = vpop.f32.mrf.mxu1 }
 0xd64   :  { %v3303_v37 = vadd.f32 %v2632_v62, %v3300_v35 }
 0xd6b   :  { %v3305_v38 = vpop.f32.mrf.mxu1 }
 0xd6c   :  { %v3308_v39 = vadd.f32 %v2632_v62, %v3305_v38 }
 0xd8d   :  { %v1122_v52 = vpop.permute.xlu2 %1121 }
 0xd8e   :  { %v1124_v53 = vadd.f32 %v1122_v52, %v267_v51 }
 0xd90   :  { %v2526_v54 = vmul.f32 -1.442695, %v1124_v53 }
 0xdcb   :  { %v1167_v47 = vpop.permute.xlu1 %1166 }
 0xdcc   :  { %v1169_v48 = vadd.f32 %v1167_v47, %v278_v45  ;;  %v2610_v45 = vpack.i.bf16 %v3334_v24, %v3339_v25  ;;  %v3355_v47 = vld [vmem:[%s3639_s7] sm:$0xff] }
 0xdce   :  { %2700 = vtanh.f32 %v1169_v48 }
 0xdcf   :  { %2702 = vpow2.f32 %v2526_v54 }
 0xdd4   :  { %v2701_v49 = vpop.eup %2700 }
 0xdd5   :  { %1173 = vrot.lane.b32.xlu0 %v2701_v49, %s2802_s3  ;;  %v2703_v55 = vpop.eup %2702  ;;  %v279_v49 = vadd.f32 %v3313_v43, %v3223_v28 }
 0xdd6   :  { %v1128_v56 = vadd.f32 1.0, %v2703_v55 }
 0xdd8   :  { %2704 = vrcp.f32 %v1128_v56  ;;  %v1140_v26 = vand.u32 2147483648, %v1128_v56  ;;  %vm1134_vm6 = vweird.f32 %v1128_v56  ;;  %v1138_v50 = vand.u32 2147483647, %v1128_v56 }
 0xdda   :  { %v1141_v1 = vor.u32 1.1754944e-38, %v1140_v26  ;;  %vm1139_vm8 = vcmp.eq.f32.partialorder %v1138_v50, 8.507059e+37 }
 0xdde   :  { %v2705_v8 = vpop.eup %2704 }
 0xddf   :  { %v1130_v57 = vmul.f32 %v2705_v8, %v1128_v56  ;;  %vm1135_vm5 = vweird.f32 %v2705_v8 }
 0xde0   :  { %vm1136_vm7 = vmor %vm1134_vm6, %vm1135_vm5 }
 0xde1   :  { %v1131_v58 = vsub.f32 1.0, %v1130_v57 }
 0xde3   :  { %v1132_v59 = vmul.f32 %v2705_v8, %v1131_v58 }
 0xde5   :  { %v1133_v63 = vadd.f32 %v2705_v8, %v1132_v59 }
 0xde7   :  { %v1137_v0 = vsel %vm1136_vm7, %v2705_v8, %v1133_v63 }
 0xde8   :  { %v1142_v6 = vsel %vm1139_vm8, %v1141_v1, %v1137_v0 }
 0xde9   :  { %v1171_v9 = vsub.f32 1.0, %v1142_v6  ;;  %v1177_v11 = vmul.f32 %v1142_v6, %v3232_v7 }
 0xe47   :  { %v1174_v10 = vpop.permute.xlu0 %1173 }
 0xe48   :  { %v1176_v14 = vmul.f32 %v1174_v10, %v1171_v9 }
 0xe4a   :  { %v3319_v15 = vadd.f32 %v1177_v11, %v1176_v14 }
 0xe4c   :  { %1180 = vrot.lane.b32.xlu1 %v3319_v15, %s2802_s3 }
 0xebe   :  { %v1181_v40 = vpop.permute.xlu1 %1180 }
 0xebf   :  { %2528 = vmatmul.msk.f32.vlgmr.msrb.gmra.mxu2 %vm191_vm4, %v1181_v40  ;;  %2530 = vmatmul.msk.f32.vlgmr.msrb.gmra.mxu3 %vm191_vm4, %v1181_v40 }
 0xec0   :  { %2532 = vmatmul.msk.f32.vlgmr.msra.gmra.mxu0 %vm191_vm4, %v1181_v40 }
 0xf3d   :  { %v1285_v4 = vpop.f32.mrf.mxu0 }
 0xf3e   :  { %v1286_v3 = vadd.f32 %v1285_v4, %v3035_v61  ;;  %v3349_v61 = vld [vmem:[%s3639_s7 + $0x8] sm:$0xff] }
 0xf3f   :  { %1396 = vmatpush.msra.mxu2 %v3349_v61  ;;  %v2625_v48 = vpack.i.bf16 %v3355_v47, %v3349_v61 }
 0xf41   :  { %1397 = vmatpush.msra.mxu2 %v3355_v47 }
 0xf42   :  { %v1201_v51 = vpop.f32.mrf.mxu2  ;;  %v1241_v42 = vpop.f32.mrf.mxu3 }
 0xf43   :  { %v1204_v62 = vadd.f32 %v1201_v51, %v268_v41  ;;  %1245 = vrot.lane.b32.xlu0 %v1241_v42, %s2804_s2  ;;  %1551 = vmatpush.msrb.mxu2 %v3339_v25 }
 0xf45   :  { %v2529_v7 = vmul.f32 -1.442695, %v1204_v62  ;;  %1552 = vmatpush.msrb.mxu2 %v3334_v24 }
 0xf47   :  { %2706 = vpow2.f32 %v2529_v7  ;;  %1553 = vmatpush.msrb.mxu2 %v3349_v61 }
 0xf49   :  { %1554 = vmatpush.msrb.mxu2 %v3355_v47 }
 0xf4b   :  { %2611 = vrot.lane.b32.xlu0 %v2610_v45, %s2801_s22 }
 0xf4d   :  { %v2707_v60 = vpop.eup %2706 }
 0xf4e   :  { %v1208_v44 = vadd.f32 1.0, %v2707_v60 }
 0xf50   :  { %2708 = vrcp.f32 %v1208_v44  ;;  %v1220_v32 = vand.u32 2147483648, %v1208_v44  ;;  %v1218_v34 = vand.u32 2147483647, %v1208_v44  ;;  %vm1214_vm10 = vweird.f32 %v1208_v44 }
 0xf52   :  { %v1221_v46 = vor.u32 1.1754944e-38, %v1220_v32  ;;  %vm1219_vm12 = vcmp.eq.f32.partialorder %v1218_v34, 8.507059e+37 }
 0xf53   :  { %2626 = vrot.lane.b32.xlu0 %v2625_v48, %s2802_s3 }
 0xf56   :  { %v2709_v21 = vpop.eup %2708 }
 0xf57   :  { %v1210_v33 = vmul.f32 %v2709_v21, %v1208_v44  ;;  %vm1215_vm9 = vweird.f32 %v2709_v21 }
 0xf58   :  { %vm1216_vm11 = vmor %vm1214_vm10, %vm1215_vm9 }
 0xf59   :  { %v1211_v2 = vsub.f32 1.0, %v1210_v33 }
 0xf5b   :  { %v1212_v31 = vmul.f32 %v2709_v21, %v1211_v2 }
 0xf5d   :  { %v1213_v36 = vadd.f32 %v2709_v21, %v1212_v31 }
 0xf5f   :  { %v1217_v20 = vsel %vm1216_vm11, %v2709_v21, %v1213_v36  ;;  %v1311_v36 = vld [vmem:[%s3638_s8] sm:$0x1] }
 0xf60   :  { %v1222_v22 = vsel %vm1219_vm12, %v1221_v46, %v1217_v20  ;;  %v1312_v46 = vld [vmem:[%s3640_s9] sm:$0x1] }
 0xf61   :  { %v1288_v23 = vmul.f32 %v1286_v3, %v1222_v22  ;;  %v1354_v3 = vadd.f32 %v1312_v46, %v1311_v36 }
 0xf63   :  { %1290 = vrot.lane.b32.xlu2 %v1288_v23, %s2801_s22  ;;  %v3432_v20 = vperm.slane %v1354_v3, 0 }
 0xf65   :  { %v1358_v22 = vadd.f32 %v3432_v20, %v3273_v27 }
 0xfb5   :  { %v1246_v55 = vpop.permute.xlu0 %1245 }
 0xfb6   :  { %v1248_v56 = vadd.f32 %v1246_v55, %v268_v41 }
 0xfb8   :  { %v2531_v8 = vmul.f32 -1.442695, %v1248_v56 }
 0xfbd   :  { %v1291_v52 = vpop.permute.xlu2 %1290  ;;  %v2612_v50 = vpop.permute.xlu0 %2611 }
 0xfbe   :  { %v1293_v53 = vadd.f32 %v1291_v52, %v279_v49  ;;  %v3369_v28 = vunpack.i.h.bf16 %v2612_v50  ;;  %v3371_v43 = vunpack.i.l.bf16 %v2612_v50 }
 0xfc0   :  { %2710 = vtanh.f32 %v1293_v53  ;;  %1511 = vmatpush.msrb.mxu0 %v3371_v43 }
 0xfc1   :  { %2712 = vpow2.f32 %v2531_v8 }
 0xfc2   :  { %1512 = vmatpush.msrb.mxu0 %v3369_v28 }
 0xfc5   :  { %v2627_v2 = vpop.permute.xlu0 %2626 }
 0xfc6   :  { %v2711_v54 = vpop.eup %2710  ;;  %v3410_v34 = vunpack.i.l.bf16 %v2627_v2  ;;  %v3412_v4 = vunpack.i.h.bf16 %v2627_v2 }
 0xfc7   :  { %1297 = vrot.lane.b32.xlu1 %v2711_v54, %s2802_s3  ;;  %v2713_v57 = vpop.eup %2712 }
 0xfc8   :  { %v1252_v58 = vadd.f32 1.0, %v2713_v57 }
 0xfca   :  { %2714 = vrcp.f32 %v1252_v58  ;;  %v1264_v6 = vand.u32 2147483648, %v1252_v58  ;;  %vm1258_vm14 = vweird.f32 %v1252_v58  ;;  %v1262_v9 = vand.u32 2147483647, %v1252_v58 }
 0xfcc   :  { %v1265_v11 = vor.u32 1.1754944e-38, %v1264_v6  ;;  %vm1263_vm15 = vcmp.eq.f32.partialorder %v1262_v9, 8.507059e+37 }
 0xfcf   :  { %2616 = vrot.lane.b32.xlu1 %v2625_v48, %s2801_s22 }
 0xfd0   :  { %v2715_v59 = vpop.eup %2714 }
 0xfd1   :  { %v1254_v63 = vmul.f32 %v2715_v59, %v1252_v58  ;;  %vm1259_vm13 = vweird.f32 %v2715_v59 }
 0xfd2   :  { %vm1260_vm1 = vmor %vm1258_vm14, %vm1259_vm13 }
 0xfd3   :  { %v1255_v26 = vsub.f32 1.0, %v1254_v63 }
 0xfd5   :  { %v1256_v0 = vmul.f32 %v2715_v59, %v1255_v26 }
 0xfd7   :  { %v1257_v1 = vadd.f32 %v2715_v59, %v1256_v0 }
 0xfd9   :  { %v1261_v10 = vsel %vm1260_vm1, %v2715_v59, %v1257_v1 }
 0xfda   :  { %v1266_v14 = vsel %vm1263_vm15, %v1265_v11, %v1261_v10 }
 0xfdb   :  { %v1295_v40 = vsub.f32 1.0, %v1266_v14  ;;  %v1301_v51 = vmul.f32 %v1266_v14, %v3319_v15  ;;  %v2633_v15 = vld [vmem:[%s3640_s9] ss:$0 sm:$0xff] }
 0xfdc   :  { %1496 = vrot.lane.b32.xlu1 %v2633_v15, %s2801_s22 }
0x1039   :  { %v1298_v41 = vpop.permute.xlu1 %1297 }
0x103a   :  { %v1300_v42 = vmul.f32 %v1298_v41, %v1295_v40 }
0x103c   :  { %v3376_v62 = vadd.f32 %v1301_v51, %v1300_v42 }
0x103e   :  { %1378 = vrot.lane.b32.xlu2 %v3376_v62, %s2802_s3 }
0x1041   :  { %v2617_v7 = vpop.permute.xlu1 %2616 }
0x1042   :  { %v3380_v60 = vunpack.i.h.bf16 %v2617_v7  ;;  %v3382_v44 = vunpack.i.l.bf16 %v2617_v7 }
0x1044   :  { %1513 = vmatpush.msrb.mxu0 %v3382_v44 }
0x1046   :  { %2621 = vrot.lane.b32.xlu2 %v2610_v45, %s2802_s3  ;;  %1514 = vmatpush.msrb.mxu0 %v3380_v60 }
0x1048   :  { %1635 = vmatpush.msra.mxu0 %v3371_v43 }
0x104a   :  { %1636 = vmatpush.msra.mxu0 %v3369_v28 }
0x104c   :  { %1637 = vmatpush.msra.mxu0 %v3382_v44 }
0x104e   :  { %1638 = vmatpush.msra.mxu0 %v3380_v60  ;;  %v3437_v59 = vpop.permute.xlu1 %1496 }
0x1098   :  { %v1379_v21 = vpop.permute.xlu2 %1378 }
0x1099   :  { %2541 = vmatmul.msk.f32.vlgmr.msra.gmra.mxu2 %vm191_vm4, %v1379_v21  ;;  %2545 = vmatmul.msk.f32.vlgmr.msrb.gmra.mxu0 %vm191_vm4, %v1379_v21 }
0x109a   :  { %1759 = vmatpush.msrb.mxu0 %v3371_v43  ;;  %1675 = vmatpush.msra.mxu2 %v3339_v25 }
0x109c   :  { %1760 = vmatpush.msrb.mxu0 %v3369_v28  ;;  %1676 = vmatpush.msra.mxu2 %v3334_v24 }
0x109e   :  { %1761 = vmatpush.msrb.mxu0 %v3382_v44  ;;  %1677 = vmatpush.msra.mxu2 %v3349_v61 }
0x10a0   :  { %v2622_v33 = vpop.permute.xlu2 %2621  ;;  %1762 = vmatpush.msrb.mxu0 %v3380_v60  ;;  %1678 = vmatpush.msra.mxu2 %v3355_v47 }
0x10a1   :  { %v3405_v32 = vunpack.i.h.bf16 %v2622_v33  ;;  %v3407_v31 = vunpack.i.l.bf16 %v2622_v33 }
0x10a3   :  { %1450 = vmatpush.msra.mxu3 %v3407_v31 }
0x10a5   :  { %1451 = vmatpush.msra.mxu3 %v3405_v32 }
0x10a7   :  { %1452 = vmatpush.msra.mxu3 %v3410_v34 }
0x10a9   :  { %1453 = vmatpush.msra.mxu3 %v3412_v4 }
0x10aa   :  { %2543 = vmatmul.msk.f32.vlgmr.msra.gmra.mxu3 %vm191_vm4, %v1379_v21 }
0x10ab   :  { %1591 = vmatpush.msrb.mxu3 %v3407_v31 }
0x10ad   :  { %1592 = vmatpush.msrb.mxu3 %v3405_v32 }
0x10af   :  { %1593 = vmatpush.msrb.mxu3 %v3410_v34 }
0x10b1   :  { %1594 = vmatpush.msrb.mxu3 %v3412_v4 }
0x10b3   :  { %1715 = vmatpush.msra.mxu3 %v3407_v31 }
0x10b5   :  { %1716 = vmatpush.msra.mxu3 %v3405_v32 }
0x10b7   :  { %1717 = vmatpush.msra.mxu3 %v3410_v34 }
0x10b9   :  { %1718 = vmatpush.msra.mxu3 %v3412_v4 }
0x1116   :  { %v1516_v27 = vpop.f32.mrf.mxu0 }
0x1117   :  { %v1517_v50 = vadd.f32 %v1516_v27, %v3437_v59 }
0x111c   :  { %v1399_v23 = vpop.f32.mrf.mxu2 }
0x111d   :  { %v1402_v45 = vadd.f32 %v1399_v23, %v1358_v22 }
0x111f   :  { %v2542_v48 = vmul.f32 -1.442695, %v1402_v45 }
0x1121   :  { %2716 = vpow2.f32 %v2542_v48 }
0x1127   :  { %v2717_v49 = vpop.eup %2716 }
0x1128   :  { %v1406_v52 = vadd.f32 1.0, %v2717_v49 }
0x112a   :  { %2718 = vrcp.f32 %v1406_v52  ;;  %v1418_v8 = vand.u32 2147483648, %v1406_v52  ;;  %v1416_v58 = vand.u32 2147483647, %v1406_v52  ;;  %vm1412_vm2 = vweird.f32 %v1406_v52 }
0x112c   :  { %v1419_v26 = vor.u32 1.1754944e-38, %v1418_v8  ;;  %vm1417_vm5 = vcmp.eq.f32.partialorder %v1416_v58, 8.507059e+37 }
0x112d   :  { %v1455_v53 = vpop.f32.mrf.mxu3 }
0x112e   :  { %1459 = vrot.lane.b32.xlu0 %v1455_v53, %s2804_s2 }
0x1130   :  { %v2719_v54 = vpop.eup %2718 }
0x1131   :  { %v1408_v55 = vmul.f32 %v2719_v54, %v1406_v52  ;;  %vm1413_vm0 = vweird.f32 %v2719_v54 }
0x1132   :  { %vm1414_vm3 = vmor %vm1412_vm2, %vm1413_vm0 }
0x1133   :  { %v1409_v56 = vsub.f32 1.0, %v1408_v55 }
0x1135   :  { %v1410_v57 = vmul.f32 %v2719_v54, %v1409_v56 }
0x1137   :  { %v1411_v63 = vadd.f32 %v2719_v54, %v1410_v57 }
0x1139   :  { %v1415_v0 = vsel %vm1414_vm3, %v2719_v54, %v1411_v63 }
0x113a   :  { %v1420_v1 = vsel %vm1417_vm5, %v1419_v26, %v1415_v0 }
0x113b   :  { %v1519_v6 = vmul.f32 %v1517_v50, %v1420_v1 }
0x113d   :  { %1521 = vrot.lane.b32.xlu2 %v1519_v6, %s2801_s22 }
0x1197   :  { %v1522_v9 = vpop.permute.xlu2 %1521 }
0x1198   :  { %v1524_v10 = vadd.f32 %v1522_v9, %v3276_v19 }
0x119a   :  { %2720 = vtanh.f32 %v1524_v10 }
0x11a0   :  { %v2721_v11 = vpop.eup %2720  ;;  %v1460_v14 = vpop.permute.xlu0 %1459 }
0x11a1   :  { %1528 = vrot.lane.b32.xlu1 %v2721_v11, %s2802_s3  ;;  %v1462_v40 = vadd.f32 %v1460_v14, %v1358_v22 }
0x11a3   :  { %v2544_v41 = vmul.f32 -1.442695, %v1462_v40 }
0x11a5   :  { %2722 = vpow2.f32 %v2544_v41 }
0x11ab   :  { %v2723_v51 = vpop.eup %2722 }
0x11ac   :  { %v1466_v42 = vadd.f32 1.0, %v2723_v51 }
0x11ae   :  { %2724 = vrcp.f32 %v1466_v42  ;;  %v1478_v36 = vand.u32 2147483648, %v1466_v42  ;;  %vm1472_vm7 = vweird.f32 %v1466_v42  ;;  %v1476_v19 = vand.u32 2147483647, %v1466_v42 }
0x11b0   :  { %v1479_v3 = vor.u32 1.1754944e-38, %v1478_v36  ;;  %vm1477_vm9 = vcmp.eq.f32.partialorder %v1476_v19, 8.507059e+37 }
0x11b4   :  { %v2725_v7 = vpop.eup %2724 }
0x11b5   :  { %v1468_v15 = vmul.f32 %v2725_v7, %v1466_v42  ;;  %vm1473_vm6 = vweird.f32 %v2725_v7 }
0x11b6   :  { %vm1474_vm8 = vmor %vm1472_vm7, %vm1473_vm6 }
0x11b7   :  { %v1469_v21 = vsub.f32 1.0, %v1468_v15 }
0x11b9   :  { %v1470_v33 = vmul.f32 %v2725_v7, %v1469_v21 }
0x11bb   :  { %v1471_v2 = vadd.f32 %v2725_v7, %v1470_v33 }
0x11bd   :  { %v1475_v46 = vsel %vm1474_vm8, %v2725_v7, %v1471_v2 }
0x11be   :  { %v1480_v23 = vsel %vm1477_vm9, %v1479_v3, %v1475_v46 }
0x11bf   :  { %v1526_v22 = vsub.f32 1.0, %v1480_v23  ;;  %v1532_v48 = vmul.f32 %v1480_v23, %v3376_v62  ;;  %v1359_v62 = vadd.f32 %v3432_v20, %v3278_v12 }
0x1213   :  { %v1529_v45 = vpop.permute.xlu1 %1528 }
0x1214   :  { %v1531_v49 = vmul.f32 %v1529_v45, %v1526_v22 }
0x1216   :  { %v3444_v52 = vadd.f32 %v1532_v48, %v1531_v49 }
0x1218   :  { %1535 = vrot.lane.b32.xlu2 %v3444_v52, %s2802_s3 }
0x1272   :  { %v1536_v53 = vpop.permute.xlu2 %1535 }
0x1273   :  { %2546 = vmatmul.msk.f32.vlgmr.msrb.gmra.mxu2 %vm191_vm4, %v1536_v53  ;;  %2548 = vmatmul.msk.f32.vlgmr.msrb.gmra.mxu3 %vm191_vm4, %v1536_v53 }
0x1274   :  { %2550 = vmatmul.msk.f32.vlgmr.msra.gmra.mxu0 %vm191_vm4, %v1536_v53  ;;  %1839 = vmatpush.msrb.mxu3 %v3407_v31 }
0x1275   :  { %1883 = vmatpush.msra.mxu0 %v3371_v43  ;;  %1799 = vmatpush.msrb.mxu2 %v3339_v25 }
0x1276   :  { %1840 = vmatpush.msrb.mxu3 %v3405_v32 }
0x1277   :  { %1884 = vmatpush.msra.mxu0 %v3369_v28  ;;  %1800 = vmatpush.msrb.mxu2 %v3334_v24 }
0x1278   :  { %1841 = vmatpush.msrb.mxu3 %v3410_v34 }
0x1279   :  { %1885 = vmatpush.msra.mxu0 %v3382_v44  ;;  %1801 = vmatpush.msrb.mxu2 %v3349_v61 }
0x127a   :  { %1842 = vmatpush.msrb.mxu3 %v3412_v4 }
0x127b   :  { %1886 = vmatpush.msra.mxu0 %v3380_v60  ;;  %1802 = vmatpush.msrb.mxu2 %v3355_v47 }
0x12f1   :  { %v1640_v6 = vpop.f32.mrf.mxu0 }
0x12f2   :  { %v1641_v10 = vadd.f32 %v1640_v6, %v3437_v59 }
0x12f6   :  { %v1556_v54 = vpop.f32.mrf.mxu2  ;;  %v1596_v55 = vpop.f32.mrf.mxu3 }
0x12f7   :  { %v1559_v56 = vadd.f32 %v1556_v54, %v1359_v62  ;;  %1600 = vrot.lane.b32.xlu1 %v1596_v55, %s2804_s2 }
0x12f9   :  { %v2547_v8 = vmul.f32 -1.442695, %v1559_v56 }
0x12fb   :  { %2726 = vpow2.f32 %v2547_v8 }
0x1301   :  { %v2727_v57 = vpop.eup %2726 }
0x1302   :  { %v1563_v58 = vadd.f32 1.0, %v2727_v57 }
0x1304   :  { %2728 = vrcp.f32 %v1563_v58  ;;  %v1575_v50 = vand.u32 2147483648, %v1563_v58  ;;  %v1573_v1 = vand.u32 2147483647, %v1563_v58  ;;  %vm1569_vm11 = vweird.f32 %v1563_v58 }
0x1306   :  { %v1576_v12 = vor.u32 1.1754944e-38, %v1575_v50  ;;  %vm1574_vm13 = vcmp.eq.f32.partialorder %v1573_v1, 8.507059e+37 }
0x130a   :  { %v2729_v27 = vpop.eup %2728 }
0x130b   :  { %v1565_v63 = vmul.f32 %v2729_v27, %v1563_v58  ;;  %vm1570_vm10 = vweird.f32 %v2729_v27 }
0x130c   :  { %vm1571_vm12 = vmor %vm1569_vm11, %vm1570_vm10 }
0x130d   :  { %v1566_v26 = vsub.f32 1.0, %v1565_v63 }
0x130f   :  { %v1567_v0 = vmul.f32 %v2729_v27, %v1566_v26 }
0x1311   :  { %v1568_v9 = vadd.f32 %v2729_v27, %v1567_v0 }
0x1313   :  { %v1572_v11 = vsel %vm1571_vm12, %v2729_v27, %v1568_v9 }
0x1314   :  { %v1577_v14 = vsel %vm1574_vm13, %v1576_v12, %v1572_v11 }
0x1315   :  { %v1643_v40 = vmul.f32 %v1641_v10, %v1577_v14 }
0x1317   :  { %1645 = vrot.lane.b32.xlu0 %v1643_v40, %s2801_s22 }
0x1369   :  { %v1601_v7 = vpop.permute.xlu1 %1600 }
0x136a   :  { %v1603_v15 = vadd.f32 %v1601_v7, %v1359_v62 }
0x136c   :  { %v2549_v21 = vmul.f32 -1.442695, %v1603_v15 }
0x1389   :  { %v1646_v41 = vpop.permute.xlu0 %1645 }
0x138a   :  { %v1648_v51 = vadd.f32 %v1646_v41, %v3281_v16 }
0x138c   :  { %2730 = vtanh.f32 %v1648_v51 }
0x138d   :  { %2732 = vpow2.f32 %v2549_v21 }
0x1392   :  { %v2731_v42 = vpop.eup %2730 }
0x1393   :  { %1652 = vrot.lane.b32.xlu2 %v2731_v42, %s2802_s3  ;;  %v2733_v33 = vpop.eup %2732 }
0x1394   :  { %v1607_v2 = vadd.f32 1.0, %v2733_v33 }
0x1396   :  { %2734 = vrcp.f32 %v1607_v2  ;;  %v1619_v22 = vand.u32 2147483648, %v1607_v2  ;;  %vm1613_vm1 = vweird.f32 %v1607_v2  ;;  %v1617_v16 = vand.u32 2147483647, %v1607_v2 }
0x1398   :  { %v1620_v48 = vor.u32 1.1754944e-38, %v1619_v22  ;;  %vm1618_vm0 = vcmp.eq.f32.partialorder %v1617_v16, 8.507059e+37 }
0x139c   :  { %v2735_v36 = vpop.eup %2734 }
0x139d   :  { %v1609_v19 = vmul.f32 %v2735_v36, %v1607_v2  ;;  %vm1614_vm14 = vweird.f32 %v2735_v36 }
0x139e   :  { %vm1615_vm15 = vmor %vm1613_vm1, %vm1614_vm14 }
0x139f   :  { %v1610_v46 = vsub.f32 1.0, %v1609_v19 }
0x13a1   :  { %v1611_v3 = vmul.f32 %v2735_v36, %v1610_v46 }
0x13a3   :  { %v1612_v23 = vadd.f32 %v2735_v36, %v1611_v3 }
0x13a5   :  { %v1616_v45 = vsel %vm1615_vm15, %v2735_v36, %v1612_v23 }
0x13a6   :  { %v1621_v49 = vsel %vm1618_vm0, %v1620_v48, %v1616_v45 }
0x13a7   :  { %v1650_v53 = vsub.f32 1.0, %v1621_v49  ;;  %v1656_v54 = vmul.f32 %v1621_v49, %v3444_v52  ;;  %v1360_v52 = vadd.f32 %v3432_v20, %v3283_v17 }
0x13ed   :  { %v1653_v62 = vpop.permute.xlu2 %1652 }
0x13ee   :  { %v1655_v55 = vmul.f32 %v1653_v62, %v1650_v53 }
0x13f0   :  { %v3471_v56 = vadd.f32 %v1656_v54, %v1655_v55 }
0x13f2   :  { %1659 = vrot.lane.b32.xlu0 %v3471_v56, %s2802_s3 }
0x1464   :  { %v1660_v8 = vpop.permute.xlu0 %1659 }
0x1465   :  { %2551 = vmatmul.msk.f32.vlgmr.msra.gmra.mxu2 %vm191_vm4, %v1660_v8  ;;  %2553 = vmatmul.msk.f32.vlgmr.msra.gmra.mxu3 %vm191_vm4, %v1660_v8 }
0x1466   :  { %2555 = vmatmul.msk.f32.vlgmr.msrb.gmra.mxu0 %vm191_vm4, %v1660_v8  ;;  %1963 = vmatpush.msra.mxu3 %v3407_v31 }
0x1467   :  { %2007 = vmatpush.msrb.mxu0 %v3371_v43  ;;  %1923 = vmatpush.msra.mxu2 %v3339_v25 }
0x1468   :  { %1964 = vmatpush.msra.mxu3 %v3405_v32 }
0x1469   :  { %2008 = vmatpush.msrb.mxu0 %v3369_v28  ;;  %1924 = vmatpush.msra.mxu2 %v3334_v24 }
0x146a   :  { %1965 = vmatpush.msra.mxu3 %v3410_v34 }
0x146b   :  { %2009 = vmatpush.msrb.mxu0 %v3382_v44  ;;  %1925 = vmatpush.msra.mxu2 %v3349_v61 }
0x146c   :  { %1966 = vmatpush.msra.mxu3 %v3412_v4 }
0x146d   :  { %2010 = vmatpush.msrb.mxu0 %v3380_v60  ;;  %1926 = vmatpush.msra.mxu2 %v3355_v47 }
0x14e3   :  { %v1764_v11 = vpop.f32.mrf.mxu0 }
0x14e4   :  { %v1765_v40 = vadd.f32 %v1764_v11, %v3437_v59 }
0x14e8   :  { %v1680_v57 = vpop.f32.mrf.mxu2  ;;  %v1720_v58 = vpop.f32.mrf.mxu3 }
0x14e9   :  { %v1683_v27 = vadd.f32 %v1680_v57, %v1360_v52  ;;  %1724 = vrot.lane.b32.xlu2 %v1720_v58, %s2804_s2 }
0x14eb   :  { %v2552_v63 = vmul.f32 -1.442695, %v1683_v27 }
0x14ed   :  { %2736 = vpow2.f32 %v2552_v63 }
0x14f3   :  { %v2737_v26 = vpop.eup %2736 }
0x14f4   :  { %v1687_v50 = vadd.f32 1.0, %v2737_v26 }
0x14f6   :  { %2738 = vrcp.f32 %v1687_v50  ;;  %v1699_v9 = vand.u32 2147483648, %v1687_v50  ;;  %v1697_v10 = vand.u32 2147483647, %v1687_v50  ;;  %vm1693_vm3 = vweird.f32 %v1687_v50 }
0x14f8   :  { %v1700_v17 = vor.u32 1.1754944e-38, %v1699_v9  ;;  %vm1698_vm6 = vcmp.eq.f32.partialorder %v1697_v10, 8.507059e+37 }
0x14fc   :  { %v2739_v0 = vpop.eup %2738 }
0x14fd   :  { %v1689_v1 = vmul.f32 %v2739_v0, %v1687_v50  ;;  %vm1694_vm2 = vweird.f32 %v2739_v0 }
0x14fe   :  { %vm1695_vm5 = vmor %vm1693_vm3, %vm1694_vm2 }
0x14ff   :  { %v1690_v6 = vsub.f32 1.0, %v1689_v1 }
0x1501   :  { %v1691_v12 = vmul.f32 %v2739_v0, %v1690_v6 }
0x1503   :  { %v1692_v14 = vadd.f32 %v2739_v0, %v1691_v12 }
0x1505   :  { %v1696_v41 = vsel %vm1695_vm5, %v2739_v0, %v1692_v14 }
0x1506   :  { %v1701_v51 = vsel %vm1698_vm6, %v1700_v17, %v1696_v41 }
0x1507   :  { %v1767_v42 = vmul.f32 %v1765_v40, %v1701_v51 }
0x1509   :  { %1769 = vrot.lane.b32.xlu1 %v1767_v42, %s2801_s22 }
0x1543   :  { %v1725_v33 = vpop.permute.xlu2 %1724 }
0x1544   :  { %v1727_v2 = vadd.f32 %v1725_v33, %v1360_v52 }
0x1546   :  { %v2554_v36 = vmul.f32 -1.442695, %v1727_v2 }
0x157b   :  { %v1770_v7 = vpop.permute.xlu1 %1769 }
0x157c   :  { %v1772_v15 = vadd.f32 %v1770_v7, %v3286_v18 }
0x157e   :  { %2740 = vtanh.f32 %v1772_v15 }
0x157f   :  { %2742 = vpow2.f32 %v2554_v36 }
0x1584   :  { %v2741_v21 = vpop.eup %2740 }
0x1585   :  { %1776 = vrot.lane.b32.xlu0 %v2741_v21, %s2802_s3  ;;  %v2743_v19 = vpop.eup %2742 }
0x1586   :  { %v1731_v46 = vadd.f32 1.0, %v2743_v19 }
0x1588   :  { %2744 = vrcp.f32 %v1731_v46  ;;  %v1743_v48 = vand.u32 2147483648, %v1731_v46  ;;  %vm1737_vm8 = vweird.f32 %v1731_v46  ;;  %v1741_v18 = vand.u32 2147483647, %v1731_v46 }
0x158a   :  { %v1744_v53 = vor.u32 1.1754944e-38, %v1743_v48  ;;  %vm1742_vm10 = vcmp.eq.f32.partialorder %v1741_v18, 8.507059e+37 }
0x158e   :  { %v2745_v3 = vpop.eup %2744 }
0x158f   :  { %v1733_v23 = vmul.f32 %v2745_v3, %v1731_v46  ;;  %vm1738_vm7 = vweird.f32 %v2745_v3 }
0x1590   :  { %vm1739_vm9 = vmor %vm1737_vm8, %vm1738_vm7 }
0x1591   :  { %v1734_v22 = vsub.f32 1.0, %v1733_v23 }
0x1593   :  { %v1735_v16 = vmul.f32 %v2745_v3, %v1734_v22 }
0x1595   :  { %v1736_v45 = vadd.f32 %v2745_v3, %v1735_v16 }
0x1597   :  { %v1740_v49 = vsel %vm1739_vm9, %v2745_v3, %v1736_v45 }
0x1598   :  { %v1745_v62 = vsel %vm1742_vm10, %v1744_v53, %v1740_v49 }
0x1599   :  { %v1774_v54 = vsub.f32 1.0, %v1745_v62  ;;  %v1780_v8 = vmul.f32 %v1745_v62, %v3471_v56  ;;  %v1361_v56 = vadd.f32 %v3432_v20, %v3288_v5 }
0x15f7   :  { %v1777_v55 = vpop.permute.xlu0 %1776 }
0x15f8   :  { %v1779_v52 = vmul.f32 %v1777_v55, %v1774_v54 }
0x15fa   :  { %v3498_v57 = vadd.f32 %v1780_v8, %v1779_v52 }
0x15fc   :  { %1783 = vrot.lane.b32.xlu1 %v3498_v57, %s2802_s3 }
0x166e   :  { %v1784_v58 = vpop.permute.xlu1 %1783 }
0x166f   :  { %2556 = vmatmul.msk.f32.vlgmr.msrb.gmra.mxu2 %vm191_vm4, %v1784_v58  ;;  %2558 = vmatmul.msk.f32.vlgmr.msrb.gmra.mxu3 %vm191_vm4, %v1784_v58 }
0x1670   :  { %2560 = vmatmul.msk.f32.vlgmr.msra.gmra.mxu0 %vm191_vm4, %v1784_v58  ;;  %2087 = vmatpush.msrb.mxu3 %v3407_v31 }
0x1671   :  { %2131 = vmatpush.msra.mxu0 %v3371_v43  ;;  %2047 = vmatpush.msrb.mxu2 %v3339_v25 }
0x1672   :  { %2088 = vmatpush.msrb.mxu3 %v3405_v32 }
0x1673   :  { %2132 = vmatpush.msra.mxu0 %v3369_v28  ;;  %2048 = vmatpush.msrb.mxu2 %v3334_v24 }
0x1674   :  { %2089 = vmatpush.msrb.mxu3 %v3410_v34 }
0x1675   :  { %2133 = vmatpush.msra.mxu0 %v3382_v44  ;;  %2049 = vmatpush.msrb.mxu2 %v3349_v61 }
0x1676   :  { %2090 = vmatpush.msrb.mxu3 %v3412_v4 }
0x1677   :  { %2134 = vmatpush.msra.mxu0 %v3380_v60  ;;  %2050 = vmatpush.msrb.mxu2 %v3355_v47 }
0x16ed   :  { %v1888_v17 = vpop.f32.mrf.mxu0 }
0x16ee   :  { %v1889_v41 = vadd.f32 %v1888_v17, %v3437_v59 }
0x16f2   :  { %v1804_v27 = vpop.f32.mrf.mxu2  ;;  %v1844_v63 = vpop.f32.mrf.mxu3 }
0x16f3   :  { %v1807_v26 = vadd.f32 %v1804_v27, %v1361_v56  ;;  %1848 = vrot.lane.b32.xlu0 %v1844_v63, %s2804_s2 }
0x16f5   :  { %v2557_v50 = vmul.f32 -1.442695, %v1807_v26 }
0x16f7   :  { %2746 = vpow2.f32 %v2557_v50 }
0x16fd   :  { %v2747_v0 = vpop.eup %2746 }
0x16fe   :  { %v1811_v1 = vadd.f32 1.0, %v2747_v0 }
0x1700   :  { %2748 = vrcp.f32 %v1811_v1  ;;  %v1823_v10 = vand.u32 2147483648, %v1811_v1  ;;  %v1821_v14 = vand.u32 2147483647, %v1811_v1  ;;  %vm1817_vm12 = vweird.f32 %v1811_v1 }
0x1702   :  { %v1824_v5 = vor.u32 1.1754944e-38, %v1823_v10  ;;  %vm1822_vm14 = vcmp.eq.f32.partialorder %v1821_v14, 8.507059e+37 }
0x1706   :  { %v2749_v6 = vpop.eup %2748 }
0x1707   :  { %v1813_v9 = vmul.f32 %v2749_v6, %v1811_v1  ;;  %vm1818_vm11 = vweird.f32 %v2749_v6 }
0x1708   :  { %vm1819_vm13 = vmor %vm1817_vm12, %vm1818_vm11 }
0x1709   :  { %v1814_v12 = vsub.f32 1.0, %v1813_v9 }
0x170b   :  { %v1815_v11 = vmul.f32 %v2749_v6, %v1814_v12 }
0x170d   :  { %v1816_v40 = vadd.f32 %v2749_v6, %v1815_v11 }
0x170f   :  { %v1820_v51 = vsel %vm1819_vm13, %v2749_v6, %v1816_v40 }
0x1710   :  { %v1825_v42 = vsel %vm1822_vm14, %v1824_v5, %v1820_v51 }
0x1711   :  { %v1891_v7 = vmul.f32 %v1889_v41, %v1825_v42 }
0x1713   :  { %1893 = vrot.lane.b32.xlu2 %v1891_v7, %s2801_s22 }
0x1765   :  { %v1849_v2 = vpop.permute.xlu0 %1848 }
0x1766   :  { %v1851_v36 = vadd.f32 %v1849_v2, %v1361_v56 }
0x1768   :  { %v2559_v19 = vmul.f32 -1.442695, %v1851_v36 }
0x176d   :  { %v1894_v15 = vpop.permute.xlu2 %1893 }
0x176e   :  { %v1896_v21 = vadd.f32 %v1894_v15, %v3291_v13 }
0x1770   :  { %2750 = vtanh.f32 %v1896_v21 }
0x1771   :  { %2752 = vpow2.f32 %v2559_v19 }
0x1776   :  { %v2751_v33 = vpop.eup %2750 }
0x1777   :  { %1900 = vrot.lane.b32.xlu1 %v2751_v33, %s2802_s3  ;;  %v2753_v46 = vpop.eup %2752 }
0x1778   :  { %v1855_v3 = vadd.f32 1.0, %v2753_v46 }
0x177a   :  { %2754 = vrcp.f32 %v1855_v3  ;;  %v1867_v18 = vand.u32 2147483648, %v1855_v3  ;;  %vm1861_vm15 = vweird.f32 %v1855_v3  ;;  %v1865_v13 = vand.u32 2147483647, %v1855_v3 }
0x177c   :  { %v1868_v53 = vor.u32 1.1754944e-38, %v1867_v18  ;;  %vm1866_vm2 = vcmp.eq.f32.partialorder %v1865_v13, 8.507059e+37 }
0x1780   :  { %v2755_v23 = vpop.eup %2754 }
0x1781   :  { %v1857_v22 = vmul.f32 %v2755_v23, %v1855_v3  ;;  %vm1862_vm1 = vweird.f32 %v2755_v23 }
0x1782   :  { %vm1863_vm0 = vmor %vm1861_vm15, %vm1862_vm1 }
0x1783   :  { %v1858_v16 = vsub.f32 1.0, %v1857_v22 }
0x1785   :  { %v1859_v45 = vmul.f32 %v2755_v23, %v1858_v16 }
0x1787   :  { %v1860_v48 = vadd.f32 %v2755_v23, %v1859_v45 }
0x1789   :  { %v1864_v49 = vsel %vm1863_vm0, %v2755_v23, %v1860_v48 }
0x178a   :  { %v1869_v62 = vsel %vm1866_vm2, %v1868_v53, %v1864_v49 }
0x178b   :  { %v1898_v54 = vsub.f32 1.0, %v1869_v62  ;;  %v1904_v8 = vmul.f32 %v1869_v62, %v3498_v57  ;;  %v1362_v57 = vadd.f32 %v3432_v20, %v3295_v29 }
0x17e9   :  { %v1901_v55 = vpop.permute.xlu1 %1900 }
0x17ea   :  { %v1903_v52 = vmul.f32 %v1901_v55, %v1898_v54 }
0x17ec   :  { %v3525_v58 = vadd.f32 %v1904_v8, %v1903_v52 }
0x17ee   :  { %1907 = vrot.lane.b32.xlu2 %v3525_v58, %s2802_s3 }
0x1848   :  { %v1908_v56 = vpop.permute.xlu2 %1907 }
0x1849   :  { %2561 = vmatmul.msk.f32.vlgmr.msra.gmra.mxu2 %vm191_vm4, %v1908_v56  ;;  %2563 = vmatmul.msk.f32.vlgmr.msra.gmra.mxu3 %vm191_vm4, %v1908_v56 }
0x184a   :  { %2565 = vmatmul.msk.f32.vlgmr.msrb.gmra.mxu0 %vm191_vm4, %v1908_v56  ;;  %2211 = vmatpush.msra.mxu3 %v3407_v31 }
0x184b   :  { %2255 = vmatpush.msrb.mxu0 %v3371_v43  ;;  %2171 = vmatpush.msra.mxu2 %v3339_v25 }
0x184c   :  { %2212 = vmatpush.msra.mxu3 %v3405_v32 }
0x184d   :  { %2256 = vmatpush.msrb.mxu0 %v3369_v28  ;;  %2172 = vmatpush.msra.mxu2 %v3334_v24 }
0x184e   :  { %2213 = vmatpush.msra.mxu3 %v3410_v34 }
0x184f   :  { %2257 = vmatpush.msrb.mxu0 %v3382_v44  ;;  %2173 = vmatpush.msra.mxu2 %v3349_v61 }
0x1850   :  { %2214 = vmatpush.msra.mxu3 %v3412_v4 }
0x1851   :  { %2258 = vmatpush.msrb.mxu0 %v3380_v60  ;;  %2174 = vmatpush.msra.mxu2 %v3355_v47 }
0x18c7   :  { %v2012_v17 = vpop.f32.mrf.mxu0 }
0x18c8   :  { %v2013_v5 = vadd.f32 %v2012_v17, %v3437_v59 }
0x18cc   :  { %v1928_v27 = vpop.f32.mrf.mxu2  ;;  %v1968_v63 = vpop.f32.mrf.mxu3 }
0x18cd   :  { %v1931_v26 = vadd.f32 %v1928_v27, %v1362_v57  ;;  %1972 = vrot.lane.b32.xlu1 %v1968_v63, %s2804_s2 }
0x18cf   :  { %v2562_v50 = vmul.f32 -1.442695, %v1931_v26 }
0x18d1   :  { %2756 = vpow2.f32 %v2562_v50 }
0x18d7   :  { %v2757_v0 = vpop.eup %2756 }
0x18d8   :  { %v1935_v1 = vadd.f32 1.0, %v2757_v0 }
0x18da   :  { %2758 = vrcp.f32 %v1935_v1  ;;  %v1947_v10 = vand.u32 2147483648, %v1935_v1  ;;  %v1945_v14 = vand.u32 2147483647, %v1935_v1  ;;  %vm1941_vm5 = vweird.f32 %v1935_v1 }
0x18dc   :  { %v1948_v29 = vor.u32 1.1754944e-38, %v1947_v10  ;;  %vm1946_vm7 = vcmp.eq.f32.partialorder %v1945_v14, 8.507059e+37 }
0x18e0   :  { %v2759_v6 = vpop.eup %2758 }
0x18e1   :  { %v1937_v9 = vmul.f32 %v2759_v6, %v1935_v1  ;;  %vm1942_vm3 = vweird.f32 %v2759_v6 }
0x18e2   :  { %vm1943_vm6 = vmor %vm1941_vm5, %vm1942_vm3 }
0x18e3   :  { %v1938_v12 = vsub.f32 1.0, %v1937_v9 }
0x18e5   :  { %v1939_v11 = vmul.f32 %v2759_v6, %v1938_v12 }
0x18e7   :  { %v1940_v40 = vadd.f32 %v2759_v6, %v1939_v11 }
0x18e9   :  { %v1944_v41 = vsel %vm1943_vm6, %v2759_v6, %v1940_v40 }
0x18ea   :  { %v1949_v51 = vsel %vm1946_vm7, %v1948_v29, %v1944_v41 }
0x18eb   :  { %v2015_v42 = vmul.f32 %v2013_v5, %v1949_v51 }
0x18ed   :  { %2017 = vrot.lane.b32.xlu0 %v2015_v42, %s2801_s22 }
0x193f   :  { %v1973_v33 = vpop.permute.xlu1 %1972 }
0x1940   :  { %v1975_v2 = vadd.f32 %v1973_v33, %v1362_v57 }
0x1942   :  { %v2564_v36 = vmul.f32 -1.442695, %v1975_v2 }
0x195f   :  { %v2018_v7 = vpop.permute.xlu0 %2017 }
0x1960   :  { %v2020_v15 = vadd.f32 %v2018_v7, %v3298_v30 }
0x1962   :  { %2760 = vtanh.f32 %v2020_v15 }
0x1963   :  { %2762 = vpow2.f32 %v2564_v36 }
0x1968   :  { %v2761_v21 = vpop.eup %2760 }
0x1969   :  { %2024 = vrot.lane.b32.xlu2 %v2761_v21, %s2802_s3  ;;  %v2763_v19 = vpop.eup %2762 }
0x196a   :  { %v1979_v46 = vadd.f32 1.0, %v2763_v19 }
0x196c   :  { %2764 = vrcp.f32 %v1979_v46  ;;  %v1991_v48 = vand.u32 2147483648, %v1979_v46  ;;  %vm1985_vm9 = vweird.f32 %v1979_v46  ;;  %v1989_v30 = vand.u32 2147483647, %v1979_v46 }
0x196e   :  { %v1992_v13 = vor.u32 1.1754944e-38, %v1991_v48  ;;  %vm1990_vm11 = vcmp.eq.f32.partialorder %v1989_v30, 8.507059e+37 }
0x1972   :  { %v2765_v3 = vpop.eup %2764 }
0x1973   :  { %v1981_v23 = vmul.f32 %v2765_v3, %v1979_v46  ;;  %vm1986_vm8 = vweird.f32 %v2765_v3 }
0x1974   :  { %vm1987_vm10 = vmor %vm1985_vm9, %vm1986_vm8 }
0x1975   :  { %v1982_v22 = vsub.f32 1.0, %v1981_v23 }
0x1977   :  { %v1983_v16 = vmul.f32 %v2765_v3, %v1982_v22 }
0x1979   :  { %v1984_v45 = vadd.f32 %v2765_v3, %v1983_v16 }
0x197b   :  { %v1988_v18 = vsel %vm1987_vm10, %v2765_v3, %v1984_v45  ;;  %v1364_v3 = vadd.f32 %v3432_v20, %v3305_v38 }
0x197c   :  { %v1993_v49 = vsel %vm1990_vm11, %v1992_v13, %v1988_v18 }
0x197d   :  { %v2022_v53 = vsub.f32 1.0, %v1993_v49  ;;  %v2028_v54 = vmul.f32 %v1993_v49, %v3525_v58 }
0x19c3   :  { %v2025_v62 = vpop.permute.xlu2 %2024 }
0x19c4   :  { %v2027_v55 = vmul.f32 %v2025_v62, %v2022_v53 }
0x19c6   :  { %v3552_v8 = vadd.f32 %v2028_v54, %v2027_v55 }
0x19c8   :  { %2031 = vrot.lane.b32.xlu0 %v3552_v8, %s2802_s3 }
0x1a3a   :  { %v2032_v52 = vpop.permute.xlu0 %2031 }
0x1a3b   :  { %2566 = vmatmul.msk.f32.vlgmr.msrb.gmra.mxu2 %vm191_vm4, %v2032_v52  ;;  %2568 = vmatmul.msk.f32.vlgmr.msrb.gmra.mxu3 %vm191_vm4, %v2032_v52 }
0x1a3c   :  { %2570 = vmatmul.msk.f32.vlgmr.msra.gmra.mxu0 %vm191_vm4, %v2032_v52  ;;  %2335 = vmatpush.msrb.mxu3 %v3407_v31 }
0x1a3d   :  { %2379 = vmatpush.msra.mxu0 %v3371_v43  ;;  %2295 = vmatpush.msrb.mxu2 %v3339_v25  ;;  %v1363_v25 = vadd.f32 %v3432_v20, %v3300_v35 }
0x1a3e   :  { %2336 = vmatpush.msrb.mxu3 %v3405_v32 }
0x1a3f   :  { %2380 = vmatpush.msra.mxu0 %v3369_v28  ;;  %2296 = vmatpush.msrb.mxu2 %v3334_v24 }
0x1a40   :  { %2337 = vmatpush.msrb.mxu3 %v3410_v34 }
0x1a41   :  { %2381 = vmatpush.msra.mxu0 %v3382_v44  ;;  %2297 = vmatpush.msrb.mxu2 %v3349_v61 }
0x1a42   :  { %2338 = vmatpush.msrb.mxu3 %v3412_v4 }
0x1a43   :  { %2382 = vmatpush.msra.mxu0 %v3380_v60  ;;  %2298 = vmatpush.msrb.mxu2 %v3355_v47 }
0x1ab9   :  { %v2136_v56 = vpop.f32.mrf.mxu0 }
0x1aba   :  { %v2137_v27 = vadd.f32 %v2136_v56, %v3437_v59 }
0x1abe   :  { %v2052_v43 = vpop.f32.mrf.mxu2  ;;  %v2092_v32 = vpop.f32.mrf.mxu3 }
0x1abf   :  { %v2055_v28 = vadd.f32 %v2052_v43, %v1363_v25  ;;  %2096 = vrot.lane.b32.xlu2 %v2092_v32, %s2804_s2 }
0x1ac1   :  { %v2567_v24 = vmul.f32 -1.442695, %v2055_v28 }
0x1ac3   :  { %2766 = vpow2.f32 %v2567_v24 }
0x1ac9   :  { %v2767_v31 = vpop.eup %2766 }
0x1aca   :  { %v2059_v44 = vadd.f32 1.0, %v2767_v31 }
0x1acc   :  { %2768 = vrcp.f32 %v2059_v44  ;;  %v2071_v58 = vand.u32 2147483648, %v2059_v44  ;;  %v2069_v47 = vand.u32 2147483647, %v2059_v44  ;;  %vm2065_vm13 = vweird.f32 %v2059_v44 }
0x1ace   :  { %v2072_v35 = vor.u32 1.1754944e-38, %v2071_v58  ;;  %vm2070_vm1 = vcmp.eq.f32.partialorder %v2069_v47, 8.507059e+37 }
0x1ad2   :  { %v2769_v61 = vpop.eup %2768 }
0x1ad3   :  { %v2061_v34 = vmul.f32 %v2769_v61, %v2059_v44  ;;  %vm2066_vm12 = vweird.f32 %v2769_v61 }
0x1ad4   :  { %vm2067_vm14 = vmor %vm2065_vm13, %vm2066_vm12 }
0x1ad5   :  { %v2062_v4 = vsub.f32 1.0, %v2061_v34 }
0x1ad7   :  { %v2063_v60 = vmul.f32 %v2769_v61, %v2062_v4 }
0x1ad9   :  { %v2064_v57 = vadd.f32 %v2769_v61, %v2063_v60 }
0x1adb   :  { %v2068_v63 = vsel %vm2067_vm14, %v2769_v61, %v2064_v57 }
0x1adc   :  { %v2073_v26 = vsel %vm2070_vm1, %v2072_v35, %v2068_v63 }
0x1add   :  { %v2139_v50 = vmul.f32 %v2137_v27, %v2073_v26 }
0x1adf   :  { %2141 = vrot.lane.b32.xlu1 %v2139_v50, %s2801_s22 }
0x1b19   :  { %v2097_v9 = vpop.permute.xlu2 %2096 }
0x1b1a   :  { %v2099_v12 = vadd.f32 %v2097_v9, %v1363_v25 }
0x1b1c   :  { %v2569_v10 = vmul.f32 -1.442695, %v2099_v12 }
0x1b51   :  { %v2142_v0 = vpop.permute.xlu1 %2141 }
0x1b52   :  { %v2144_v1 = vadd.f32 %v2142_v0, %v3303_v37 }
0x1b54   :  { %2770 = vtanh.f32 %v2144_v1 }
0x1b55   :  { %2772 = vpow2.f32 %v2569_v10 }
0x1b5a   :  { %v2771_v6 = vpop.eup %2770 }
0x1b5b   :  { %2148 = vrot.lane.b32.xlu0 %v2771_v6, %s2802_s3  ;;  %v2773_v11 = vpop.eup %2772 }
0x1b5c   :  { %v2103_v14 = vadd.f32 1.0, %v2773_v11  ;;  %v1351_v11 = vpop.f32.mrf.mxu1 }
0x1b5e   :  { %2774 = vrcp.f32 %v2103_v14  ;;  %v2115_v51 = vand.u32 2147483648, %v2103_v14  ;;  %vm2109_vm0 = vweird.f32 %v2103_v14  ;;  %v2113_v37 = vand.u32 2147483647, %v2103_v14 }
0x1b60   :  { %v2116_v7 = vor.u32 1.1754944e-38, %v2115_v51  ;;  %vm2114_vm3 = vcmp.eq.f32.partialorder %v2113_v37, 8.507059e+37 }
0x1b64   :  { %v2775_v17 = vpop.eup %2774 }
0x1b65   :  { %v2105_v40 = vmul.f32 %v2775_v17, %v2103_v14  ;;  %vm2110_vm15 = vweird.f32 %v2775_v17  ;;  %v1365_v14 = vadd.f32 %v3432_v20, %v1351_v11 }
0x1b66   :  { %vm2111_vm2 = vmor %vm2109_vm0, %vm2110_vm15 }
0x1b67   :  { %v2106_v29 = vsub.f32 1.0, %v2105_v40 }
0x1b69   :  { %v2107_v5 = vmul.f32 %v2775_v17, %v2106_v29 }
0x1b6b   :  { %v2108_v41 = vadd.f32 %v2775_v17, %v2107_v5 }
0x1b6d   :  { %v2112_v42 = vsel %vm2111_vm2, %v2775_v17, %v2108_v41 }
0x1b6e   :  { %v2117_v15 = vsel %vm2114_vm3, %v2116_v7, %v2112_v42 }
0x1b6f   :  { %v2146_v21 = vsub.f32 1.0, %v2117_v15  ;;  %v2152_v2 = vmul.f32 %v2117_v15, %v3552_v8 }
0x1bcd   :  { %v2149_v33 = vpop.permute.xlu0 %2148 }
0x1bce   :  { %v2151_v36 = vmul.f32 %v2149_v33, %v2146_v21 }
0x1bd0   :  { %v2153_v19 = vadd.f32 %v2152_v2, %v2151_v36 }
0x1bd2   :  { %2155 = vrot.lane.b32.xlu1 %v2153_v19, %s2802_s3 }
0x1c44   :  { %v2156_v46 = vpop.permute.xlu1 %2155 }
0x1c45   :  { %2571 = vmatmul.msk.f32.vlgmr.msra.gmra.mxu2 %vm191_vm4, %v2156_v46  ;;  %2573 = vmatmul.msk.f32.vlgmr.msra.gmra.mxu3 %vm191_vm4, %v2156_v46 }
0x1c46   :  { %2575 = vmatmul.msk.f32.vlgmr.msrb.gmra.mxu0 %vm191_vm4, %v2156_v46 }
0x1cc3   :  { %v2260_v55 = vpop.f32.mrf.mxu0 }
0x1cc4   :  { %v2261_v52 = vadd.f32 %v2260_v55, %v3437_v59 }
0x1cc8   :  { %v2176_v23 = vpop.f32.mrf.mxu2  ;;  %v2216_v22 = vpop.f32.mrf.mxu3 }
0x1cc9   :  { %v2179_v16 = vadd.f32 %v2176_v23, %v1364_v3  ;;  %2220 = vrot.lane.b32.xlu0 %v2216_v22, %s2804_s2  ;;  %v2799_v22 = vld [vmem:[%s3638_s8] ss:$0 sm:$0xff] }
0x1ccb   :  { %v2572_v45 = vmul.f32 -1.442695, %v2179_v16  ;;  %v1376_v16 = vadd.f32 %v2799_v22, %v1351_v11 }
0x1ccd   :  { %2776 = vpow2.f32 %v2572_v45 }
0x1cd3   :  { %v2777_v48 = vpop.eup %2776 }
0x1cd4   :  { %v2183_v30 = vadd.f32 1.0, %v2777_v48 }
0x1cd6   :  { %2778 = vrcp.f32 %v2183_v30  ;;  %v2195_v53 = vand.u32 2147483648, %v2183_v30  ;;  %v2193_v54 = vand.u32 2147483647, %v2183_v30  ;;  %vm2189_vm6 = vweird.f32 %v2183_v30 }
0x1cd8   :  { %v2196_v38 = vor.u32 1.1754944e-38, %v2195_v53  ;;  %vm2194_vm8 = vcmp.eq.f32.partialorder %v2193_v54, 8.507059e+37  ;;  %v18_v54 = vstv %s3641_s12 }
0x1cd9   :  { %19 = vst [vmem:[#allocation2] sm:$0x1] %v18_v54 }
0x1cdc   :  { %v2779_v18 = vpop.eup %2778 }
0x1cdd   :  { %v2185_v13 = vmul.f32 %v2779_v18, %v2183_v30  ;;  %vm2190_vm5 = vweird.f32 %v2779_v18 }
0x1cde   :  { %vm2191_vm7 = vmor %vm2189_vm6, %vm2190_vm5 }
0x1cdf   :  { %v2186_v49 = vsub.f32 1.0, %v2185_v13 }
0x1ce1   :  { %v2187_v62 = vmul.f32 %v2779_v18, %v2186_v49 }
0x1ce3   :  { %v2188_v8 = vadd.f32 %v2779_v18, %v2187_v62 }
0x1ce5   :  { %v2192_v25 = vsel %vm2191_vm7, %v2779_v18, %v2188_v8 }
0x1ce6   :  { %v2197_v43 = vsel %vm2194_vm8, %v2196_v38, %v2192_v25 }
0x1ce7   :  { %v2263_v32 = vmul.f32 %v2261_v52, %v2197_v43 }
0x1ce9   :  { %2265 = vrot.lane.b32.xlu2 %v2263_v32, %s2801_s22 }
0x1d3b   :  { %v2221_v44 = vpop.permute.xlu0 %2220 }
0x1d3c   :  { %v2223_v61 = vadd.f32 %v2221_v44, %v1364_v3 }
0x1d3e   :  { %v2574_v34 = vmul.f32 -1.442695, %v2223_v61 }
0x1d43   :  { %v2266_v28 = vpop.permute.xlu2 %2265 }
0x1d44   :  { %v2268_v24 = vadd.f32 %v2266_v28, %v3308_v39 }
0x1d46   :  { %2780 = vtanh.f32 %v2268_v24 }
0x1d47   :  { %2782 = vpow2.f32 %v2574_v34 }
0x1d4c   :  { %v2781_v31 = vpop.eup %2780 }
0x1d4d   :  { %2272 = vrot.lane.b32.xlu1 %v2781_v31, %s2802_s3  ;;  %v2783_v4 = vpop.eup %2782 }
0x1d4e   :  { %v2227_v58 = vadd.f32 1.0, %v2783_v4 }
0x1d50   :  { %2784 = vrcp.f32 %v2227_v58  ;;  %v2239_v27 = vand.u32 2147483648, %v2227_v58  ;;  %vm2233_vm10 = vweird.f32 %v2227_v58  ;;  %v2237_v39 = vand.u32 2147483647, %v2227_v58 }
0x1d52   :  { %v2240_v26 = vor.u32 1.1754944e-38, %v2239_v27  ;;  %vm2238_vm12 = vcmp.eq.f32.partialorder %v2237_v39, 8.507059e+37  ;;  %v2423_v27 = vld [vmem:[%s3643_s10 + $0x8] sm:$0xff]  ;;  %v2422_v39 = vld [vmem:[%s3643_s10] sm:$0xff] }
0x1d56   :  { %v2785_v60 = vpop.eup %2784 }
0x1d57   :  { %v2229_v47 = vmul.f32 %v2785_v60, %v2227_v58  ;;  %vm2234_vm9 = vweird.f32 %v2785_v60 }
0x1d58   :  { %vm2235_vm11 = vmor %vm2233_vm10, %vm2234_vm9  ;;  %vm2465_vm10 = vcmask 31744  }
0x1d59   :  { %v2230_v56 = vsub.f32 1.0, %v2229_v47 }
0x1d5b   :  { %v2231_v57 = vmul.f32 %v2785_v60, %v2230_v56 }
0x1d5d   :  { %v2232_v35 = vadd.f32 %v2785_v60, %v2231_v57  ;;  %v2425_v57 = vld [vmem:[%s3643_s10 + $0x18] sm:$0xff] }
0x1d5e   :  { %2447 = vmatpush.msra.mxu1 %v2425_v57 }
0x1d5f   :  { %v2236_v63 = vsel %vm2235_vm11, %v2785_v60, %v2232_v35  ;;  %v2634_v60 = vld [vmem:[#allocation2] ss:$0 sm:$0xff]  ;;  %v2424_v35 = vld [vmem:[%s3643_s10 + $0x10] sm:$0xff] }
0x1d60   :  { %v2241_v50 = vsel %vm2238_vm12, %v2240_v26, %v2236_v63  ;;  %2448 = vmatpush.msra.mxu1 %v2424_v35 }
0x1d61   :  { %v2270_v0 = vsub.f32 1.0, %v2241_v50  ;;  %v2276_v6 = vmul.f32 %v2241_v50, %v2153_v19 }
0x1d62   :  { %2449 = vmatpush.msra.mxu1 %v2423_v27 }
0x1d64   :  { %2450 = vmatpush.msra.mxu1 %v2422_v39 }
0x1dbf   :  { %v2273_v1 = vpop.permute.xlu1 %2272 }
0x1dc0   :  { %v2275_v9 = vmul.f32 %v2273_v1, %v2270_v0 }
0x1dc2   :  { %v3590_v12 = vadd.f32 %v2276_v6, %v2275_v9 }
0x1dc4   :  { %2279 = vrot.lane.b32.xlu2 %v3590_v12, %s2802_s3 }
0x1e1e   :  { %v2280_v10 = vpop.permute.xlu2 %2279 }
0x1e1f   :  { %2576 = vmatmul.msk.f32.vlgmr.msrb.gmra.mxu2 %vm191_vm4, %v2280_v10  ;;  %2578 = vmatmul.msk.f32.vlgmr.msrb.gmra.mxu3 %vm191_vm4, %v2280_v10 }
0x1e20   :  { %2580 = vmatmul.msk.f32.vlgmr.msra.gmra.mxu0 %vm191_vm4, %v2280_v10 }
0x1e9d   :  { %v2384_v2 = vpop.f32.mrf.mxu0 }
0x1e9e   :  { %v2385_v19 = vadd.f32 %v2384_v2, %v3437_v59 }
0x1ea2   :  { %v2300_v17 = vpop.f32.mrf.mxu2  ;;  %v2340_v40 = vpop.f32.mrf.mxu3 }
0x1ea3   :  { %v2303_v29 = vadd.f32 %v2300_v17, %v1365_v14  ;;  %2344 = vrot.lane.b32.xlu1 %v2340_v40, %s2804_s2  ;;  %v2635_v17 = vld [vmem:[%s3642_s11] ss:$0 sm:$0xff] }
0x1ea5   :  { %v2577_v5 = vmul.f32 -1.442695, %v2303_v29 }
0x1ea7   :  { %2786 = vpow2.f32 %v2577_v5 }
0x1ead   :  { %v2787_v41 = vpop.eup %2786 }
0x1eae   :  { %v2307_v51 = vadd.f32 1.0, %v2787_v41 }
0x1eb0   :  { %2788 = vrcp.f32 %v2307_v51  ;;  %v2319_v15 = vand.u32 2147483648, %v2307_v51  ;;  %v2317_v33 = vand.u32 2147483647, %v2307_v51  ;;  %vm2313_vm14 = vweird.f32 %v2307_v51 }
0x1eb2   :  { %v2320_v20 = vor.u32 1.1754944e-38, %v2319_v15  ;;  %vm2318_vm15 = vcmp.eq.f32.partialorder %v2317_v33, 8.507059e+37 }
0x1eb6   :  { %v2789_v37 = vpop.eup %2788 }
0x1eb7   :  { %v2309_v42 = vmul.f32 %v2789_v37, %v2307_v51  ;;  %vm2314_vm13 = vweird.f32 %v2789_v37 }
0x1eb8   :  { %vm2315_vm1 = vmor %vm2313_vm14, %vm2314_vm13 }
0x1eb9   :  { %v2310_v7 = vsub.f32 1.0, %v2309_v42 }
0x1ebb   :  { %v2311_v21 = vmul.f32 %v2789_v37, %v2310_v7 }
0x1ebd   :  { %v2312_v36 = vadd.f32 %v2789_v37, %v2311_v21 }
0x1ebf   :  { %v2316_v46 = vsel %vm2315_vm1, %v2789_v37, %v2312_v36 }
0x1ec0   :  { %v2321_v3 = vsel %vm2318_vm15, %v2320_v20, %v2316_v46 }
0x1ec1   :  { %v2387_v23 = vmul.f32 %v2385_v19, %v2321_v3 }
0x1ec3   :  { %2389 = vrot.lane.b32.xlu0 %v2387_v23, %s2801_s22 }
0x1f15   :  { %v2345_v18 = vpop.permute.xlu1 %2344 }
0x1f16   :  { %v2347_v13 = vadd.f32 %v2345_v18, %v1365_v14 }
0x1f18   :  { %v2579_v59 = vmul.f32 -1.442695, %v2347_v13 }
0x1f35   :  { %v2390_v45 = vpop.permute.xlu0 %2389 }
0x1f36   :  { %v2392_v48 = vadd.f32 %v2390_v45, %v1376_v16 }
0x1f38   :  { %2790 = vtanh.f32 %v2392_v48 }
0x1f39   :  { %2792 = vpow2.f32 %v2579_v59 }
0x1f3e   :  { %v2791_v30 = vpop.eup %2790 }
0x1f3f   :  { %2396 = vrot.lane.b32.xlu2 %v2791_v30, %s2802_s3  ;;  %v2793_v49 = vpop.eup %2792 }
0x1f40   :  { %v2351_v53 = vadd.f32 1.0, %v2793_v49 }
0x1f42   :  { %2794 = vrcp.f32 %v2351_v53  ;;  %v2363_v25 = vand.u32 2147483648, %v2351_v53  ;;  %vm2357_vm2 = vweird.f32 %v2351_v53  ;;  %v2361_v43 = vand.u32 2147483647, %v2351_v53 }
0x1f44   :  { %v2364_v28 = vor.u32 1.1754944e-38, %v2363_v25  ;;  %vm2362_vm5 = vcmp.eq.f32.partialorder %v2361_v43, 8.507059e+37 }
0x1f48   :  { %v2795_v62 = vpop.eup %2794 }
0x1f49   :  { %v2353_v55 = vmul.f32 %v2795_v62, %v2351_v53  ;;  %vm2358_vm0 = vweird.f32 %v2795_v62 }
0x1f4a   :  { %vm2359_vm3 = vmor %vm2357_vm2, %vm2358_vm0 }
0x1f4b   :  { %v2354_v8 = vsub.f32 1.0, %v2353_v55 }
0x1f4d   :  { %v2355_v38 = vmul.f32 %v2795_v62, %v2354_v8 }
0x1f4f   :  { %v2356_v52 = vadd.f32 %v2795_v62, %v2355_v38 }
0x1f51   :  { %v2360_v32 = vsel %vm2359_vm3, %v2795_v62, %v2356_v52 }
0x1f52   :  { %v2365_v24 = vsel %vm2362_vm5, %v2364_v28, %v2360_v32 }
0x1f53   :  { %v2394_v31 = vsub.f32 1.0, %v2365_v24  ;;  %v2400_v61 = vmul.f32 %v2365_v24, %v3590_v12 }
0x1f99   :  { %v2397_v44 = vpop.permute.xlu2 %2396 }
0x1f9a   :  { %v2399_v34 = vmul.f32 %v2397_v44, %v2394_v31 }
0x1f9c   :  { %v2401_v4 = vadd.f32 %v2400_v61, %v2399_v34 }
0x1f9e   :  { %v2402_v58 = vmul.f32 %v2401_v4, %v2401_v4 }
0x1fa0   :  { %2404 = vrot.lane.b32.xlu0 %v2402_v58, %s2802_s3 }
0x1fa8   :  { %2460 = vperm.xlu0 %2587, %v2634_v60  }
0x2012   :  { %v2405_v47 = vpop.permute.xlu0 %2404 }
0x2013   :  { %v2407_v56 = vsel %vm191_vm4, %v2405_v47, 0.0 }
0x2014   :  { %2408 = vadd.xlane.f32.xlu1 %v2407_v56 }
0x201a   :  { %v2461_v5 = vpop.permute.xlu0 %2460 }
0x2087   :  { %v2409_v63 = vpop.xlane.xlu1 %2408 }
0x2088   :  { %v2410_v26 = vadd.f32 1e-24, %v2409_v63 }
0x208a   :  { %2796 = vrsqrt.f32 %v2410_v26  ;;  %vm2417_vm7 = vweird.f32 %v2410_v26 }
0x2090   :  { %v2797_v50 = vpop.eup %2796 }
0x2091   :  { %v2412_v0 = vmul.f32 %v2797_v50, %v2410_v26  ;;  %vm2418_vm6 = vweird.f32 %v2797_v50 }
0x2092   :  { %vm2419_vm8 = vmor %vm2417_vm7, %vm2418_vm6 }
0x2093   :  { %v2413_v1 = vmul.f32 %v2797_v50, %v2412_v0 }
0x2095   :  { %v2414_v6 = vmul.f32 0.5, %v2413_v1 }
0x2097   :  { %v2415_v9 = vsub.f32 1.5, %v2414_v6 }
0x2099   :  { %v2416_v12 = vmul.f32 %v2797_v50, %v2415_v9 }
0x209b   :  { %v2420_v10 = vsel %vm2419_vm8, %v2797_v50, %v2416_v12 }
0x209c   :  { %v2421_v11 = vmul.f32 %v2420_v10, %v2401_v4 }
0x209e   :  { %2431 = vrot.lane.b32.xlu2 %v2421_v11, %s2802_s3 }
0x20f8   :  { %v2432_v14 = vpop.permute.xlu2 %2431 }
0x20f9   :  { %2581 = vmatmul.msk.f32.vlgmr.msra.gmra.mxu1 %vm191_vm4, %v2432_v14 }
0x2176   :  { %v2452_v40 = vpop.f32.mrf.mxu1 }
0x2177   :  { %v2453_v29 = vadd.f32 %v2635_v17, %v2452_v40 }
0x2179   :  { %vm2456_vm9 = vcmp.ge.f32.partialorder %v2453_v29, 0.0  ;;  %v2463_v41 = vmul.f32 %v2461_v5, %v2453_v29 }
0x217b   :  { %v2464_v51 = vsel %vm2456_vm9, %v2453_v29, %v2463_v41 }
0x217c   :  { %2466 = vst.msk [vmem:[%s3644_s13] sm:$0xff] %vm2465_vm10, %v2464_v51 }

</bundles_post_ra>
